<compile_context>
chip_gen: v7x
topology: tpu7x:2x2x1
jax: 0.10.0
libtpu: 0.0.40
codegen_flags: <defaults>
</compile_context>

<pallas_src>
import math
import functools

import jax
import jax.numpy as jnp
from jax.experimental import pallas as pl
from jax.experimental.pallas import tpu as pltpu


# ----------------------------------------------------------------------------
# Per-generation VMEM budget and tile pickers.
# ----------------------------------------------------------------------------
@functools.lru_cache(maxsize=1)
def _vmem_capacity():
    try:
        return int(pltpu.get_tpu_info().vmem_capacity_bytes)
    except Exception:
        return 64 * 1024 * 1024            # conservative (v7x-sized) fallback


def _vmem_limit():
    # 48 MiB budget on v7x (64 MiB VMEM), 96 MiB on v5e/v6e (128 MiB).
    return int(min((_vmem_capacity() * 3) // 4, 96 * 1024 * 1024))


def _ffn_row_cap():
    # h1 (tm, dff) f32 + bf16 copy must fit next to w1/w2 + pipeline buffers.
    return 256 if _vmem_capacity() <= 64 * 1024 * 1024 else 512


def _round_up(n, m):
    return ((n + m - 1) // m) * m


def _largest_divisor(n, cap, multiple):
    for t in range(min(cap, n), 0, -1):
        if n % t == 0 and t % multiple == 0:
            return t
    return None


def _pick_row_tile(m, cap=512):
    """Row (sublane) tile for 2-D (rows, feat) kernels.  Returns (tile, m_pad).
    Prefers exact divisors; prefers >=2 blocks on the parallel axis (v7x
    megacore); pads awkward M to a multiple of 128 instead of one huge block."""
    if m <= cap:
        if m >= 256 and m % 16 == 0:
            return m // 2, m               # >=2 blocks for the 2nd TensorCore
        return m, m
    t = _largest_divisor(m, cap, 128) or _largest_divisor(m, cap, 8)
    if t is not None:
        return t, m
    m_pad = _round_up(m, 128)
    t = _largest_divisor(m_pad, cap, 128) or 128
    return t, m_pad


def _pick_divisor_tile(n, cap):
    """Tile that must divide n exactly (patch rows / attention q rows)."""
    if n <= cap:
        return n
    t = _largest_divisor(n, cap, 128) or _largest_divisor(n, cap, 8)
    if t is not None:
        return t
    # TODO(synk): awkward extents fall back to a single full block (VMEM risk).
    return n


def _pick_k_tile(k, cap=2048):
    """Contraction tile: multiple of 128 so no padded garbage hits the acc."""
    if k <= cap:
        return k
    t = _largest_divisor(k, cap, 128)
    return t if t else k


def _pick_attn_tile(S, nh, cap=256):
    """q-row tile: divides S, keeps the (nh,tq,S) f32 + bf16 score tiles small."""
    budget = 12 * 1024 * 1024
    if S <= cap and nh * S * S * 6 <= budget:
        return S
    for t in range(min(cap, S), 0, -1):
        if S % t == 0 and t % 8 == 0 and nh * t * S * 6 <= budget:
            return t
    return S


# ----------------------------------------------------------------------------
# Generic linear:  (M,K) @ (K,N) bf16  + (1,N) f32  ->  (M,N) f32
# Single-K fast path (no accumulator scratch) + K-tiled accumulator path.
# ----------------------------------------------------------------------------
def _linear_kernel_1k(x_ref, w_ref, b_ref, o_ref):
    o_ref[...] = (jnp.dot(x_ref[...].astype(jnp.bfloat16), w_ref[...],
                          preferred_element_type=jnp.float32)
                  + b_ref[...]).astype(o_ref.dtype)


def _linear_kernel(x_ref, w_ref, b_ref, o_ref, acc_ref):
    @pl.when(pl.program_id(1) == 0)
    def _():
        acc_ref[...] = jnp.zeros_like(acc_ref)

    acc_ref[...] += jnp.dot(x_ref[...].astype(jnp.bfloat16), w_ref[...],
                            preferred_element_type=jnp.float32)

    @pl.when(pl.program_id(1) == pl.num_programs(1) - 1)
    def _():
        o_ref[...] = (acc_ref[...] + b_ref[...]).astype(o_ref.dtype)


def linear(x, w, b):
    M, K = x.shape
    N = w.shape[1]
    tm, m_pad = _pick_row_tile(M)
    if m_pad != M:
        x = jnp.pad(x, ((0, m_pad - M), (0, 0)))
    tk = _pick_k_tile(K)

    if tk == K:                                   # single K step: no scratch
        out = pl.pallas_call(
            _linear_kernel_1k,
            out_shape=jax.ShapeDtypeStruct((m_pad, N), jnp.float32),
            grid_spec=pltpu.PrefetchScalarGridSpec(
                num_scalar_prefetch=0,
                grid=(m_pad // tm,),
                in_specs=[
                    pl.BlockSpec((tm, K), lambda i: (i, 0)),
                    pl.BlockSpec((K, N), lambda i: (0, 0)),
                    pl.BlockSpec((1, N), lambda i: (0, 0)),
                ],
                out_specs=pl.BlockSpec((tm, N), lambda i: (i, 0)),
            ),
            compiler_params=pltpu.CompilerParams(
                dimension_semantics=("parallel",),
                vmem_limit_bytes=_vmem_limit(),
            ),
        )(x, w, b)
    else:
        out = pl.pallas_call(
            _linear_kernel,
            out_shape=jax.ShapeDtypeStruct((m_pad, N), jnp.float32),
            grid_spec=pltpu.PrefetchScalarGridSpec(
                num_scalar_prefetch=0,
                grid=(m_pad // tm, K // tk),
                in_specs=[
                    pl.BlockSpec((tm, tk), lambda i, k: (i, k)),
                    pl.BlockSpec((tk, N), lambda i, k: (k, 0)),
                    pl.BlockSpec((1, N), lambda i, k: (0, 0)),
                ],
                out_specs=pl.BlockSpec((tm, N), lambda i, k: (i, 0)),
                scratch_shapes=[pltpu.VMEM((tm, N), jnp.float32)],
            ),
            compiler_params=pltpu.CompilerParams(
                dimension_semantics=("parallel", "arbitrary"),
                vmem_limit_bytes=_vmem_limit(),
            ),
        )(x, w, b)
    return out[:M] if m_pad != M else out


# ----------------------------------------------------------------------------
# Fused patch embed: (space_embed ∘ Conv4d) as one matmul (bf16-streamed
# patches), with the positional-encoding add fused into the epilogue.
# ----------------------------------------------------------------------------
def _patch_embed_kernel_1k(x_ref, w_ref, b_ref, pe_ref, o_ref):
    o_ref[0] = (jnp.dot(x_ref[0].astype(jnp.bfloat16), w_ref[...],
                        preferred_element_type=jnp.float32)
                + b_ref[...] + pe_ref[...]).astype(o_ref.dtype)


def _patch_embed_kernel(x_ref, w_ref, b_ref, pe_ref, o_ref, acc_ref):
    @pl.when(pl.program_id(2) == 0)
    def _():
        acc_ref[...] = jnp.zeros_like(acc_ref)

    acc_ref[...] += jnp.dot(x_ref[0].astype(jnp.bfloat16), w_ref[...],
                            preferred_element_type=jnp.float32)

    @pl.when(pl.program_id(2) == pl.num_programs(2) - 1)
    def _():
        o_ref[0] = (acc_ref[...] + b_ref[...] + pe_ref[...]).astype(o_ref.dtype)


def patch_embed(patches, w_comb, conv_b, pe):
    """patches: (B,P,K) bf16; w_comb: (K,H) bf16; conv_b: (1,H); pe: (P,H)."""
    B, P, K = patches.shape
    H = w_comb.shape[1]
    tp = _pick_divisor_tile(P, 512)
    tk = _pick_k_tile(K)

    if tk == K:                                   # single K step: no scratch
        return pl.pallas_call(
            _patch_embed_kernel_1k,
            out_shape=jax.ShapeDtypeStruct((B, P, H), jnp.float32),
            grid_spec=pltpu.PrefetchScalarGridSpec(
                num_scalar_prefetch=0,
                grid=(B, P // tp),
                in_specs=[
                    pl.BlockSpec((1, tp, K), lambda b, p: (b, p, 0)),
                    pl.BlockSpec((K, H), lambda b, p: (0, 0)),
                    pl.BlockSpec((1, H), lambda b, p: (0, 0)),
                    pl.BlockSpec((tp, H), lambda b, p: (p, 0)),
                ],
                out_specs=pl.BlockSpec((1, tp, H), lambda b, p: (b, p, 0)),
            ),
            compiler_params=pltpu.CompilerParams(
                dimension_semantics=("parallel", "parallel"),
                vmem_limit_bytes=_vmem_limit(),
            ),
        )(patches, w_comb, conv_b, pe)

    return pl.pallas_call(
        _patch_embed_kernel,
        out_shape=jax.ShapeDtypeStruct((B, P, H), jnp.float32),
        grid_spec=pltpu.PrefetchScalarGridSpec(
            num_scalar_prefetch=0,
            grid=(B, P // tp, K // tk),
            in_specs=[
                pl.BlockSpec((1, tp, tk), lambda b, p, k: (b, p, k)),
                pl.BlockSpec((tk, H), lambda b, p, k: (k, 0)),
                pl.BlockSpec((1, H), lambda b, p, k: (0, 0)),
                pl.BlockSpec((tp, H), lambda b, p, k: (p, 0)),
            ],
            out_specs=pl.BlockSpec((1, tp, H), lambda b, p, k: (b, p, 0)),
            scratch_shapes=[pltpu.VMEM((tp, H), jnp.float32)],
        ),
        compiler_params=pltpu.CompilerParams(
            dimension_semantics=("parallel", "parallel", "arbitrary"),
            vmem_limit_bytes=_vmem_limit(),
        ),
    )(patches, w_comb, conv_b, pe)


# ----------------------------------------------------------------------------
# Attention block: QKV projection FUSED in-kernel, head-major MHA (q tile vs
# full K/V), out-proj folded per head, then residual + LayerNorm1.
# Grid = (B, S // tq).
# ----------------------------------------------------------------------------
def _attention_kernel(x_ref, wq_ref, wk_ref, wv_ref, bq_ref, bk_ref, bv_ref,
                      wo_ref, bo_ref, ln1w_ref, ln1b_ref, o_ref, *,
                      num_heads, tq, eps=1e-5):
    nh = num_heads
    x_full = x_ref[0]                                  # (S, D) f32
    S, D = x_full.shape
    hd = D // nh
    scale = 1.0 / math.sqrt(hd)

    start = pl.multiple_of(pl.program_id(1) * tq, tq)
    x_tile = x_ref[0, pl.ds(start, tq), :]             # (tq, D) f32 (residual)

    xf_b = x_full.astype(jnp.bfloat16)                 # (S, D)
    xt_b = x_tile.astype(jnp.bfloat16)                 # (tq, D)
    xh_f = jnp.broadcast_to(xf_b[None], (nh, S, D))
    xh_t = jnp.broadcast_to(xt_b[None], (nh, tq, D))

    # Per-head projections, head-major outputs (no (tq,nh,hd)<->(tq,D) relayout).
    dn_proj = (((2,), (1,)), ((0,), (0,)))             # contract D, batch heads
    q = jax.lax.dot_general(xh_t, wq_ref[...], dn_proj,
                            preferred_element_type=jnp.float32)    # (nh,tq,hd)
    k = jax.lax.dot_general(xh_f, wk_ref[...], dn_proj,
                            preferred_element_type=jnp.float32)    # (nh,S, hd)
    v = jax.lax.dot_general(xh_f, wv_ref[...], dn_proj,
                            preferred_element_type=jnp.float32)    # (nh,S, hd)
    q = (q + bq_ref[...]) * scale
    k = k + bk_ref[...]
    v = v + bv_ref[...]

    # scores / softmax (f32 math, EUP reciprocal)
    s = jax.lax.dot_general(q.astype(jnp.bfloat16), k.astype(jnp.bfloat16),
                            (((2,), (2,)), ((0,), (0,))),
                            preferred_element_type=jnp.float32)    # (nh,tq,S)
    s = s - jnp.max(s, axis=-1, keepdims=True)
    p = jnp.exp(s)
    p = p * pl.reciprocal(jnp.sum(p, axis=-1, keepdims=True), approx=True)

    ctx = jax.lax.dot_general(p.astype(jnp.bfloat16), v.astype(jnp.bfloat16),
                              (((2,), (1,)), ((0,), (0,))),
                              preferred_element_type=jnp.float32)  # (nh,tq,hd)

    # Out-projection folded per head: sum_h ctx[h] @ wo[h]  -> (tq, D).
    attn_h = jax.lax.dot_general(ctx.astype(jnp.bfloat16), wo_ref[...],
                                 (((2,), (1,)), ((0,), (0,))),
                                 preferred_element_type=jnp.float32)  # (nh,tq,D)
    attn = jnp.sum(attn_h, axis=0) + bo_ref[...]

    # residual + LayerNorm1 (post-norm), all in f32.
    y = x_tile + attn
    mu = jnp.mean(y, axis=-1, keepdims=True)
    var = jnp.mean((y - mu) ** 2, axis=-1, keepdims=True)
    y = (y - mu) * jax.lax.rsqrt(var + eps) * ln1w_ref[...] + ln1b_ref[...]
    o_ref[0] = y.astype(o_ref.dtype)


def attention_block(x, p, num_heads):
    B, S, D = x.shape
    nh = num_heads
    hd = D // nh
    tq = _pick_attn_tile(S, nh)
    return pl.pallas_call(
        functools.partial(_attention_kernel, num_heads=nh, tq=tq),
        out_shape=jax.ShapeDtypeStruct((B, S, D), jnp.float32),
        grid_spec=pltpu.PrefetchScalarGridSpec(
            num_scalar_prefetch=0,
            grid=(B, S // tq),
            in_specs=[
                pl.BlockSpec((1, S, D), lambda b, i: (b, 0, 0)),     # x (full seq)
                pl.BlockSpec((nh, D, hd), lambda b, i: (0, 0, 0)),   # wq (bf16)
                pl.BlockSpec((nh, D, hd), lambda b, i: (0, 0, 0)),   # wk
                pl.BlockSpec((nh, D, hd), lambda b, i: (0, 0, 0)),   # wv
                pl.BlockSpec((nh, 1, hd), lambda b, i: (0, 0, 0)),   # bq
                pl.BlockSpec((nh, 1, hd), lambda b, i: (0, 0, 0)),   # bk
                pl.BlockSpec((nh, 1, hd), lambda b, i: (0, 0, 0)),   # bv
                pl.BlockSpec((nh, hd, D), lambda b, i: (0, 0, 0)),   # wo (bf16)
                pl.BlockSpec((1, D), lambda b, i: (0, 0)),           # bo
                pl.BlockSpec((1, D), lambda b, i: (0, 0)),           # ln1_w
                pl.BlockSpec((1, D), lambda b, i: (0, 0)),           # ln1_b
            ],
            out_specs=pl.BlockSpec((1, tq, D), lambda b, i: (b, i, 0)),
        ),
        compiler_params=pltpu.CompilerParams(
            dimension_semantics=("parallel", "parallel"),
            vmem_limit_bytes=_vmem_limit(),
        ),
    )(x, p["wq_h"], p["wk_h"], p["wv_h"], p["bq_h"], p["bk_h"], p["bv_h"],
      p["wo_h"], p["bo"], p["ln1_w"], p["ln1_b"])


# ----------------------------------------------------------------------------
# FFN block (Linear -> ReLU -> Linear) fused with residual + LayerNorm2,
# row-tiled over the (B*S) token axis.
# ----------------------------------------------------------------------------
def _ffn_kernel(x_ref, w1_ref, b1_ref, w2_ref, b2_ref, ln2w_ref, ln2b_ref,
                o_ref, *, eps=1e-5):
    x = x_ref[...]                                                 # (tm, D) f32
    h1 = jnp.dot(x.astype(jnp.bfloat16), w1_ref[...],
                 preferred_element_type=jnp.float32) + b1_ref[...]
    h1 = jnp.maximum(h1, 0.0)
    y = jnp.dot(h1.astype(jnp.bfloat16), w2_ref[...],
                preferred_element_type=jnp.float32) + b2_ref[...]
    y = x + y
    mu = jnp.mean(y, axis=-1, keepdims=True)
    var = jnp.mean((y - mu) ** 2, axis=-1, keepdims=True)
    y = (y - mu) * jax.lax.rsqrt(var + eps) * ln2w_ref[...] + ln2b_ref[...]
    o_ref[...] = y.astype(o_ref.dtype)


def ffn_block(x2d, p):
    M, D = x2d.shape
    dff = p["w1"].shape[1]
    tm, m_pad = _pick_row_tile(M, cap=_ffn_row_cap())
    if m_pad != M:
        x2d = jnp.pad(x2d, ((0, m_pad - M), (0, 0)))
    out = pl.pallas_call(
        _ffn_kernel,
        out_shape=jax.ShapeDtypeStruct((m_pad, D), jnp.float32),
        grid_spec=pltpu.PrefetchScalarGridSpec(
            num_scalar_prefetch=0,
            grid=(m_pad // tm,),
            in_specs=[
                pl.BlockSpec((tm, D), lambda i: (i, 0)),
                pl.BlockSpec((D, dff), lambda i: (0, 0)),
                pl.BlockSpec((1, dff), lambda i: (0, 0)),
                pl.BlockSpec((dff, D), lambda i: (0, 0)),
                pl.BlockSpec((1, D), lambda i: (0, 0)),
                pl.BlockSpec((1, D), lambda i: (0, 0)),
                pl.BlockSpec((1, D), lambda i: (0, 0)),
            ],
            out_specs=pl.BlockSpec((tm, D), lambda i: (i, 0)),
        ),
        compiler_params=pltpu.CompilerParams(
            dimension_semantics=("parallel",),
            vmem_limit_bytes=_vmem_limit(),
        ),
    )(x2d, p["w1"], p["b1"], p["w2"], p["b2"], p["ln2_w"], p["ln2_b"])
    return out[:M] if m_pad != M else out


# ----------------------------------------------------------------------------
# One nn.TransformerEncoderLayer (post-norm, ReLU FFN): fused attention block
# (QKV + MHA + out-proj + residual + LN1) then fused FFN + residual + LN2.
# ----------------------------------------------------------------------------
def encoder_layer(x, p, num_heads):
    B, S, D = x.shape
    x1 = attention_block(x, p, num_heads)
    x2 = ffn_block(x1.reshape(B * S, D), p)
    return x2.reshape(B, S, D)


# ----------------------------------------------------------------------------
# Glue: PE table, raw-input patchify, parameter init / precomposition.
# ----------------------------------------------------------------------------
def make_pe(max_len, d_model):
    position = jnp.arange(max_len, dtype=jnp.float32)[:, None]
    div_term = jnp.exp(jnp.arange(0, d_model, 2, dtype=jnp.float32)
                       * (-math.log(10000.0) / d_model))
    pe = jnp.zeros((max_len, d_model), jnp.float32)
    pe = pe.at[:, 0::2].set(jnp.sin(position * div_term))
    pe = pe.at[:, 1::2].set(jnp.cos(position * div_term))
    return pe


def patchify(x, tsl):
    """(B,T,X,Y,Z,V) -> (B, P, V*tt*tx*ty*tz); K order = (v, kt, kx, ky, kz)."""
    B, T, X, Y, Z, V = x.shape
    tt, tx, ty, tz = tsl
    x = x.reshape(B, T // tt, tt, X // tx, tx, Y // ty, ty, Z // tz, tz, V)
    x = x.transpose(0, 1, 3, 5, 7, 9, 2, 4, 6, 8)   # (B,pt,px,py,pz,V,tt,tx,ty,tz)
    P = (T // tt) * (X // tx) * (Y // ty) * (Z // tz)
    return x.reshape(B, P, V * tt * tx * ty * tz), P


def init_raw_params(key, num_vars, hidden, num_layers, dff, tsl, dec_out):
    tt, tx, ty, tz = tsl
    scale = 0.02

    def nrm(k, shape):
        return scale * jax.random.normal(k, shape, jnp.float32)

    keys = jax.random.split(key, 6 + num_layers)
    params = {
        "space_embed_w": nrm(keys[0], (num_vars, hidden)),          # bias=False
        "conv_w": nrm(keys[1], (hidden, hidden, tt, tx, ty, tz)),   # Conv4d weight
        "conv_b": nrm(keys[2], (hidden,)),
        "decoder_w": nrm(keys[3], (hidden, dec_out)),
        "decoder_b": nrm(keys[4], (dec_out,)),
        "layers": [],
    }
    for li in range(num_layers):
        lk = jax.random.split(keys[5 + li], 8)
        params["layers"].append({
            "wqkv": nrm(lk[0], (hidden, 3 * hidden)),
            "bqkv": nrm(lk[1], (3 * hidden,)),
            "wo": nrm(lk[2], (hidden, hidden)),
            "bo": nrm(lk[3], (hidden,)),
            "ln1_w": jnp.ones((hidden,), jnp.float32),
            "ln1_b": jnp.zeros((hidden,), jnp.float32),
            "w1": nrm(lk[4], (hidden, dff)),
            "b1": nrm(lk[5], (dff,)),
            "w2": nrm(lk[6], (dff, hidden)),
            "b2": nrm(lk[7], (hidden,)),
            "ln2_w": jnp.ones((hidden,), jnp.float32),
            "ln2_b": jnp.zeros((hidden,), jnp.float32),
        })
    return params


def prepare_params(raw, num_heads):
    """Precompose space_embed∘conv4d, split qkv/out-proj weights into head-major
    blocks, lane-pad the decoder only if needed, cast matmul weights to bf16
    (f32 accumulation happens in-kernel)."""
    H = raw["space_embed_w"].shape[1]
    nh = num_heads
    hd = H // nh

    # W_comb[(v,kt,kx,ky,kz), h] = sum_c W_se[v,c] * conv_w[h,c,kt,kx,ky,kz]
    w_comb = jnp.einsum("vc,ocklmn->vklmno", raw["space_embed_w"], raw["conv_w"])
    w_comb = w_comb.reshape(-1, H)

    n = raw["decoder_w"].shape[1]
    if n % 128 == 0:                       # already lane-dense: no pad, no slice
        dec_w = raw["decoder_w"]
        dec_b = raw["decoder_b"].reshape(1, -1)
    else:
        n_pad = _round_up(n, 128)
        dec_w = jnp.zeros((H, n_pad), jnp.float32).at[:, :n].set(raw["decoder_w"])
        dec_b = jnp.zeros((1, n_pad), jnp.float32).at[:, :n].set(raw["decoder_b"])

    params = {
        "patch_w": w_comb.astype(jnp.bfloat16),
        "patch_b": raw["conv_b"].reshape(1, -1),
        "dec_w": dec_w.astype(jnp.bfloat16),
        "dec_b": dec_b,
        "layers": [],
    }
    for lp in raw["layers"]:
        wqkv, bqkv = lp["wqkv"], lp["bqkv"]
        wq, wk, wv = wqkv[:, :H], wqkv[:, H:2 * H], wqkv[:, 2 * H:]
        bq, bk, bv = bqkv[:H], bqkv[H:2 * H], bqkv[2 * H:]

        def to_heads_w(w):   # (D, D) -> (nh, D, hd)
            return jnp.transpose(w.reshape(H, nh, hd), (1, 0, 2))

        def to_heads_b(b):   # (D,) -> (nh, 1, hd)
            return b.reshape(nh, 1, hd)

        params["layers"].append({
            "wq_h": to_heads_w(wq).astype(jnp.bfloat16),
            "wk_h": to_heads_w(wk).astype(jnp.bfloat16),
            "wv_h": to_heads_w(wv).astype(jnp.bfloat16),
            "bq_h": to_heads_b(bq),
            "bk_h": to_heads_b(bk),
            "bv_h": to_heads_b(bv),
            "wo_h": lp["wo"].reshape(nh, hd, H).astype(jnp.bfloat16),
            "bo": lp["bo"].reshape(1, -1),
            "ln1_w": lp["ln1_w"].reshape(1, -1),
            "ln1_b": lp["ln1_b"].reshape(1, -1),
            "w1": lp["w1"].astype(jnp.bfloat16),
            "b1": lp["b1"].reshape(1, -1),
            "w2": lp["w2"].astype(jnp.bfloat16),
            "b2": lp["b2"].reshape(1, -1),
            "ln2_w": lp["ln2_w"].reshape(1, -1),
            "ln2_b": lp["ln2_b"].reshape(1, -1),
        })
    return params


# ----------------------------------------------------------------------------
# ViT4d forward (eval-mode semantics).
# ----------------------------------------------------------------------------
# TODO(synk): dropout (PositionalEncoding p=0.1 and transformer dropouts) is
# stochastic in PyTorch train mode; implemented here as identity (eval mode).
def vit4d_forward(x, params, pe, *, tsl, num_heads, dec_out):
    B, T, X, Y, Z, V = x.shape
    # Stream patches (the largest HBM read) as bf16; matmul acc stays f32.
    patches, P = patchify(x.astype(jnp.bfloat16), tsl)               # (B, P, K)
    h = patch_embed(patches, params["patch_w"], params["patch_b"], pe)  # (B,P,H)+PE
    for layer_p in params["layers"]:
        h = encoder_layer(h, layer_p, num_heads)
    Hd = h.shape[-1]
    # decoder input cast to bf16 at the boundary (kernel casts anyway)
    out = linear(h.reshape(B * P, Hd).astype(jnp.bfloat16),
                 params["dec_w"], params["dec_b"])
    if out.shape[1] != dec_out:
        out = out[:, :dec_out]              # strip lane padding (only if padded)
    # raw view of (B, P, dec_out), same as the torch module's .view(...)
    out = out.reshape(B, T, X, Y, Z, 1)
    return out


# ----------------------------------------------------------------------------
# Pure-JAX f32 reference (unfused, mirrors the PyTorch module) for validation.
# ----------------------------------------------------------------------------
def _layernorm(x, w, b, eps=1e-5):
    mu = jnp.mean(x, axis=-1, keepdims=True)
    var = jnp.mean((x - mu) ** 2, axis=-1, keepdims=True)
    return (x - mu) * jax.lax.rsqrt(var + eps) * w + b


def reference_forward(x, raw, pe, *, tsl, num_heads):
    B, T, X, Y, Z, V = x.shape
    H = raw["space_embed_w"].shape[1]
    tt, tx, ty, tz = tsl
    emb = x @ raw["space_embed_w"]                                  # (B,T,X,Y,Z,H)
    e = emb.reshape(B, T // tt, tt, X // tx, tx, Y // ty, ty, Z // tz, tz, H)
    e = e.transpose(0, 1, 3, 5, 7, 9, 2, 4, 6, 8)
    P = (T // tt) * (X // tx) * (Y // ty) * (Z // tz)
    patches = e.reshape(B, P, H * tt * tx * ty * tz)
    conv_mat = raw["conv_w"].reshape(H, -1).T
    h = patches @ conv_mat + raw["conv_b"] + pe                     # (B,P,H)
    for lp in raw["layers"]:
        D = H
        hd = D // num_heads
        qkv = h @ lp["wqkv"] + lp["bqkv"]
        q, k, v = qkv[..., :D], qkv[..., D:2 * D], qkv[..., 2 * D:]
        q = q.reshape(B, P, num_heads, hd).transpose(0, 2, 1, 3)
        k = k.reshape(B, P, num_heads, hd).transpose(0, 2, 1, 3)
        v = v.reshape(B, P, num_heads, hd).transpose(0, 2, 1, 3)
        s = (q @ jnp.swapaxes(k, -1, -2)) / math.sqrt(hd)
        a = jax.nn.softmax(s, axis=-1)
        ctx = (a @ v).transpose(0, 2, 1, 3).reshape(B, P, D)
        attn = ctx @ lp["wo"] + lp["bo"]
        h = _layernorm(h + attn, lp["ln1_w"], lp["ln1_b"])
        f = jnp.maximum(h @ lp["w1"] + lp["b1"], 0.0) @ lp["w2"] + lp["b2"]
        h = _layernorm(h + f, lp["ln2_w"], lp["ln2_b"])
    out = h @ raw["decoder_w"] + raw["decoder_b"]
    return out.reshape(B, T, X, Y, Z, 1)


# ----------------------------------------------------------------------------
if __name__ == "__main__":
    # Scaled-down configuration consistent with the module's structure
    # (the original hard-codes tsl=(2,24,16,5), dims=(16,120,80,25), hidden=64).
    B = 2
    NUM_VARS = 4
    HIDDEN = 64          # module forces hidden_size = 64
    NUM_HEADS = 8
    NUM_LAYERS = 2
    DFF = 2048           # nn.TransformerEncoderLayer default dim_feedforward
    TSL = (2, 4, 4, 5)                       # (t_tsl, x_tsl, y_tsl, z_tsl)
    DIMS = (4, 8, 8, 5)                      # (t_dim, x_dim, y_dim, z_dim)
    T, X, Y, Z = DIMS
    tt, tx, ty, tz = TSL
    P = (T // tt) * (X // tx) * (Y // ty) * (Z // tz)   # = max_pe_len
    DEC_OUT = tt * tx * ty * tz

    key = jax.random.PRNGKey(0)
    k_in, k_par = jax.random.split(key)
    x = jax.random.normal(k_in, (B, T, X, Y, Z, NUM_VARS), jnp.float32)

    raw = init_raw_params(k_par, NUM_VARS, HIDDEN, NUM_LAYERS, DFF, TSL, DEC_OUT)
    params = prepare_params(raw, NUM_HEADS)
    pe = make_pe(P, HIDDEN)

    fwd = jax.jit(functools.partial(vit4d_forward, tsl=TSL,
                                    num_heads=NUM_HEADS, dec_out=DEC_OUT))
    out = jax.block_until_ready(fwd(x, params, pe))

    assert out.shape == (B, T, X, Y, Z, 1), out.shape
    assert bool(jnp.all(jnp.isfinite(out)))

    # Validate against the unfused f32 reference (bf16 matmuls + approx
    # reciprocal introduce small numerical differences).
    ref = reference_forward(x, raw, pe, tsl=TSL, num_heads=NUM_HEADS)
    err = float(jnp.max(jnp.abs(out - ref)))
    assert err < 5e-2, f"max abs error vs reference: {err}"

    print("KERNEL_OK")
</pallas_src>

<mosaic_0001>
module attributes {stable_mosaic.version = 11 : i64} {
  func.func @_patch_embed_kernel_1k(%arg0: i32, %arg1: i32, %arg2: memref<1x8x640xbf16, #tpu.memory_space<vmem>>, %arg3: memref<640x64xbf16, #tpu.memory_space<vmem>>, %arg4: memref<1x64xf32, #tpu.memory_space<vmem>>, %arg5: memref<8x64xf32, #tpu.memory_space<vmem>>, %arg6: memref<1x8x64xf32, #tpu.memory_space<vmem>>) attributes {dimension_semantics = [#tpu.dimension_semantics<parallel>, #tpu.dimension_semantics<parallel>], iteration_bounds = array<i64: 2, 1>, scalar_prefetch = 0 : i64, scratch_operands = 0 : i64, tpu.core_type = #tpu.core_type<tc>, window_params = [{transform_indices = @transform_0, window_bounds = array<i64: 1, 8, 640>}, {pipeline_mode = #tpu.pipeline_mode<synchronous>, transform_indices = @transform_1, window_bounds = array<i64: 640, 64>}, {pipeline_mode = #tpu.pipeline_mode<synchronous>, transform_indices = @transform_2, window_bounds = array<i64: 1, 64>}, {transform_indices = @transform_3, window_bounds = array<i64: 8, 64>}, {transform_indices = @transform_4, window_bounds = array<i64: 1, 8, 64>}]} {
    %c0 = arith.constant 0 : index
    %c0_0 = arith.constant 0 : index
    %c0_1 = arith.constant 0 : index
    %0 = vector.load %arg2[%c0, %c0_0, %c0_1] : memref<1x8x640xbf16, #tpu.memory_space<vmem>>, vector<1x8x640xbf16>
    %1 = vector.shape_cast %0 : vector<1x8x640xbf16> to vector<8x640xbf16>
    %c0_2 = arith.constant 0 : index
    %c0_3 = arith.constant 0 : index
    %2 = vector.load %arg3[%c0_2, %c0_3] : memref<640x64xbf16, #tpu.memory_space<vmem>>, vector<640x64xbf16>
    %cst = arith.constant dense<0.000000e+00> : vector<8x64xf32>
    %3 = tpu.matmul %1, %2, %cst {dimension_numbers = #tpu.dot_dimension_numbers<[1], [0], [0], [1], [0, 0, 1, 1], [], []>} : vector<8x640xbf16>, vector<640x64xbf16>, vector<8x64xf32> -> vector<8x64xf32>
    %c0_4 = arith.constant 0 : index
    %c0_5 = arith.constant 0 : index
    %4 = vector.load %arg4[%c0_4, %c0_5] : memref<1x64xf32, #tpu.memory_space<vmem>>, vector<1x64xf32>
    %5 = vector.broadcast %4 : vector<1x64xf32> to vector<8x64xf32>
    %6 = arith.addf %3, %5 : vector<8x64xf32>
    %c0_6 = arith.constant 0 : index
    %c0_7 = arith.constant 0 : index
    %7 = vector.load %arg5[%c0_6, %c0_7] : memref<8x64xf32, #tpu.memory_space<vmem>>, vector<8x64xf32>
    %8 = arith.addf %6, %7 : vector<8x64xf32>
    %c0_8 = arith.constant 0 : index
    %c0_9 = arith.constant 0 : index
    %c0_10 = arith.constant 0 : index
    %9 = vector.load %arg6[%c0_8, %c0_9, %c0_10] : memref<1x8x64xf32, #tpu.memory_space<vmem>>, vector<1x8x64xf32>
    %10 = vector.shape_cast %9 : vector<1x8x64xf32> to vector<8x64xf32>
    %11 = vector.shape_cast %8 : vector<8x64xf32> to vector<1x8x64xf32>
    tpu.vector_store %arg6[%c0_8, %c0_9, %c0_10], %11 {strides = array<i32>} : memref<1x8x64xf32, #tpu.memory_space<vmem>>, vector<1x8x64xf32>,
    return
  }
  func.func @transform_0(%arg0: i32, %arg1: i32) -> (i32, i32, i32) {
    %c0_i32 = arith.constant 0 : i32
    %c0_i32_0 = arith.constant 0 : i32
    return %arg0, %arg1, %c0_i32 : i32, i32, i32
  }
  func.func @transform_1(%arg0: i32, %arg1: i32) -> (i32, i32) {
    %c0_i32 = arith.constant 0 : i32
    %c0_i32_0 = arith.constant 0 : i32
    %c0_i32_1 = arith.constant 0 : i32
    return %c0_i32, %c0_i32_0 : i32, i32
  }
  func.func @transform_2(%arg0: i32, %arg1: i32) -> (i32, i32) {
    %c0_i32 = arith.constant 0 : i32
    %c0_i32_0 = arith.constant 0 : i32
    %c0_i32_1 = arith.constant 0 : i32
    return %c0_i32, %c0_i32_0 : i32, i32
  }
  func.func @transform_3(%arg0: i32, %arg1: i32) -> (i32, i32) {
    %c0_i32 = arith.constant 0 : i32
    %c0_i32_0 = arith.constant 0 : i32
    return %arg1, %c0_i32 : i32, i32
  }
  func.func @transform_4(%arg0: i32, %arg1: i32) -> (i32, i32, i32) {
    %c0_i32 = arith.constant 0 : i32
    %c0_i32_0 = arith.constant 0 : i32
    return %arg0, %arg1, %c0_i32 : i32, i32, i32
  }
}

module attributes {stable_mosaic.version = 11 : i64} {
  func.func @_attention_kernel(%arg0: i32, %arg1: i32, %arg2: memref<1x8x64xf32, #tpu.memory_space<vmem>>, %arg3: memref<8x64x8xbf16, #tpu.memory_space<vmem>>, %arg4: memref<8x64x8xbf16, #tpu.memory_space<vmem>>, %arg5: memref<8x64x8xbf16, #tpu.memory_space<vmem>>, %arg6: memref<8x1x8xf32, #tpu.memory_space<vmem>>, %arg7: memref<8x1x8xf32, #tpu.memory_space<vmem>>, %arg8: memref<8x1x8xf32, #tpu.memory_space<vmem>>, %arg9: memref<8x8x64xbf16, #tpu.memory_space<vmem>>, %arg10: memref<1x64xf32, #tpu.memory_space<vmem>>, %arg11: memref<1x64xf32, #tpu.memory_space<vmem>>, %arg12: memref<1x64xf32, #tpu.memory_space<vmem>>, %arg13: memref<1x8x64xf32, #tpu.memory_space<vmem>>) attributes {dimension_semantics = [#tpu.dimension_semantics<parallel>, #tpu.dimension_semantics<parallel>], iteration_bounds = array<i64: 2, 1>, scalar_prefetch = 0 : i64, scratch_operands = 0 : i64, tpu.core_type = #tpu.core_type<tc>, window_params = [{transform_indices = @transform_0, window_bounds = array<i64: 1, 8, 64>}, {pipeline_mode = #tpu.pipeline_mode<synchronous>, transform_indices = @transform_1, window_bounds = array<i64: 8, 64, 8>}, {pipeline_mode = #tpu.pipeline_mode<synchronous>, transform_indices = @transform_2, window_bounds = array<i64: 8, 64, 8>}, {pipeline_mode = #tpu.pipeline_mode<synchronous>, transform_indices = @transform_3, window_bounds = array<i64: 8, 64, 8>}, {pipeline_mode = #tpu.pipeline_mode<synchronous>, transform_indices = @transform_4, window_bounds = array<i64: 8, 1, 8>}, {pipeline_mode = #tpu.pipeline_mode<synchronous>, transform_indices = @transform_5, window_bounds = array<i64: 8, 1, 8>}, {pipeline_mode = #tpu.pipeline_mode<synchronous>, transform_indices = @transform_6, window_bounds = array<i64: 8, 1, 8>}, {pipeline_mode = #tpu.pipeline_mode<synchronous>, transform_indices = @transform_7, window_bounds = array<i64: 8, 8, 64>}, {pipeline_mode = #tpu.pipeline_mode<synchronous>, transform_indices = @transform_8, window_bounds = array<i64: 1, 64>}, {pipeline_mode = #tpu.pipeline_mode<synchronous>, transform_indices = @transform_9, window_bounds = array<i64: 1, 64>}, {pipeline_mode = #tpu.pipeline_mode<synchronous>, transform_indices = @transform_10, window_bounds = array<i64: 1, 64>}, {transform_indices = @transform_11, window_bounds = array<i64: 1, 8, 64>}]} {
    %c0 = arith.constant 0 : index
    %c0_0 = arith.constant 0 : index
    %c0_1 = arith.constant 0 : index
    %0 = vector.load %arg2[%c0, %c0_0, %c0_1] : memref<1x8x64xf32, #tpu.memory_space<vmem>>, vector<1x8x64xf32>
    %1 = vector.shape_cast %0 : vector<1x8x64xf32> to vector<8x64xf32>
    %c8_i32 = arith.constant 8 : i32
    %2 = arith.muli %arg1, %c8_i32 : i32
    %3 = tpu.assume_multiple %2, 8 : i32
    %c0_2 = arith.constant 0 : index
    %4 = arith.index_cast %3 : i32 to index
    %c0_3 = arith.constant 0 : index
    %5 = vector.load %arg2[%c0_2, %4, %c0_3] : memref<1x8x64xf32, #tpu.memory_space<vmem>>, vector<1x8x64xf32>
    %6 = vector.shape_cast %5 : vector<1x8x64xf32> to vector<8x64xf32>
    %7 = arith.truncf %1 : vector<8x64xf32> to vector<8x64xbf16>
    %8 = arith.truncf %6 : vector<8x64xf32> to vector<8x64xbf16>
    %9 = vector.shape_cast %7 : vector<8x64xbf16> to vector<1x8x64xbf16>
    %10 = vector.shape_cast %9 : vector<1x8x64xbf16> to vector<1x8x64xbf16>
    %11 = vector.broadcast %10 : vector<1x8x64xbf16> to vector<8x8x64xbf16>
    %12 = vector.shape_cast %8 : vector<8x64xbf16> to vector<1x8x64xbf16>
    %13 = vector.shape_cast %12 : vector<1x8x64xbf16> to vector<1x8x64xbf16>
    %14 = vector.broadcast %13 : vector<1x8x64xbf16> to vector<8x8x64xbf16>
    %c0_4 = arith.constant 0 : index
    %c0_5 = arith.constant 0 : index
    %c0_6 = arith.constant 0 : index
    %15 = vector.load %arg3[%c0_4, %c0_5, %c0_6] : memref<8x64x8xbf16, #tpu.memory_space<vmem>>, vector<8x64x8xbf16>
    %cst = arith.constant dense<0.000000e+00> : vector<8x8x8xf32>
    %16 = tpu.matmul %14, %15, %cst {dimension_numbers = #tpu.dot_dimension_numbers<[2], [1], [1], [2], [0, 0, 0, 1, 1, 2], [0], [0]>} : vector<8x8x64xbf16>, vector<8x64x8xbf16>, vector<8x8x8xf32> -> vector<8x8x8xf32>
    %c0_7 = arith.constant 0 : index
    %c0_8 = arith.constant 0 : index
    %c0_9 = arith.constant 0 : index
    %17 = vector.load %arg4[%c0_7, %c0_8, %c0_9] : memref<8x64x8xbf16, #tpu.memory_space<vmem>>, vector<8x64x8xbf16>
    %cst_10 = arith.constant dense<0.000000e+00> : vector<8x8x8xf32>
    %18 = tpu.matmul %11, %17, %cst_10 {dimension_numbers = #tpu.dot_dimension_numbers<[2], [1], [1], [2], [0, 0, 0, 1, 1, 2], [0], [0]>} : vector<8x8x64xbf16>, vector<8x64x8xbf16>, vector<8x8x8xf32> -> vector<8x8x8xf32>
    %c0_11 = arith.constant 0 : index
    %c0_12 = arith.constant 0 : index
    %c0_13 = arith.constant 0 : index
    %19 = vector.load %arg5[%c0_11, %c0_12, %c0_13] : memref<8x64x8xbf16, #tpu.memory_space<vmem>>, vector<8x64x8xbf16>
    %cst_14 = arith.constant dense<0.000000e+00> : vector<8x8x8xf32>
    %20 = tpu.matmul %11, %19, %cst_14 {dimension_numbers = #tpu.dot_dimension_numbers<[2], [1], [1], [2], [0, 0, 0, 1, 1, 2], [0], [0]>} : vector<8x8x64xbf16>, vector<8x64x8xbf16>, vector<8x8x8xf32> -> vector<8x8x8xf32>
    %c0_15 = arith.constant 0 : index
    %c0_16 = arith.constant 0 : index
    %c0_17 = arith.constant 0 : index
    %21 = vector.load %arg6[%c0_15, %c0_16, %c0_17] : memref<8x1x8xf32, #tpu.memory_space<vmem>>, vector<8x1x8xf32>
    %22 = vector.broadcast %21 : vector<8x1x8xf32> to vector<8x8x8xf32>
    %23 = arith.addf %16, %22 : vector<8x8x8xf32>
    %cst_18 = arith.constant 0.353553385 : f32
    %24 = vector.broadcast %cst_18 : f32 to vector<8x8x8xf32>
    %25 = arith.mulf %23, %24 : vector<8x8x8xf32>
    %c0_19 = arith.constant 0 : index
    %c0_20 = arith.constant 0 : index
    %c0_21 = arith.constant 0 : index
    %26 = vector.load %arg7[%c0_19, %c0_20, %c0_21] : memref<8x1x8xf32, #tpu.memory_space<vmem>>, vector<8x1x8xf32>
    %27 = vector.broadcast %26 : vector<8x1x8xf32> to vector<8x8x8xf32>
    %28 = arith.addf %18, %27 : vector<8x8x8xf32>
    %c0_22 = arith.constant 0 : index
    %c0_23 = arith.constant 0 : index
    %c0_24 = arith.constant 0 : index
    %29 = vector.load %arg8[%c0_22, %c0_23, %c0_24] : memref<8x1x8xf32, #tpu.memory_space<vmem>>, vector<8x1x8xf32>
    %30 = vector.broadcast %29 : vector<8x1x8xf32> to vector<8x8x8xf32>
    %31 = arith.addf %20, %30 : vector<8x8x8xf32>
    %32 = arith.truncf %25 : vector<8x8x8xf32> to vector<8x8x8xbf16>
    %33 = arith.truncf %28 : vector<8x8x8xf32> to vector<8x8x8xbf16>
    %cst_25 = arith.constant dense<0.000000e+00> : vector<8x8x8xf32>
    %34 = tpu.matmul %32, %33, %cst_25 {dimension_numbers = #tpu.dot_dimension_numbers<[2], [2], [1], [1], [0, 0, 0, 1, 1, 1], [0], [0]>} : vector<8x8x8xbf16>, vector<8x8x8xbf16>, vector<8x8x8xf32> -> vector<8x8x8xf32>
    %cst_26 = arith.constant dense<0xFF800000> : vector<8x8xf32>
    %35 = vector.multi_reduction <maximumf>, %34, %cst_26 [2] : vector<8x8x8xf32> to vector<8x8xf32>
    %36 = vector.shape_cast %35 : vector<8x8xf32> to vector<8x8x1xf32>
    %37 = vector.broadcast %36 : vector<8x8x1xf32> to vector<8x8x8xf32>
    %38 = arith.subf %34, %37 : vector<8x8x8xf32>
    %39 = math.exp %38 : vector<8x8x8xf32>
    %cst_27 = arith.constant dense<0.000000e+00> : vector<8x8xf32>
    %40 = vector.multi_reduction <add>, %39, %cst_27 [2] : vector<8x8x8xf32> to vector<8x8xf32>
    %41 = vector.shape_cast %40 : vector<8x8xf32> to vector<8x8x1xf32>
    %42 = tpu.reciprocal %41 {approx = true} : vector<8x8x1xf32> -> vector<8x8x1xf32>
    %43 = vector.broadcast %42 : vector<8x8x1xf32> to vector<8x8x8xf32>
    %44 = arith.mulf %39, %43 : vector<8x8x8xf32>
    %45 = arith.truncf %44 : vector<8x8x8xf32> to vector<8x8x8xbf16>
    %46 = arith.truncf %31 : vector<8x8x8xf32> to vector<8x8x8xbf16>
    %cst_28 = arith.constant dense<0.000000e+00> : vector<8x8x8xf32>
    %47 = tpu.matmul %45, %46, %cst_28 {dimension_numbers = #tpu.dot_dimension_numbers<[2], [1], [1], [2], [0, 0, 0, 1, 1, 2], [0], [0]>} : vector<8x8x8xbf16>, vector<8x8x8xbf16>, vector<8x8x8xf32> -> vector<8x8x8xf32>
    %48 = arith.truncf %47 : vector<8x8x8xf32> to vector<8x8x8xbf16>
    %c0_29 = arith.constant 0 : index
    %c0_30 = arith.constant 0 : index
    %c0_31 = arith.constant 0 : index
    %49 = vector.load %arg9[%c0_29, %c0_30, %c0_31] : memref<8x8x64xbf16, #tpu.memory_space<vmem>>, vector<8x8x64xbf16>
    %cst_32 = arith.constant dense<0.000000e+00> : vector<8x8x64xf32>
    %50 = tpu.matmul %48, %49, %cst_32 {dimension_numbers = #tpu.dot_dimension_numbers<[2], [1], [1], [2], [0, 0, 0, 1, 1, 2], [0], [0]>} : vector<8x8x8xbf16>, vector<8x8x64xbf16>, vector<8x8x64xf32> -> vector<8x8x64xf32>
    %cst_33 = arith.constant dense<0.000000e+00> : vector<8x64xf32>
    %51 = vector.multi_reduction <add>, %50, %cst_33 [0] : vector<8x8x64xf32> to vector<8x64xf32>
    %c0_34 = arith.constant 0 : index
    %c0_35 = arith.constant 0 : index
    %52 = vector.load %arg10[%c0_34, %c0_35] : memref<1x64xf32, #tpu.memory_space<vmem>>, vector<1x64xf32>
    %53 = vector.broadcast %52 : vector<1x64xf32> to vector<8x64xf32>
    %54 = arith.addf %51, %53 : vector<8x64xf32>
    %55 = arith.addf %6, %54 : vector<8x64xf32>
    %cst_36 = arith.constant dense<0.000000e+00> : vector<8xf32>
    %56 = vector.multi_reduction <add>, %55, %cst_36 [1] : vector<8x64xf32> to vector<8xf32>
    %57 = vector.shape_cast %56 : vector<8xf32> to vector<8x1xf32>
    %cst_37 = arith.constant 6.400000e+01 : f32
    %58 = vector.broadcast %cst_37 : f32 to vector<8x1xf32>
    %59 = arith.divf %57, %58 : vector<8x1xf32>
    %60 = vector.broadcast %59 : vector<8x1xf32> to vector<8x64xf32>
    %61 = arith.subf %55, %60 : vector<8x64xf32>
    %62 = arith.mulf %61, %61 : vector<8x64xf32>
    %cst_38 = arith.constant dense<0.000000e+00> : vector<8xf32>
    %63 = vector.multi_reduction <add>, %62, %cst_38 [1] : vector<8x64xf32> to vector<8xf32>
    %64 = vector.shape_cast %63 : vector<8xf32> to vector<8x1xf32>
    %cst_39 = arith.constant 6.400000e+01 : f32
    %65 = vector.broadcast %cst_39 : f32 to vector<8x1xf32>
    %66 = arith.divf %64, %65 : vector<8x1xf32>
    %67 = vector.broadcast %59 : vector<8x1xf32> to vector<8x64xf32>
    %68 = arith.subf %55, %67 : vector<8x64xf32>
    %cst_40 = arith.constant 9.99999974E-6 : f32
    %69 = vector.broadcast %cst_40 : f32 to vector<8x1xf32>
    %70 = arith.addf %66, %69 : vector<8x1xf32>
    %71 = math.rsqrt %70 : vector<8x1xf32>
    %72 = vector.broadcast %71 : vector<8x1xf32> to vector<8x64xf32>
    %73 = arith.mulf %68, %72 : vector<8x64xf32>
    %c0_41 = arith.constant 0 : index
    %c0_42 = arith.constant 0 : index
    %74 = vector.load %arg11[%c0_41, %c0_42] : memref<1x64xf32, #tpu.memory_space<vmem>>, vector<1x64xf32>
    %75 = vector.broadcast %74 : vector<1x64xf32> to vector<8x64xf32>
    %76 = arith.mulf %73, %75 : vector<8x64xf32>
    %c0_43 = arith.constant 0 : index
    %c0_44 = arith.constant 0 : index
    %77 = vector.load %arg12[%c0_43, %c0_44] : memref<1x64xf32, #tpu.memory_space<vmem>>, vector<1x64xf32>
    %78 = vector.broadcast %77 : vector<1x64xf32> to vector<8x64xf32>
    %79 = arith.addf %76, %78 : vector<8x64xf32>
    %c0_45 = arith.constant 0 : index
    %c0_46 = arith.constant 0 : index
    %c0_47 = arith.constant 0 : index
    %80 = vector.load %arg13[%c0_45, %c0_46, %c0_47] : memref<1x8x64xf32, #tpu.memory_space<vmem>>, vector<1x8x64xf32>
    %81 = vector.shape_cast %80 : vector<1x8x64xf32> to vector<8x64xf32>
    %82 = vector.shape_cast %79 : vector<8x64xf32> to vector<1x8x64xf32>
    tpu.vector_store %arg13[%c0_45, %c0_46, %c0_47], %82 {strides = array<i32>} : memref<1x8x64xf32, #tpu.memory_space<vmem>>, vector<1x8x64xf32>,
    return
  }
  func.func @transform_0(%arg0: i32, %arg1: i32) -> (i32, i32, i32) {
    %c0_i32 = arith.constant 0 : i32
    %c0_i32_0 = arith.constant 0 : i32
    %c0_i32_1 = arith.constant 0 : i32
    return %arg0, %c0_i32, %c0_i32_0 : i32, i32, i32
  }
  func.func @transform_1(%arg0: i32, %arg1: i32) -> (i32, i32, i32) {
    %c0_i32 = arith.constant 0 : i32
    %c0_i32_0 = arith.constant 0 : i32
    %c0_i32_1 = arith.constant 0 : i32
    %c0_i32_2 = arith.constant 0 : i32
    return %c0_i32, %c0_i32_0, %c0_i32_1 : i32, i32, i32
  }
  func.func @transform_2(%arg0: i32, %arg1: i32) -> (i32, i32, i32) {
    %c0_i32 = arith.constant 0 : i32
    %c0_i32_0 = arith.constant 0 : i32
    %c0_i32_1 = arith.constant 0 : i32
    %c0_i32_2 = arith.constant 0 : i32
    return %c0_i32, %c0_i32_0, %c0_i32_1 : i32, i32, i32
  }
  func.func @transform_3(%arg0: i32, %arg1: i32) -> (i32, i32, i32) {
    %c0_i32 = arith.constant 0 : i32
    %c0_i32_0 = arith.constant 0 : i32
    %c0_i32_1 = arith.constant 0 : i32
    %c0_i32_2 = arith.constant 0 : i32
    return %c0_i32, %c0_i32_0, %c0_i32_1 : i32, i32, i32
  }
  func.func @transform_4(%arg0: i32, %arg1: i32) -> (i32, i32, i32) {
    %c0_i32 = arith.constant 0 : i32
    %c0_i32_0 = arith.constant 0 : i32
    %c0_i32_1 = arith.constant 0 : i32
    %c0_i32_2 = arith.constant 0 : i32
    return %c0_i32, %c0_i32_0, %c0_i32_1 : i32, i32, i32
  }
  func.func @transform_5(%arg0: i32, %arg1: i32) -> (i32, i32, i32) {
    %c0_i32 = arith.constant 0 : i32
    %c0_i32_0 = arith.constant 0 : i32
    %c0_i32_1 = arith.constant 0 : i32
    %c0_i32_2 = arith.constant 0 : i32
    return %c0_i32, %c0_i32_0, %c0_i32_1 : i32, i32, i32
  }
  func.func @transform_6(%arg0: i32, %arg1: i32) -> (i32, i32, i32) {
    %c0_i32 = arith.constant 0 : i32
    %c0_i32_0 = arith.constant 0 : i32
    %c0_i32_1 = arith.constant 0 : i32
    %c0_i32_2 = arith.constant 0 : i32
    return %c0_i32, %c0_i32_0, %c0_i32_1 : i32, i32, i32
  }
  func.func @transform_7(%arg0: i32, %arg1: i32) -> (i32, i32, i32) {
    %c0_i32 = arith.constant 0 : i32
    %c0_i32_0 = arith.constant 0 : i32
    %c0_i32_1 = arith.constant 0 : i32
    %c0_i32_2 = arith.constant 0 : i32
    return %c0_i32, %c0_i32_0, %c0_i32_1 : i32, i32, i32
  }
  func.func @transform_8(%arg0: i32, %arg1: i32) -> (i32, i32) {
    %c0_i32 = arith.constant 0 : i32
    %c0_i32_0 = arith.constant 0 : i32
    %c0_i32_1 = arith.constant 0 : i32
    return %c0_i32, %c0_i32_0 : i32, i32
  }
  func.func @transform_9(%arg0: i32, %arg1: i32) -> (i32, i32) {
    %c0_i32 = arith.constant 0 : i32
    %c0_i32_0 = arith.constant 0 : i32
    %c0_i32_1 = arith.constant 0 : i32
    return %c0_i32, %c0_i32_0 : i32, i32
  }
  func.func @transform_10(%arg0: i32, %arg1: i32) -> (i32, i32) {
    %c0_i32 = arith.constant 0 : i32
    %c0_i32_0 = arith.constant 0 : i32
    %c0_i32_1 = arith.constant 0 : i32
    return %c0_i32, %c0_i32_0 : i32, i32
  }
  func.func @transform_11(%arg0: i32, %arg1: i32) -> (i32, i32, i32) {
    %c0_i32 = arith.constant 0 : i32
    %c0_i32_0 = arith.constant 0 : i32
    return %arg0, %arg1, %c0_i32 : i32, i32, i32
  }
}

module attributes {stable_mosaic.version = 11 : i64} {
  func.func @_ffn_kernel(%arg0: i32, %arg1: memref<16x64xf32, #tpu.memory_space<vmem>>, %arg2: memref<64x2048xbf16, #tpu.memory_space<vmem>>, %arg3: memref<1x2048xf32, #tpu.memory_space<vmem>>, %arg4: memref<2048x64xbf16, #tpu.memory_space<vmem>>, %arg5: memref<1x64xf32, #tpu.memory_space<vmem>>, %arg6: memref<1x64xf32, #tpu.memory_space<vmem>>, %arg7: memref<1x64xf32, #tpu.memory_space<vmem>>, %arg8: memref<16x64xf32, #tpu.memory_space<vmem>>) attributes {dimension_semantics = [#tpu.dimension_semantics<parallel>], iteration_bounds = array<i64: 1>, scalar_prefetch = 0 : i64, scratch_operands = 0 : i64, tpu.core_type = #tpu.core_type<tc>, window_params = [{transform_indices = @transform_0, window_bounds = array<i64: 16, 64>}, {pipeline_mode = #tpu.pipeline_mode<synchronous>, transform_indices = @transform_1, window_bounds = array<i64: 64, 2048>}, {pipeline_mode = #tpu.pipeline_mode<synchronous>, transform_indices = @transform_2, window_bounds = array<i64: 1, 2048>}, {pipeline_mode = #tpu.pipeline_mode<synchronous>, transform_indices = @transform_3, window_bounds = array<i64: 2048, 64>}, {pipeline_mode = #tpu.pipeline_mode<synchronous>, transform_indices = @transform_4, window_bounds = array<i64: 1, 64>}, {pipeline_mode = #tpu.pipeline_mode<synchronous>, transform_indices = @transform_5, window_bounds = array<i64: 1, 64>}, {pipeline_mode = #tpu.pipeline_mode<synchronous>, transform_indices = @transform_6, window_bounds = array<i64: 1, 64>}, {transform_indices = @transform_7, window_bounds = array<i64: 16, 64>}]} {
    %c0 = arith.constant 0 : index
    %c0_0 = arith.constant 0 : index
    %0 = vector.load %arg1[%c0, %c0_0] : memref<16x64xf32, #tpu.memory_space<vmem>>, vector<16x64xf32>
    %1 = arith.truncf %0 : vector<16x64xf32> to vector<16x64xbf16>
    %c0_1 = arith.constant 0 : index
    %c0_2 = arith.constant 0 : index
    %2 = vector.load %arg2[%c0_1, %c0_2] : memref<64x2048xbf16, #tpu.memory_space<vmem>>, vector<64x2048xbf16>
    %cst = arith.constant dense<0.000000e+00> : vector<16x2048xf32>
    %3 = tpu.matmul %1, %2, %cst {dimension_numbers = #tpu.dot_dimension_numbers<[1], [0], [0], [1], [0, 0, 1, 1], [], []>} : vector<16x64xbf16>, vector<64x2048xbf16>, vector<16x2048xf32> -> vector<16x2048xf32>
    %c0_3 = arith.constant 0 : index
    %c0_4 = arith.constant 0 : index
    %4 = vector.load %arg3[%c0_3, %c0_4] : memref<1x2048xf32, #tpu.memory_space<vmem>>, vector<1x2048xf32>
    %5 = vector.broadcast %4 : vector<1x2048xf32> to vector<16x2048xf32>
    %6 = arith.addf %3, %5 : vector<16x2048xf32>
    %cst_5 = arith.constant 0.000000e+00 : f32
    %7 = vector.broadcast %cst_5 : f32 to vector<16x2048xf32>
    %8 = arith.maximumf %6, %7 : vector<16x2048xf32>
    %9 = arith.truncf %8 : vector<16x2048xf32> to vector<16x2048xbf16>
    %c0_6 = arith.constant 0 : index
    %c0_7 = arith.constant 0 : index
    %10 = vector.load %arg4[%c0_6, %c0_7] : memref<2048x64xbf16, #tpu.memory_space<vmem>>, vector<2048x64xbf16>
    %cst_8 = arith.constant dense<0.000000e+00> : vector<16x64xf32>
    %11 = tpu.matmul %9, %10, %cst_8 {dimension_numbers = #tpu.dot_dimension_numbers<[1], [0], [0], [1], [0, 0, 1, 1], [], []>} : vector<16x2048xbf16>, vector<2048x64xbf16>, vector<16x64xf32> -> vector<16x64xf32>
    %c0_9 = arith.constant 0 : index
    %c0_10 = arith.constant 0 : index
    %12 = vector.load %arg5[%c0_9, %c0_10] : memref<1x64xf32, #tpu.memory_space<vmem>>, vector<1x64xf32>
    %13 = vector.broadcast %12 : vector<1x64xf32> to vector<16x64xf32>
    %14 = arith.addf %11, %13 : vector<16x64xf32>
    %15 = arith.addf %0, %14 : vector<16x64xf32>
    %cst_11 = arith.constant dense<0.000000e+00> : vector<16xf32>
    %16 = vector.multi_reduction <add>, %15, %cst_11 [1] : vector<16x64xf32> to vector<16xf32>
    %17 = vector.shape_cast %16 : vector<16xf32> to vector<16x1xf32>
    %cst_12 = arith.constant 6.400000e+01 : f32
    %18 = vector.broadcast %cst_12 : f32 to vector<16x1xf32>
    %19 = arith.divf %17, %18 : vector<16x1xf32>
    %20 = vector.broadcast %19 : vector<16x1xf32> to vector<16x64xf32>
    %21 = arith.subf %15, %20 : vector<16x64xf32>
    %22 = arith.mulf %21, %21 : vector<16x64xf32>
    %cst_13 = arith.constant dense<0.000000e+00> : vector<16xf32>
    %23 = vector.multi_reduction <add>, %22, %cst_13 [1] : vector<16x64xf32> to vector<16xf32>
    %24 = vector.shape_cast %23 : vector<16xf32> to vector<16x1xf32>
    %cst_14 = arith.constant 6.400000e+01 : f32
    %25 = vector.broadcast %cst_14 : f32 to vector<16x1xf32>
    %26 = arith.divf %24, %25 : vector<16x1xf32>
    %27 = vector.broadcast %19 : vector<16x1xf32> to vector<16x64xf32>
    %28 = arith.subf %15, %27 : vector<16x64xf32>
    %cst_15 = arith.constant 9.99999974E-6 : f32
    %29 = vector.broadcast %cst_15 : f32 to vector<16x1xf32>
    %30 = arith.addf %26, %29 : vector<16x1xf32>
    %31 = math.rsqrt %30 : vector<16x1xf32>
    %32 = vector.broadcast %31 : vector<16x1xf32> to vector<16x64xf32>
    %33 = arith.mulf %28, %32 : vector<16x64xf32>
    %c0_16 = arith.constant 0 : index
    %c0_17 = arith.constant 0 : index
    %34 = vector.load %arg6[%c0_16, %c0_17] : memref<1x64xf32, #tpu.memory_space<vmem>>, vector<1x64xf32>
    %35 = vector.broadcast %34 : vector<1x64xf32> to vector<16x64xf32>
    %36 = arith.mulf %33, %35 : vector<16x64xf32>
    %c0_18 = arith.constant 0 : index
    %c0_19 = arith.constant 0 : index
    %37 = vector.load %arg7[%c0_18, %c0_19] : memref<1x64xf32, #tpu.memory_space<vmem>>, vector<1x64xf32>
    %38 = vector.broadcast %37 : vector<1x64xf32> to vector<16x64xf32>
    %39 = arith.addf %36, %38 : vector<16x64xf32>
    %c0_20 = arith.constant 0 : index
    %c0_21 = arith.constant 0 : index
    %40 = vector.load %arg8[%c0_20, %c0_21] : memref<16x64xf32, #tpu.memory_space<vmem>>, vector<16x64xf32>
    tpu.vector_store %arg8[%c0_20, %c0_21], %39 {strides = array<i32>} : memref<16x64xf32, #tpu.memory_space<vmem>>, vector<16x64xf32>,
    return
  }
  func.func @transform_0(%arg0: i32) -> (i32, i32) {
    %c0_i32 = arith.constant 0 : i32
    %c0_i32_0 = arith.constant 0 : i32
    return %arg0, %c0_i32 : i32, i32
  }
  func.func @transform_1(%arg0: i32) -> (i32, i32) {
    %c0_i32 = arith.constant 0 : i32
    %c0_i32_0 = arith.constant 0 : i32
    %c0_i32_1 = arith.constant 0 : i32
    return %c0_i32, %c0_i32_0 : i32, i32
  }
  func.func @transform_2(%arg0: i32) -> (i32, i32) {
    %c0_i32 = arith.constant 0 : i32
    %c0_i32_0 = arith.constant 0 : i32
    %c0_i32_1 = arith.constant 0 : i32
    return %c0_i32, %c0_i32_0 : i32, i32
  }
  func.func @transform_3(%arg0: i32) -> (i32, i32) {
    %c0_i32 = arith.constant 0 : i32
    %c0_i32_0 = arith.constant 0 : i32
    %c0_i32_1 = arith.constant 0 : i32
    return %c0_i32, %c0_i32_0 : i32, i32
  }
  func.func @transform_4(%arg0: i32) -> (i32, i32) {
    %c0_i32 = arith.constant 0 : i32
    %c0_i32_0 = arith.constant 0 : i32
    %c0_i32_1 = arith.constant 0 : i32
    return %c0_i32, %c0_i32_0 : i32, i32
  }
  func.func @transform_5(%arg0: i32) -> (i32, i32) {
    %c0_i32 = arith.constant 0 : i32
    %c0_i32_0 = arith.constant 0 : i32
    %c0_i32_1 = arith.constant 0 : i32
    return %c0_i32, %c0_i32_0 : i32, i32
  }
  func.func @transform_6(%arg0: i32) -> (i32, i32) {
    %c0_i32 = arith.constant 0 : i32
    %c0_i32_0 = arith.constant 0 : i32
    %c0_i32_1 = arith.constant 0 : i32
    return %c0_i32, %c0_i32_0 : i32, i32
  }
  func.func @transform_7(%arg0: i32) -> (i32, i32) {
    %c0_i32 = arith.constant 0 : i32
    %c0_i32_0 = arith.constant 0 : i32
    return %arg0, %c0_i32 : i32, i32
  }
}

module attributes {stable_mosaic.version = 11 : i64} {
  func.func @_linear_kernel_1k(%arg0: i32, %arg1: memref<16x64xbf16, #tpu.memory_space<vmem>>, %arg2: memref<64x256xbf16, #tpu.memory_space<vmem>>, %arg3: memref<1x256xf32, #tpu.memory_space<vmem>>, %arg4: memref<16x256xf32, #tpu.memory_space<vmem>>) attributes {dimension_semantics = [#tpu.dimension_semantics<parallel>], iteration_bounds = array<i64: 1>, scalar_prefetch = 0 : i64, scratch_operands = 0 : i64, tpu.core_type = #tpu.core_type<tc>, window_params = [{transform_indices = @transform_0, window_bounds = array<i64: 16, 64>}, {pipeline_mode = #tpu.pipeline_mode<synchronous>, transform_indices = @transform_1, window_bounds = array<i64: 64, 256>}, {pipeline_mode = #tpu.pipeline_mode<synchronous>, transform_indices = @transform_2, window_bounds = array<i64: 1, 256>}, {transform_indices = @transform_3, window_bounds = array<i64: 16, 256>}]} {
    %c0 = arith.constant 0 : index
    %c0_0 = arith.constant 0 : index
    %0 = vector.load %arg1[%c0, %c0_0] : memref<16x64xbf16, #tpu.memory_space<vmem>>, vector<16x64xbf16>
    %c0_1 = arith.constant 0 : index
    %c0_2 = arith.constant 0 : index
    %1 = vector.load %arg2[%c0_1, %c0_2] : memref<64x256xbf16, #tpu.memory_space<vmem>>, vector<64x256xbf16>
    %cst = arith.constant dense<0.000000e+00> : vector<16x256xf32>
    %2 = tpu.matmul %0, %1, %cst {dimension_numbers = #tpu.dot_dimension_numbers<[1], [0], [0], [1], [0, 0, 1, 1], [], []>} : vector<16x64xbf16>, vector<64x256xbf16>, vector<16x256xf32> -> vector<16x256xf32>
    %c0_3 = arith.constant 0 : index
    %c0_4 = arith.constant 0 : index
    %3 = vector.load %arg3[%c0_3, %c0_4] : memref<1x256xf32, #tpu.memory_space<vmem>>, vector<1x256xf32>
    %4 = vector.broadcast %3 : vector<1x256xf32> to vector<16x256xf32>
    %5 = arith.addf %2, %4 : vector<16x256xf32>
    %c0_5 = arith.constant 0 : index
    %c0_6 = arith.constant 0 : index
    %6 = vector.load %arg4[%c0_5, %c0_6] : memref<16x256xf32, #tpu.memory_space<vmem>>, vector<16x256xf32>
    tpu.vector_store %arg4[%c0_5, %c0_6], %5 {strides = array<i32>} : memref<16x256xf32, #tpu.memory_space<vmem>>, vector<16x256xf32>,
    return
  }
  func.func @transform_0(%arg0: i32) -> (i32, i32) {
    %c0_i32 = arith.constant 0 : i32
    %c0_i32_0 = arith.constant 0 : i32
    return %arg0, %c0_i32 : i32, i32
  }
  func.func @transform_1(%arg0: i32) -> (i32, i32) {
    %c0_i32 = arith.constant 0 : i32
    %c0_i32_0 = arith.constant 0 : i32
    %c0_i32_1 = arith.constant 0 : i32
    return %c0_i32, %c0_i32_0 : i32, i32
  }
  func.func @transform_2(%arg0: i32) -> (i32, i32) {
    %c0_i32 = arith.constant 0 : i32
    %c0_i32_0 = arith.constant 0 : i32
    %c0_i32_1 = arith.constant 0 : i32
    return %c0_i32, %c0_i32_0 : i32, i32
  }
  func.func @transform_3(%arg0: i32) -> (i32, i32) {
    %c0_i32 = arith.constant 0 : i32
    %c0_i32_0 = arith.constant 0 : i32
    return %arg0, %c0_i32 : i32, i32
  }
}

</mosaic_0001>

<bundles_post_ra>
// kernel: vit4d_forward.6
= control target key start
LH: loop header
LB: loop body
LE: loop exit
PB: predicated region body
PF: predicated region fallthrough
CT: control target
= control target key end

     0   :  { %s1068_s15 = smov 0   ;;  %s1070_s16 = smov 0   ;;  %s1240_s0 = inlined_call_operand.vmem [shape: bf16[2,8,640], index: 0, kind: input, shape index: {}]   ;;  %s1241_s1 = inlined_call_operand.vmem [shape: bf16[640,64], index: 1, kind: input, shape index: {}]   ;;  %s1242_s2 = inlined_call_operand.vmem [shape: f32[1,64], index: 2, kind: input, shape index: {}]   ;;  %s1243_s3 = inlined_call_operand.vmem [shape: f32[8,64], index: 3, kind: input, shape index: {}]   ;;  %s1244_s4 = inlined_call_operand.vmem [shape: f32[2,8,64], index: 4, kind: output, shape index: {}]  }
   0x1   :  { %s1072_s17 = smov 0  }
   0x2 LB: > { %s26_s18 = sadd.s32 1, %s1035_s16  ;;  %p821_p0 = scmp.ge.s32.totalorder %s1039_s17, 1  ;;  %s1039_s17 = sphi %s1072_s17, %s14_s17   ;;  %s1035_s16 = sphi %s1070_s16, %s1246_s16   ;;  %s1031_s15 = sphi %s1068_s15, %s1245_s15  }
   0x3   : > { %p28_p1 = scmp.ge.s32.totalorder %s26_s18, 2  ;;  %p191_p2 = scmp.lt.s32.totalorder %s1039_s17, 3 }
   0x5   : > { %s1248_s18 = smov (%p28_p1, %s26_s18), 0  ;;  %p192_p3 = pnand %p821_p0, %p191_p2 }
   0x6   : > { %v972_v0 = vld [vmem:[%s1241_s1 + $0x40] sm:$0xff] (!%p192_p3)   ;;  %v976_v4 = vld [vmem:[%s1241_s1 + $0x48] sm:$0xff] (!%p192_p3)   ;;  %v980_v8 = vld [vmem:[%s1241_s1 + $0x50] sm:$0xff] (!%p192_p3)   ;;  %p227_p4 = scmp.lt.s32.totalorder (!%p192_p3), %s1031_s15, 1  ;;  %v1041_v35 = vmov (!%p192_p3), 0.0   ;;  %vm1042_vm0 = vmmov (!%p192_p3), 0  }
   0x7   : > { %195 = sbr.rel (%p192_p3) target bundleno = 288 (0x120), region = 36  ;;  %v973_v1 = vld [vmem:[%s1241_s1] sm:$0xff] (!%p192_p3)   ;;  %872 = vmatprep.subr.bf16.mxu0 (!%p192_p3), %v972_v0  ;;  %v977_v5 = vld [vmem:[%s1241_s1 + $0x8] sm:$0xff] (!%p192_p3)   ;;  %v981_v9 = vld [vmem:[%s1241_s1 + $0x10] sm:$0xff] (!%p192_p3)   ;;  %vm718_vm1 = vcmask (!%p192_p3), 523264  }
   0x8   : > { %v974_v2 = vld [vmem:[%s1241_s1 + $0xc0] sm:$0xff] (!%p192_p3)   ;;  %873 = vmatpush3.bf16.msra.mxu0 (!%p192_p3), %v973_v1  ;;  %v978_v6 = vld [vmem:[%s1241_s1 + $0xc8] sm:$0xff] (!%p192_p3)   ;;  %v982_v10 = vld [vmem:[%s1241_s1 + $0xd0] sm:$0xff] (!%p192_p3)  }
   0x9   : > { %v975_v3 = vld [vmem:[%s1241_s1 + $0x80] sm:$0xff] (!%p192_p3)   ;;  %894 = vmatprep.subr.bf16.mxu1 (!%p192_p3), %v974_v2  ;;  %874 = vmatprep.subr.bf16.mxu0 (!%p192_p3), %v976_v4  ;;  %v979_v7 = vld [vmem:[%s1241_s1 + $0x88] sm:$0xff] (!%p192_p3)   ;;  %v983_v11 = vld [vmem:[%s1241_s1 + $0x90] sm:$0xff] (!%p192_p3)  }
   0xa   : > { %895 = vmatpush3.bf16.msra.mxu1 (!%p192_p3), %v975_v3  ;;  %v984_v12 = vld [vmem:[%s1241_s1 + $0x58] sm:$0xff] (!%p192_p3)   ;;  %v988_v16 = vld [vmem:[%s1241_s1 + $0x60] sm:$0xff] (!%p192_p3)   ;;  %v992_v20 = vld [vmem:[%s1241_s1 + $0x68] sm:$0xff] (!%p192_p3)  }
   0xb   : > { %896 = vmatprep.subr.bf16.mxu1 (!%p192_p3), %v978_v6  ;;  %v985_v13 = vld [vmem:[%s1241_s1 + $0x18] sm:$0xff] (!%p192_p3)   ;;  %v989_v17 = vld [vmem:[%s1241_s1 + $0x20] sm:$0xff] (!%p192_p3)   ;;  %v993_v21 = vld [vmem:[%s1241_s1 + $0x28] sm:$0xff] (!%p192_p3)  }
   0xc   : > { %875 = vmatpush3.bf16.msra.mxu0 (!%p192_p3), %v977_v5  ;;  %v986_v14 = vld [vmem:[%s1241_s1 + $0xd8] sm:$0xff] (!%p192_p3)   ;;  %v990_v18 = vld [vmem:[%s1241_s1 + $0xe0] sm:$0xff] (!%p192_p3)   ;;  %v994_v22 = vld [vmem:[%s1241_s1 + $0xe8] sm:$0xff] (!%p192_p3)  }
   0xd   : > { %876 = vmatprep.subr.bf16.mxu0 (!%p192_p3), %v980_v8  ;;  %v987_v15 = vld [vmem:[%s1241_s1 + $0x98] sm:$0xff] (!%p192_p3)   ;;  %v991_v19 = vld [vmem:[%s1241_s1 + $0xa0] sm:$0xff] (!%p192_p3)   ;;  %v995_v23 = vld [vmem:[%s1241_s1 + $0xa8] sm:$0xff] (!%p192_p3)  }
   0xe   : > { %897 = vmatpush3.bf16.msra.mxu1 %v979_v7  ;;  %s1250_s15 = smov (!%p227_p4, %s1031_s15), 1  ;;  %v996_v24 = vld [vmem:[%s1241_s1 + $0x70] sm:$0xff]   ;;  %v1000_v28 = vld [vmem:[%s1241_s1 + $0x78] sm:$0xff]   ;;  %v1009_v39 = vld [vmem:[%s1241_s1 + $0x100] sm:$0xff]  }
   0xf   : > { %898 = vmatprep.subr.bf16.mxu1 %v982_v10  ;;  %s945_s25 = smul.u32 20, %s1250_s15  ;;  %v997_v25 = vld [vmem:[%s1241_s1 + $0x30] sm:$0xff]   ;;  %v1001_v29 = vld [vmem:[%s1241_s1 + $0x38] sm:$0xff]   ;;  %v1010_v40 = vld [vmem:[%s1241_s1 + $0x108] sm:$0xff]  }
  0x10   : > { %877 = vmatpush3.bf16.msra.mxu0 %v981_v9  ;;  %v998_v26 = vld [vmem:[%s1241_s1 + $0xf0] sm:$0xff]   ;;  %v1002_v30 = vld [vmem:[%s1241_s1 + $0xf8] sm:$0xff]   ;;  %v1013_v43 = vld [vmem:[%s1241_s1 + $0x120] sm:$0xff]  }
  0x11   : > { %878 = vmatprep.subr.bf16.mxu0 %v984_v12  ;;  %v999_v27 = vld [vmem:[%s1241_s1 + $0xb0] sm:$0xff]   ;;  %s1183_s10 = scalar_lea.vmem %s1240_s0, %s945_s25  ;;  %v1006_v34 = vld [vmem:[%s1241_s1 + $0xb8] sm:$0xff]   ;;  %v1014_v44 = vld [vmem:[%s1241_s1 + $0x128] sm:$0xff]  }
  0x12   : > { %899 = vmatpush3.bf16.msra.mxu1 %v983_v11  ;;  %v248_v31 = vld [vmem:[%s1183_s10] sm:$0xff]  ;;  %v249_v36 = vld [vmem:[%s1183_s10 + $0x8] sm:$0xff]  ;;  %v1011_v41 = vld [vmem:[%s1241_s1 + $0x110] sm:$0xff]  }
  0x13   : > { %900 = vmatprep.subr.bf16.mxu1 %v986_v14  ;;  %v825_v32 = vcombine.low %v248_v31, %v248_v31  ;;  %v826_v33 = vcombine.high %v248_v31, %v248_v31  ;;  %v827_v37 = vcombine.low %v249_v36, %v249_v36  ;;  %v828_v38 = vcombine.high %v249_v36, %v249_v36  ;;  %v1012_v42 = vld [vmem:[%s1241_s1 + $0x118] sm:$0xff]   ;;  %v1015_v45 = vld [vmem:[%s1241_s1 + $0x130] sm:$0xff]   ;;  %v824_v49 = vld [vmem:[%s1242_s2] ss:$0 sm:$0xff] }
  0x14   : > { %879 = vmatpush3.bf16.msra.mxu0 %v985_v13  ;;  %v1016_v46 = vld [vmem:[%s1241_s1 + $0x138] sm:$0xff]   ;;  %v1005_v47 = vld [vmem:[%s1183_s10 + $0x10] ss:$0 sps:$4 sm:$0xff]   ;;  %s823_s10 = sshll.u32 %s1250_s15, 3  ;;  %v716_v62 = vld [vmem:[%s1243_s3] sm:$0xff] }
  0x15   : > { %880 = vmatprep.subr.bf16.mxu0 %v988_v16  ;;  %628 = vmatprep.mubr.bf16.mxu0 %v826_v33  ;;  %s246_s22 = scalar_lea.vmem %s1244_s4, %s823_s10 }
  0x16   : > { %901 = vmatpush3.bf16.msra.mxu1 %v987_v15  ;;  %668 = vmatprep.mubr.bf16.mxu1 %v828_v38 }
  0x17   : > { %902 = vmatprep.subr.bf16.mxu1 %v990_v18 }
  0x18   : > { %881 = vmatpush3.bf16.msra.mxu0 %v989_v17 }
  0x19   : > { %882 = vmatprep.subr.bf16.mxu0 %v992_v20 }
  0x1a   : > { %903 = vmatpush3.bf16.msra.mxu1 %v991_v19 }
  0x1b   : > { %904 = vmatprep.subr.bf16.mxu1 %v994_v22 }
  0x1c   : > { %883 = vmatpush3.bf16.msra.mxu0 %v993_v21 }
  0x1d   : > { %884 = vmatprep.subr.bf16.mxu0 %v996_v24 }
  0x1e   : > { %905 = vmatpush3.bf16.msra.mxu1 %v995_v23 }
  0x1f   : > { %906 = vmatprep.subr.bf16.mxu1 %v998_v26 }
  0x20   : > { %885 = vmatpush3.bf16.msra.mxu0 %v997_v25 }
  0x21   : > { %886 = vmatprep.subr.bf16.mxu0 %v1000_v28 }
  0x22   : > { %907 = vmatpush3.bf16.msra.mxu1 %v999_v27 }
  0x23   : > { %908 = vmatprep.subr.bf16.mxu1 %v1002_v30 }
  0x24   : > { %887 = vmatpush3.bf16.msra.mxu0 %v1001_v29 }
  0x25   : > { %925 = vmatprep.subr.bf16.mxu0 %v1041_v35 }
  0x26   : > { %909 = vmatpush3.bf16.msra.mxu1 %v1006_v34 }
  0x27   : > { %629 = vmatmul.mubr.bf16.vlgmr.msra.gmra.mrb[0].mxu0 %v825_v32 }
  0x28   : > { %926 = vmatpush3.bf16.msra.mxu0 %v1009_v39  ;;  %941 = vmatprep.mubr.msk.bf16.mxu0 %vm1042_vm0, %v1041_v35 }
  0x29   : > { %669 = vmatmul.mubr.bf16.vlgmr.msra.gmra.mrb[0].mxu1 %v827_v37  ;;  %927 = vmatprep.subr.bf16.mxu0 %v1041_v35 }
  0x2c   : > { %928 = vmatpush3.bf16.msra.mxu0 %v1010_v40 }
  0x2d   : > { %929 = vmatprep.subr.bf16.mxu0 %v1041_v35 }
  0x30   : > { %930 = vmatpush3.bf16.msra.mxu0 %v1011_v41 }
  0x31   : > { %931 = vmatprep.subr.bf16.mxu0 %v1041_v35 }
  0x34   : > { %932 = vmatpush3.bf16.msra.mxu0 %v1012_v42 }
  0x35   : > { %933 = vmatprep.subr.bf16.mxu0 %v1041_v35 }
  0x38   : > { %934 = vmatpush3.bf16.msra.mxu0 %v1013_v43 }
  0x39   : > { %935 = vmatprep.subr.bf16.mxu0 %v1041_v35 }
  0x3c   : > { %936 = vmatpush3.bf16.msra.mxu0 %v1014_v44 }
  0x3d   : > { %937 = vmatprep.subr.bf16.mxu0 %v1041_v35 }
  0x40   : > { %938 = vmatpush3.bf16.msra.mxu0 %v1015_v45 }
  0x41   : > { %939 = vmatprep.subr.bf16.mxu0 %v1041_v35 }
  0x44   : > { %940 = vmatpush3.bf16.msra.mxu0 %v1016_v46 }
  0x47   : > { %942 = vmatmul.mubr.bf16.vlgmr.msra.gmra.mrb[4].mxu0 %v1005_v47 }
  0xfa   : > { %v888_v48 = vpop.f32.mrb[0].mxu0 }
  0xfb   : > { %v889_v50 = vpop.f32.mrb[1].mxu0 }
  0xfc   : > { %v890_v51 = vadd.f32 %v889_v50, %v888_v48  ;;  %v891_v52 = vpop.f32.mrb[2].mxu0  ;;  %v910_v53 = vpop.f32.mrb[0].mxu1 }
  0xfd   : > { %v892_v54 = vpop.f32.mrb[3].mxu0  ;;  %v911_v55 = vpop.f32.mrb[1].mxu1 }
  0xfe   : > { %v631_v56 = vadd.f32 %v890_v51, %v824_v49  ;;  %v912_v57 = vadd.f32 %v911_v55, %v910_v53  ;;  %v913_v58 = vpop.f32.mrb[2].mxu1 }
  0xff   : > { %v914_v59 = vpop.f32.mrb[3].mxu1 }
 0x100   : > { %v671_v60 = vadd.f32 %v912_v57, %v631_v56 }
 0x11a   : > { %v710_v61 = vpop.f32.mrb[4].mxu0 }
 0x11b   : > { %v711_v63 = vadd.f32 %v710_v61, %v671_v60  ;;  %v943_v0 = vpop.f32.mrb[5].mxu0 }
 0x11c   : > { %v713_v1 = vpop.f32.mrb[6].mxu0 }
 0x11d   : > { %v717_v2 = vadd.f32 %v716_v62, %v711_v63  ;;  %v944_v3 = vpop.f32.mrb[7].mxu0 }
 0x11f   : > { %719 = vst.msk [vmem:[%s246_s22] sm:$0xff] %vm718_vm1, %v717_v2 }
 0x120 PF: > { %s14_s17 = sadd.s32 1, %s1039_s17   ;;  %s1245_s15 = smov %s1035_s16 }
 0x121   : > { %p11_p5 = scmp.ge.s32.totalorder %s14_s17, 4   ;;  %s1246_s16 = smov %s1248_s18 }
 0x123   :  { %13 = sbr.rel (!%p11_p5) target bundleno = 2 (0x2), region = 69 }

// kernel: vit4d_forward.7
= control target key start
LH: loop header
LB: loop body
LE: loop exit
PB: predicated region body
PF: predicated region fallthrough
CT: control target
= control target key end

     0   :  { %s4713_s17 = smov 0   ;;  %s4715_s18 = smov 0   ;;  %s5551_s0 = inlined_call_operand.vmem [shape: f32[2,8,64], index: 0, kind: input, shape index: {}]   ;;  %s5552_s1 = inlined_call_operand.vmem [shape: bf16[8,64,8], index: 1, kind: input, shape index: {}]   ;;  %s5553_s2 = inlined_call_operand.vmem [shape: bf16[8,64,8], index: 2, kind: input, shape index: {}]   ;;  %s5554_s3 = inlined_call_operand.vmem [shape: bf16[8,64,8], index: 3, kind: input, shape index: {}]   ;;  %s5555_s4 = inlined_call_operand.vmem [shape: f32[8,1,8], index: 4, kind: input, shape index: {}]   ;;  %s5556_s5 = inlined_call_operand.vmem [shape: f32[8,1,8], index: 5, kind: input, shape index: {}]   ;;  %s5557_s6 = inlined_call_operand.vmem [shape: f32[8,1,8], index: 6, kind: input, shape index: {}]   ;;  %s5558_s7 = inlined_call_operand.vmem [shape: bf16[8,8,64], index: 7, kind: input, shape index: {}]   ;;  %s5559_s8 = inlined_call_operand.vmem [shape: f32[1,64], index: 8, kind: input, shape index: {}]   ;;  %s5560_s9 = inlined_call_operand.vmem [shape: f32[1,64], index: 9, kind: input, shape index: {}]   ;;  %s5561_s10 = inlined_call_operand.vmem [shape: f32[1,64], index: 10, kind: input, shape index: {}]   ;;  %s5562_s11 = inlined_call_operand.vmem [shape: f32[2,8,64], index: 11, kind: output, shape index: {}]  }
   0x1   :  { %s4717_s19 = smov 0  }
   0x2 LB: > { %s33_s20 = sadd.s32 1, %s4645_s18  ;;  %p3694_p0 = scmp.ge.s32.totalorder %s4649_s19, 1  ;;  %s4649_s19 = sphi %s4717_s19, %s21_s19   ;;  %s4645_s18 = sphi %s4715_s18, %s5564_s18   ;;  %s4641_s17 = sphi %s4713_s17, %s5563_s17  }
   0x3   : > { %p35_p1 = scmp.ge.s32.totalorder %s33_s20, 2  ;;  %p350_p2 = scmp.lt.s32.totalorder %s4649_s19, 3 }
   0x5   : > { %s5566_s20 = smov (%p35_p1, %s33_s20), 0  ;;  %p351_p3 = pnand %p3694_p0, %p350_p2 }
   0x6   : > { %v4496_v0 = vld [vmem:[%s5552_s1] sm:$0xff] (!%p351_p3)   ;;  %v4651_v1 = vmov (!%p351_p3), 0.0   ;;  %v4498_v3 = vld [vmem:[%s5552_s1 + $0x8] sm:$0xff] (!%p351_p3)   ;;  %vm4652_vm0 = vmmov (!%p351_p3), 0   ;;  %p391_p4 = scmp.lt.s32.totalorder (!%p351_p3), %s4641_s17, 1  ;;  %v4500_v5 = vld [vmem:[%s5552_s1 + $0x10] sm:$0xff] (!%p351_p3)  }
   0x7   : > { %354 = sbr.rel (%p351_p3) target bundleno = 1636 (0x664), region = 64  ;;  %4038 = vmatprep.subr.bf16.mxu0 (!%p351_p3), %v4651_v1  ;;  %4050 = vmatprep.subr.bf16.mxu1 (!%p351_p3), %v4651_v1  ;;  %v4497_v2 = vld [vmem:[%s5552_s1 + $0x20] sm:$0xff] (!%p351_p3)   ;;  %v4499_v4 = vld [vmem:[%s5552_s1 + $0x28] sm:$0xff] (!%p351_p3)   ;;  %v4501_v6 = vld [vmem:[%s5552_s1 + $0x30] sm:$0xff] (!%p351_p3)   ;;  %vm681_vm1 = vcmask (!%p351_p3), 523264   ;;  %vm2336_vm2 = vcmask (!%p351_p3), 64512  }
   0x8   : > { %4039 = vmatpush3.bf16.msra.mxu0 (!%p351_p3), %v4496_v0  ;;  %4046 = vmatprep.mubr.msk.bf16.mxu0 (!%p351_p3), %vm4652_vm0, %v4651_v1  ;;  %v4502_v7 = vld [vmem:[%s5552_s1 + $0x18] sm:$0xff] (!%p351_p3)   ;;  %v4504_v11 = vld [vmem:[%s5552_s1 + $0x40] sm:$0xff] (!%p351_p3)   ;;  %v4506_v13 = vld [vmem:[%s5552_s1 + $0x48] sm:$0xff] (!%p351_p3)   ;;  %vm2812_vm3 = vcmask (!%p351_p3), 1043456  }
   0x9   : > { %4051 = vmatpush3.bf16.msra.mxu1 (!%p351_p3), %v4497_v2  ;;  %4040 = vmatprep.subr.bf16.mxu0 (!%p351_p3), %v4651_v1  ;;  %v4503_v9 = vld [vmem:[%s5552_s1 + $0x38] sm:$0xff] (!%p351_p3)   ;;  %v4505_v12 = vld [vmem:[%s5552_s1 + $0x60] sm:$0xff] (!%p351_p3)   ;;  %v4507_v14 = vld [vmem:[%s5552_s1 + $0x68] sm:$0xff] (!%p351_p3)  }
   0xa   : > { %4052 = vmatprep.subr.bf16.mxu1 (!%p351_p3), %v4651_v1  ;;  %4058 = vmatprep.mubr.msk.bf16.mxu1 (!%p351_p3), %vm4652_vm0, %v4651_v1  ;;  %v4508_v15 = vld [vmem:[%s5552_s1 + $0x50] sm:$0xff] (!%p351_p3)   ;;  %v4510_v17 = vld [vmem:[%s5552_s1 + $0x58] sm:$0xff] (!%p351_p3)   ;;  %v4512_v19 = vld [vmem:[%s5552_s1 + $0x80] sm:$0xff] (!%p351_p3)  }
   0xb   : > { %v4509_v16 = vld [vmem:[%s5552_s1 + $0x70] sm:$0xff] (!%p351_p3)   ;;  %v4511_v18 = vld [vmem:[%s5552_s1 + $0x78] sm:$0xff] (!%p351_p3)   ;;  %v4513_v20 = vld [vmem:[%s5552_s1 + $0xa0] sm:$0xff] (!%p351_p3)  }
   0xc   : > { %4041 = vmatpush3.bf16.msra.mxu0 (!%p351_p3), %v4498_v3  ;;  %v4514_v21 = vld [vmem:[%s5552_s1 + $0x88] sm:$0xff] (!%p351_p3)   ;;  %v4516_v23 = vld [vmem:[%s5552_s1 + $0x90] sm:$0xff] (!%p351_p3)   ;;  %v4518_v25 = vld [vmem:[%s5552_s1 + $0x98] sm:$0xff] (!%p351_p3)  }
   0xd   : > { %4053 = vmatpush3.bf16.msra.mxu1 (!%p351_p3), %v4499_v4  ;;  %4042 = vmatprep.subr.bf16.mxu0 (!%p351_p3), %v4651_v1  ;;  %v4515_v22 = vld [vmem:[%s5552_s1 + $0xa8] sm:$0xff] (!%p351_p3)   ;;  %v4517_v24 = vld [vmem:[%s5552_s1 + $0xb0] sm:$0xff] (!%p351_p3)   ;;  %v4519_v26 = vld [vmem:[%s5552_s1 + $0xb8] sm:$0xff] (!%p351_p3)  }
   0xe   : > { %s5568_s17 = smov (!%p391_p4, %s4641_s17), 1  ;;  %4054 = vmatprep.subr.bf16.mxu1 %v4651_v1  ;;  %v4520_v27 = vld [vmem:[%s5552_s1 + $0xc0] sm:$0xff]   ;;  %v4522_v29 = vld [vmem:[%s5552_s1 + $0xc8] sm:$0xff]   ;;  %v4524_v31 = vld [vmem:[%s5552_s1 + $0xd0] sm:$0xff]  }
   0xf   : > { %s3695_s12 = sshll.u32 %s5568_s17, 3  ;;  %v4521_v28 = vld [vmem:[%s5552_s1 + $0xe0] sm:$0xff]   ;;  %v4523_v30 = vld [vmem:[%s5552_s1 + $0xe8] sm:$0xff]   ;;  %v4525_v32 = vld [vmem:[%s5552_s1 + $0xf0] sm:$0xff]  }
  0x10   : > { %s4766_s21 = scalar_lea.vmem %s5551_s0, %s3695_s12  ;;  %4043 = vmatpush3.bf16.msra.mxu0 %v4500_v5  ;;  %v4526_v33 = vld [vmem:[%s5552_s1 + $0xd8] sm:$0xff]   ;;  %v4528_v35 = vld [vmem:[%s5553_s2] sm:$0xff]   ;;  %v4530_v37 = vld [vmem:[%s5553_s2 + $0x8] sm:$0xff]   ;;  %s401_s26 = scalar_lea.vmem %s5562_s11, %s3695_s12 }
  0x11   : > { %v403_v8 = vld [vmem:[%s4766_s21] sm:$0xff]  ;;  %4055 = vmatpush3.bf16.msra.mxu1 %v4501_v6  ;;  %4044 = vmatprep.subr.bf16.mxu0 %v4651_v1  ;;  %v4527_v34 = vld [vmem:[%s5552_s1 + $0xf8] sm:$0xff]   ;;  %v4531_v38 = vld [vmem:[%s5553_s2 + $0x28] sm:$0xff]  }
  0x12   : > { %4056 = vmatprep.subr.bf16.mxu1 %v4651_v1  ;;  %v4778_v10 = vpack.c.bf16 %v403_v8, %v403_v8  ;;  %v4529_v36 = vld [vmem:[%s5553_s2 + $0x20] sm:$0xff]   ;;  %v4532_v39 = vld [vmem:[%s5553_s2 + $0x10] sm:$0xff]   ;;  %v4534_v41 = vld [vmem:[%s5553_s2 + $0x18] sm:$0xff]  }
  0x13   : > { %v4533_v40 = vld [vmem:[%s5553_s2 + $0x30] sm:$0xff]   ;;  %v4535_v42 = vld [vmem:[%s5553_s2 + $0x38] sm:$0xff]   ;;  %v4536_v43 = vld [vmem:[%s5553_s2 + $0x40] sm:$0xff]  }
  0x14   : > { %4045 = vmatpush3.bf16.msra.mxu0 %v4502_v7  ;;  %v4537_v44 = vld [vmem:[%s5553_s2 + $0x60] sm:$0xff]   ;;  %v4538_v45 = vld [vmem:[%s5553_s2 + $0x48] sm:$0xff]   ;;  %v4540_v47 = vld [vmem:[%s5553_s2 + $0x50] sm:$0xff]  }
  0x15   : > { %4057 = vmatpush3.bf16.msra.mxu1 %v4503_v9  ;;  %4062 = vmatprep.subr.bf16.mxu0 %v4651_v1  ;;  %v4539_v46 = vld [vmem:[%s5553_s2 + $0x68] sm:$0xff]   ;;  %v4541_v48 = vld [vmem:[%s5553_s2 + $0x70] sm:$0xff]   ;;  %v4542_v49 = vld [vmem:[%s5553_s2 + $0x58] sm:$0xff]  }
  0x16   : > { %4074 = vmatprep.subr.bf16.mxu1 %v4651_v1  ;;  %v4543_v50 = vld [vmem:[%s5553_s2 + $0x78] sm:$0xff]   ;;  %v4544_v51 = vld [vmem:[%s5553_s2 + $0x80] sm:$0xff]   ;;  %v4546_v53 = vld [vmem:[%s5553_s2 + $0x88] sm:$0xff]  }
  0x17   : > { %4047 = vmatmul.mubr.msk.bf16.vlgmr.msra.gmra.mrb[0].mxu0 %vm681_vm1, %v4778_v10  ;;  %v4545_v52 = vld [vmem:[%s5553_s2 + $0xa0] sm:$0xff]   ;;  %v4547_v54 = vld [vmem:[%s5553_s2 + $0xa8] sm:$0xff]   ;;  %v4548_v55 = vld [vmem:[%s5553_s2 + $0x90] sm:$0xff]  }
  0x18   : > { %4059 = vmatmul.mubr.msk.bf16.vlgmr.msra.gmra.mrb[0].mxu1 %vm681_vm1, %v4778_v10  ;;  %4063 = vmatpush3.bf16.msra.mxu0 %v4504_v11  ;;  %v4549_v56 = vld [vmem:[%s5553_s2 + $0xb0] sm:$0xff]   ;;  %v4550_v57 = vld [vmem:[%s5553_s2 + $0x98] sm:$0xff]   ;;  %v4552_v59 = vld [vmem:[%s5553_s2 + $0xc0] sm:$0xff]  }
  0x19   : > { %4075 = vmatpush3.bf16.msra.mxu1 %v4505_v12  ;;  %4064 = vmatprep.subr.bf16.mxu0 %v4651_v1  ;;  %v4551_v58 = vld [vmem:[%s5553_s2 + $0xb8] sm:$0xff]   ;;  %v4553_v60 = vld [vmem:[%s5553_s2 + $0xe0] sm:$0xff]   ;;  %v4554_v61 = vld [vmem:[%s5553_s2 + $0xc8] sm:$0xff]  }
  0x1a   : > { %4076 = vmatprep.subr.bf16.mxu1 %v4651_v1  ;;  %4070 = vmatprep.mubr.msk.bf16.mxu0 %vm4652_vm0, %v4651_v1  ;;  %v4555_v62 = vld [vmem:[%s5553_s2 + $0xe8] sm:$0xff]   ;;  %v4556_v63 = vld [vmem:[%s5553_s2 + $0xd0] sm:$0xff]   ;;  %v4558_v2 = vld [vmem:[%s5553_s2 + $0xd8] sm:$0xff]  }
  0x1b   : > { %4082 = vmatprep.mubr.msk.bf16.mxu1 %vm4652_vm0, %v4651_v1  ;;  %v4557_v0 = vld [vmem:[%s5553_s2 + $0xf0] sm:$0xff]   ;;  %v4559_v3 = vld [vmem:[%s5553_s2 + $0xf8] sm:$0xff]   ;;  %v4560_v4 = vld [vmem:[%s5554_s3] sm:$0xff]  }
  0x1c   : > { %4065 = vmatpush3.bf16.msra.mxu0 %v4506_v13  ;;  %v4561_v5 = vld [vmem:[%s5554_s3 + $0x20] sm:$0xff]   ;;  %v4562_v6 = vld [vmem:[%s5554_s3 + $0x8] sm:$0xff]   ;;  %v4564_v8 = vld [vmem:[%s5554_s3 + $0x10] sm:$0xff]  }
  0x1d   : > { %4077 = vmatpush3.bf16.msra.mxu1 %v4507_v14  ;;  %4066 = vmatprep.subr.bf16.mxu0 %v4651_v1  ;;  %v4563_v7 = vld [vmem:[%s5554_s3 + $0x28] sm:$0xff]   ;;  %v4565_v9 = vld [vmem:[%s5554_s3 + $0x30] sm:$0xff]   ;;  %v4566_v11 = vld [vmem:[%s5554_s3 + $0x18] sm:$0xff]  }
  0x1e   : > { %4078 = vmatprep.subr.bf16.mxu1 %v4651_v1  ;;  %v4567_v12 = vld [vmem:[%s5554_s3 + $0x38] sm:$0xff]   ;;  %v4568_v13 = vld [vmem:[%s5554_s3 + $0x40] sm:$0xff]  }
  0x1f   : > { %v4569_v14 = vld [vmem:[%s5554_s3 + $0x60] sm:$0xff]  }
  0x20   : > { %4067 = vmatpush3.bf16.msra.mxu0 %v4508_v15  ;;  %v4570_v15 = vld [vmem:[%s5554_s3 + $0x48] sm:$0xff]  }
  0x21   : > { %4079 = vmatpush3.bf16.msra.mxu1 %v4509_v16  ;;  %4068 = vmatprep.subr.bf16.mxu0 %v4651_v1  ;;  %v4571_v16 = vld [vmem:[%s5554_s3 + $0x68] sm:$0xff]  }
  0x22   : > { %4080 = vmatprep.subr.bf16.mxu1 %v4651_v1 }
  0x24   : > { %4069 = vmatpush3.bf16.msra.mxu0 %v4510_v17  ;;  %v4572_v17 = vld [vmem:[%s5554_s3 + $0x50] sm:$0xff]  }
  0x25   : > { %4081 = vmatpush3.bf16.msra.mxu1 %v4511_v18  ;;  %4086 = vmatprep.subr.bf16.mxu0 %v4651_v1  ;;  %v4573_v18 = vld [vmem:[%s5554_s3 + $0x70] sm:$0xff]  }
  0x26   : > { %4098 = vmatprep.subr.bf16.mxu1 %v4651_v1 }
  0x27   : > { %4071 = vmatmul.mubr.msk.bf16.vlgmr.msra.gmra.mrb[4].mxu0 %vm681_vm1, %v4778_v10 }
  0x28   : > { %4083 = vmatmul.mubr.msk.bf16.vlgmr.msra.gmra.mrb[4].mxu1 %vm681_vm1, %v4778_v10  ;;  %4087 = vmatpush3.bf16.msra.mxu0 %v4512_v19  ;;  %v4574_v19 = vld [vmem:[%s5554_s3 + $0x58] sm:$0xff]  }
  0x29   : > { %4099 = vmatpush3.bf16.msra.mxu1 %v4513_v20  ;;  %4088 = vmatprep.subr.bf16.mxu0 %v4651_v1  ;;  %v4575_v20 = vld [vmem:[%s5554_s3 + $0x78] sm:$0xff]  }
  0x2a   : > { %4100 = vmatprep.subr.bf16.mxu1 %v4651_v1  ;;  %4094 = vmatprep.mubr.msk.bf16.mxu0 %vm4652_vm0, %v4651_v1 }
  0x2b   : > { %4106 = vmatprep.mubr.msk.bf16.mxu1 %vm4652_vm0, %v4651_v1 }
  0x2c   : > { %4089 = vmatpush3.bf16.msra.mxu0 %v4514_v21  ;;  %v4576_v21 = vld [vmem:[%s5554_s3 + $0x80] sm:$0xff]  }
  0x2d   : > { %4101 = vmatpush3.bf16.msra.mxu1 %v4515_v22  ;;  %4090 = vmatprep.subr.bf16.mxu0 %v4651_v1  ;;  %v4577_v22 = vld [vmem:[%s5554_s3 + $0xa0] sm:$0xff]  }
  0x2e   : > { %4102 = vmatprep.subr.bf16.mxu1 %v4651_v1 }
  0x30   : > { %4091 = vmatpush3.bf16.msra.mxu0 %v4516_v23  ;;  %v4578_v23 = vld [vmem:[%s5554_s3 + $0x88] sm:$0xff]  }
  0x31   : > { %4103 = vmatpush3.bf16.msra.mxu1 %v4517_v24  ;;  %4092 = vmatprep.subr.bf16.mxu0 %v4651_v1  ;;  %v4579_v24 = vld [vmem:[%s5554_s3 + $0xa8] sm:$0xff]  }
  0x32   : > { %4104 = vmatprep.subr.bf16.mxu1 %v4651_v1 }
  0x34   : > { %4093 = vmatpush3.bf16.msra.mxu0 %v4518_v25  ;;  %v4580_v25 = vld [vmem:[%s5554_s3 + $0x90] sm:$0xff]  }
  0x35   : > { %4105 = vmatpush3.bf16.msra.mxu1 %v4519_v26  ;;  %4110 = vmatprep.subr.bf16.mxu0 %v4651_v1  ;;  %v4581_v26 = vld [vmem:[%s5554_s3 + $0xb0] sm:$0xff]  }
  0x36   : > { %4122 = vmatprep.subr.bf16.mxu1 %v4651_v1 }
  0x37   : > { %4095 = vmatmul.mubr.msk.bf16.vlgmr.msra.gmra.mrb[8].mxu0 %vm681_vm1, %v4778_v10 }
  0x38   : > { %4107 = vmatmul.mubr.msk.bf16.vlgmr.msra.gmra.mrb[8].mxu1 %vm681_vm1, %v4778_v10  ;;  %4111 = vmatpush3.bf16.msra.mxu0 %v4520_v27  ;;  %v4582_v27 = vld [vmem:[%s5554_s3 + $0x98] sm:$0xff]  }
  0x39   : > { %4123 = vmatpush3.bf16.msra.mxu1 %v4521_v28  ;;  %4112 = vmatprep.subr.bf16.mxu0 %v4651_v1  ;;  %v4583_v28 = vld [vmem:[%s5554_s3 + $0xb8] sm:$0xff]  }
  0x3a   : > { %4124 = vmatprep.subr.bf16.mxu1 %v4651_v1  ;;  %4118 = vmatprep.mubr.msk.bf16.mxu0 %vm4652_vm0, %v4651_v1 }
  0x3b   : > { %4130 = vmatprep.mubr.msk.bf16.mxu1 %vm4652_vm0, %v4651_v1 }
  0x3c   : > { %4113 = vmatpush3.bf16.msra.mxu0 %v4522_v29  ;;  %v4584_v29 = vld [vmem:[%s5554_s3 + $0xc0] sm:$0xff]  }
  0x3d   : > { %4125 = vmatpush3.bf16.msra.mxu1 %v4523_v30  ;;  %4114 = vmatprep.subr.bf16.mxu0 %v4651_v1  ;;  %v4585_v30 = vld [vmem:[%s5554_s3 + $0xe0] sm:$0xff]  }
  0x3e   : > { %4126 = vmatprep.subr.bf16.mxu1 %v4651_v1 }
  0x40   : > { %4115 = vmatpush3.bf16.msra.mxu0 %v4524_v31  ;;  %v4586_v31 = vld [vmem:[%s5554_s3 + $0xc8] sm:$0xff]  }
  0x41   : > { %4127 = vmatpush3.bf16.msra.mxu1 %v4525_v32  ;;  %4116 = vmatprep.subr.bf16.mxu0 %v4651_v1  ;;  %v4587_v32 = vld [vmem:[%s5554_s3 + $0xe8] sm:$0xff]  }
  0x42   : > { %4128 = vmatprep.subr.bf16.mxu1 %v4651_v1 }
  0x44   : > { %4117 = vmatpush3.bf16.msra.mxu0 %v4526_v33  ;;  %v4588_v33 = vld [vmem:[%s5554_s3 + $0xd0] sm:$0xff]  }
  0x45   : > { %4129 = vmatpush3.bf16.msra.mxu1 %v4527_v34  ;;  %4134 = vmatprep.subr.bf16.mxu0 %v4651_v1  ;;  %v4589_v34 = vld [vmem:[%s5554_s3 + $0xf0] sm:$0xff]  }
  0x46   : > { %4146 = vmatprep.subr.bf16.mxu1 %v4651_v1 }
  0x47   : > { %4119 = vmatmul.mubr.msk.bf16.vlgmr.msra.gmra.mrb[12].mxu0 %vm681_vm1, %v4778_v10 }
  0x48   : > { %4131 = vmatmul.mubr.msk.bf16.vlgmr.msra.gmra.mrb[12].mxu1 %vm681_vm1, %v4778_v10  ;;  %4135 = vmatpush3.bf16.msra.mxu0 %v4528_v35  ;;  %v4590_v35 = vld [vmem:[%s5554_s3 + $0xd8] sm:$0xff]  }
  0x49   : > { %4147 = vmatpush3.bf16.msra.mxu1 %v4529_v36  ;;  %4136 = vmatprep.subr.bf16.mxu0 %v4651_v1  ;;  %v4591_v36 = vld [vmem:[%s5554_s3 + $0xf8] sm:$0xff]  }
  0x4a   : > { %4148 = vmatprep.subr.bf16.mxu1 %v4651_v1  ;;  %4142 = vmatprep.mubr.msk.bf16.mxu0 %vm4652_vm0, %v4651_v1 }
  0x4b   : > { %4154 = vmatprep.mubr.msk.bf16.mxu1 %vm4652_vm0, %v4651_v1 }
  0x4c   : > { %4137 = vmatpush3.bf16.msra.mxu0 %v4530_v37 }
  0x4d   : > { %4149 = vmatpush3.bf16.msra.mxu1 %v4531_v38  ;;  %4138 = vmatprep.subr.bf16.mxu0 %v4651_v1 }
  0x4e   : > { %4150 = vmatprep.subr.bf16.mxu1 %v4651_v1 }
  0x50   : > { %4139 = vmatpush3.bf16.msra.mxu0 %v4532_v39 }
  0x51   : > { %4151 = vmatpush3.bf16.msra.mxu1 %v4533_v40  ;;  %4140 = vmatprep.subr.bf16.mxu0 %v4651_v1 }
  0x52   : > { %4152 = vmatprep.subr.bf16.mxu1 %v4651_v1 }
  0x54   : > { %4141 = vmatpush3.bf16.msra.mxu0 %v4534_v41 }
  0x55   : > { %4153 = vmatpush3.bf16.msra.mxu1 %v4535_v42  ;;  %4158 = vmatprep.subr.bf16.mxu0 %v4651_v1 }
  0x56   : > { %4170 = vmatprep.subr.bf16.mxu1 %v4651_v1 }
  0x57   : > { %4143 = vmatmul.mubr.msk.bf16.vlgmr.msra.gmra.mrb[16].mxu0 %vm681_vm1, %v4778_v10 }
  0x58   : > { %4155 = vmatmul.mubr.msk.bf16.vlgmr.msra.gmra.mrb[16].mxu1 %vm681_vm1, %v4778_v10  ;;  %4159 = vmatpush3.bf16.msra.mxu0 %v4536_v43 }
  0x59   : > { %4171 = vmatpush3.bf16.msra.mxu1 %v4537_v44  ;;  %4160 = vmatprep.subr.bf16.mxu0 %v4651_v1 }
  0x5a   : > { %4172 = vmatprep.subr.bf16.mxu1 %v4651_v1  ;;  %4166 = vmatprep.mubr.msk.bf16.mxu0 %vm4652_vm0, %v4651_v1 }
  0x5b   : > { %4178 = vmatprep.mubr.msk.bf16.mxu1 %vm4652_vm0, %v4651_v1 }
  0x5c   : > { %4161 = vmatpush3.bf16.msra.mxu0 %v4538_v45 }
  0x5d   : > { %4173 = vmatpush3.bf16.msra.mxu1 %v4539_v46  ;;  %4162 = vmatprep.subr.bf16.mxu0 %v4651_v1 }
  0x5e   : > { %4174 = vmatprep.subr.bf16.mxu1 %v4651_v1 }
  0x60   : > { %4163 = vmatpush3.bf16.msra.mxu0 %v4540_v47 }
  0x61   : > { %4175 = vmatpush3.bf16.msra.mxu1 %v4541_v48  ;;  %4164 = vmatprep.subr.bf16.mxu0 %v4651_v1 }
  0x62   : > { %4176 = vmatprep.subr.bf16.mxu1 %v4651_v1 }
  0x64   : > { %4165 = vmatpush3.bf16.msra.mxu0 %v4542_v49 }
  0x65   : > { %4177 = vmatpush3.bf16.msra.mxu1 %v4543_v50  ;;  %4182 = vmatprep.subr.bf16.mxu0 %v4651_v1 }
  0x66   : > { %4194 = vmatprep.subr.bf16.mxu1 %v4651_v1 }
  0x67   : > { %4167 = vmatmul.mubr.msk.bf16.vlgmr.msra.gmra.mrb[20].mxu0 %vm681_vm1, %v4778_v10 }
  0x68   : > { %4179 = vmatmul.mubr.msk.bf16.vlgmr.msra.gmra.mrb[20].mxu1 %vm681_vm1, %v4778_v10  ;;  %4183 = vmatpush3.bf16.msra.mxu0 %v4544_v51 }
  0x69   : > { %4195 = vmatpush3.bf16.msra.mxu1 %v4545_v52  ;;  %4184 = vmatprep.subr.bf16.mxu0 %v4651_v1 }
  0x6a   : > { %4196 = vmatprep.subr.bf16.mxu1 %v4651_v1  ;;  %4190 = vmatprep.mubr.msk.bf16.mxu0 %vm4652_vm0, %v4651_v1 }
  0x6b   : > { %4202 = vmatprep.mubr.msk.bf16.mxu1 %vm4652_vm0, %v4651_v1 }
  0x6c   : > { %4185 = vmatpush3.bf16.msra.mxu0 %v4546_v53 }
  0x6d   : > { %4197 = vmatpush3.bf16.msra.mxu1 %v4547_v54  ;;  %4186 = vmatprep.subr.bf16.mxu0 %v4651_v1 }
  0x6e   : > { %4198 = vmatprep.subr.bf16.mxu1 %v4651_v1 }
  0x70   : > { %4187 = vmatpush3.bf16.msra.mxu0 %v4548_v55 }
  0x71   : > { %4199 = vmatpush3.bf16.msra.mxu1 %v4549_v56  ;;  %4188 = vmatprep.subr.bf16.mxu0 %v4651_v1 }
  0x72   : > { %4200 = vmatprep.subr.bf16.mxu1 %v4651_v1 }
  0x74   : > { %4189 = vmatpush3.bf16.msra.mxu0 %v4550_v57 }
  0x75   : > { %4201 = vmatpush3.bf16.msra.mxu1 %v4551_v58  ;;  %4206 = vmatprep.subr.bf16.mxu0 %v4651_v1 }
  0x76   : > { %4218 = vmatprep.subr.bf16.mxu1 %v4651_v1 }
  0x77   : > { %4191 = vmatmul.mubr.msk.bf16.vlgmr.msra.gmra.mrb[24].mxu0 %vm681_vm1, %v4778_v10 }
  0x78   : > { %4203 = vmatmul.mubr.msk.bf16.vlgmr.msra.gmra.mrb[24].mxu1 %vm681_vm1, %v4778_v10  ;;  %4207 = vmatpush3.bf16.msra.mxu0 %v4552_v59 }
  0x79   : > { %4219 = vmatpush3.bf16.msra.mxu1 %v4553_v60  ;;  %4208 = vmatprep.subr.bf16.mxu0 %v4651_v1 }
  0x7a   : > { %4220 = vmatprep.subr.bf16.mxu1 %v4651_v1  ;;  %4214 = vmatprep.mubr.msk.bf16.mxu0 %vm4652_vm0, %v4651_v1 }
  0x7b   : > { %4226 = vmatprep.mubr.msk.bf16.mxu1 %vm4652_vm0, %v4651_v1 }
  0x7c   : > { %4209 = vmatpush3.bf16.msra.mxu0 %v4554_v61 }
  0x7d   : > { %4221 = vmatpush3.bf16.msra.mxu1 %v4555_v62  ;;  %4210 = vmatprep.subr.bf16.mxu0 %v4651_v1 }
  0x7e   : > { %4222 = vmatprep.subr.bf16.mxu1 %v4651_v1 }
  0x80   : > { %4211 = vmatpush3.bf16.msra.mxu0 %v4556_v63 }
  0x81   : > { %4223 = vmatpush3.bf16.msra.mxu1 %v4557_v0  ;;  %4212 = vmatprep.subr.bf16.mxu0 %v4651_v1 }
  0x82   : > { %4224 = vmatprep.subr.bf16.mxu1 %v4651_v1 }
  0x84   : > { %4213 = vmatpush3.bf16.msra.mxu0 %v4558_v2 }
  0x85   : > { %4225 = vmatpush3.bf16.msra.mxu1 %v4559_v3  ;;  %4230 = vmatprep.subr.bf16.mxu0 %v4651_v1 }
  0x86   : > { %4242 = vmatprep.subr.bf16.mxu1 %v4651_v1 }
  0x87   : > { %4215 = vmatmul.mubr.msk.bf16.vlgmr.msra.gmra.mrb[28].mxu0 %vm681_vm1, %v4778_v10 }
  0x88   : > { %4227 = vmatmul.mubr.msk.bf16.vlgmr.msra.gmra.mrb[28].mxu1 %vm681_vm1, %v4778_v10  ;;  %4231 = vmatpush3.bf16.msra.mxu0 %v4560_v4 }
  0x89   : > { %4243 = vmatpush3.bf16.msra.mxu1 %v4561_v5  ;;  %4232 = vmatprep.subr.bf16.mxu0 %v4651_v1  ;;  %v3745_v5 = vld [vmem:[%s5556_s5] ss:$0 sm:$0xff] }
  0x8a   : > { %4244 = vmatprep.subr.bf16.mxu1 %v4651_v1  ;;  %4238 = vmatprep.mubr.msk.bf16.mxu0 %vm4652_vm0, %v4651_v1 }
  0x8b   : > { %4250 = vmatprep.mubr.msk.bf16.mxu1 %vm4652_vm0, %v4651_v1 }
  0x8c   : > { %4233 = vmatpush3.bf16.msra.mxu0 %v4562_v6  ;;  %v3746_v6 = vld [vmem:[%s5556_s5 + $0x1] ss:$0 sm:$0xff] }
  0x8d   : > { %4245 = vmatpush3.bf16.msra.mxu1 %v4563_v7  ;;  %4234 = vmatprep.subr.bf16.mxu0 %v4651_v1  ;;  %v3697_v7 = vld [vmem:[%s5555_s4] ss:$0 sm:$0xff] }
  0x8e   : > { %4246 = vmatprep.subr.bf16.mxu1 %v4651_v1 }
  0x90   : > { %4235 = vmatpush3.bf16.msra.mxu0 %v4564_v8 }
  0x91   : > { %4247 = vmatpush3.bf16.msra.mxu1 %v4565_v9  ;;  %4236 = vmatprep.subr.bf16.mxu0 %v4651_v1  ;;  %v3698_v9 = vld [vmem:[%s5555_s4 + $0x1] ss:$0 sm:$0xff] }
  0x92   : > { %4248 = vmatprep.subr.bf16.mxu1 %v4651_v1 }
  0x94   : > { %4237 = vmatpush3.bf16.msra.mxu0 %v4566_v11 }
  0x95   : > { %4249 = vmatpush3.bf16.msra.mxu1 %v4567_v12  ;;  %4254 = vmatprep.subr.bf16.mxu0 %v4651_v1 }
  0x96   : > { %4266 = vmatprep.subr.bf16.mxu1 %v4651_v1 }
  0x97   : > { %4239 = vmatmul.mubr.msk.bf16.vlgmr.msra.gmra.mrb[32].mxu0 %vm681_vm1, %v4778_v10 }
  0x98   : > { %4251 = vmatmul.mubr.msk.bf16.vlgmr.msra.gmra.mrb[32].mxu1 %vm681_vm1, %v4778_v10  ;;  %4255 = vmatpush3.bf16.msra.mxu0 %v4568_v13 }
  0x99   : > { %4267 = vmatpush3.bf16.msra.mxu1 %v4569_v14  ;;  %4256 = vmatprep.subr.bf16.mxu0 %v4651_v1 }
  0x9a   : > { %4268 = vmatprep.subr.bf16.mxu1 %v4651_v1  ;;  %4262 = vmatprep.mubr.msk.bf16.mxu0 %vm4652_vm0, %v4651_v1 }
  0x9b   : > { %4274 = vmatprep.mubr.msk.bf16.mxu1 %vm4652_vm0, %v4651_v1 }
  0x9c   : > { %4257 = vmatpush3.bf16.msra.mxu0 %v4570_v15 }
  0x9d   : > { %4269 = vmatpush3.bf16.msra.mxu1 %v4571_v16  ;;  %4258 = vmatprep.subr.bf16.mxu0 %v4651_v1 }
  0x9e   : > { %4270 = vmatprep.subr.bf16.mxu1 %v4651_v1 }
  0xa0   : > { %4259 = vmatpush3.bf16.msra.mxu0 %v4572_v17 }
  0xa1   : > { %4271 = vmatpush3.bf16.msra.mxu1 %v4573_v18  ;;  %4260 = vmatprep.subr.bf16.mxu0 %v4651_v1 }
  0xa2   : > { %4272 = vmatprep.subr.bf16.mxu1 %v4651_v1 }
  0xa4   : > { %4261 = vmatpush3.bf16.msra.mxu0 %v4574_v19 }
  0xa5   : > { %4273 = vmatpush3.bf16.msra.mxu1 %v4575_v20  ;;  %4278 = vmatprep.subr.bf16.mxu0 %v4651_v1 }
  0xa6   : > { %4290 = vmatprep.subr.bf16.mxu1 %v4651_v1 }
  0xa7   : > { %4263 = vmatmul.mubr.msk.bf16.vlgmr.msra.gmra.mrb[36].mxu0 %vm681_vm1, %v4778_v10 }
  0xa8   : > { %4275 = vmatmul.mubr.msk.bf16.vlgmr.msra.gmra.mrb[36].mxu1 %vm681_vm1, %v4778_v10  ;;  %4279 = vmatpush3.bf16.msra.mxu0 %v4576_v21 }
  0xa9   : > { %4291 = vmatpush3.bf16.msra.mxu1 %v4577_v22  ;;  %4280 = vmatprep.subr.bf16.mxu0 %v4651_v1 }
  0xaa   : > { %4292 = vmatprep.subr.bf16.mxu1 %v4651_v1  ;;  %4286 = vmatprep.mubr.msk.bf16.mxu0 %vm4652_vm0, %v4651_v1 }
  0xab   : > { %4298 = vmatprep.mubr.msk.bf16.mxu1 %vm4652_vm0, %v4651_v1 }
  0xac   : > { %4281 = vmatpush3.bf16.msra.mxu0 %v4578_v23 }
  0xad   : > { %4293 = vmatpush3.bf16.msra.mxu1 %v4579_v24  ;;  %4282 = vmatprep.subr.bf16.mxu0 %v4651_v1 }
  0xae   : > { %4294 = vmatprep.subr.bf16.mxu1 %v4651_v1 }
  0xb0   : > { %4283 = vmatpush3.bf16.msra.mxu0 %v4580_v25 }
  0xb1   : > { %4295 = vmatpush3.bf16.msra.mxu1 %v4581_v26  ;;  %4284 = vmatprep.subr.bf16.mxu0 %v4651_v1 }
  0xb2   : > { %4296 = vmatprep.subr.bf16.mxu1 %v4651_v1 }
  0xb4   : > { %4285 = vmatpush3.bf16.msra.mxu0 %v4582_v27 }
  0xb5   : > { %4297 = vmatpush3.bf16.msra.mxu1 %v4583_v28  ;;  %4302 = vmatprep.subr.bf16.mxu0 %v4651_v1 }
  0xb6   : > { %4314 = vmatprep.subr.bf16.mxu1 %v4651_v1 }
  0xb7   : > { %4287 = vmatmul.mubr.msk.bf16.vlgmr.msra.gmra.mrb[40].mxu0 %vm681_vm1, %v4778_v10 }
  0xb8   : > { %4299 = vmatmul.mubr.msk.bf16.vlgmr.msra.gmra.mrb[40].mxu1 %vm681_vm1, %v4778_v10  ;;  %4303 = vmatpush3.bf16.msra.mxu0 %v4584_v29 }
  0xb9   : > { %4315 = vmatpush3.bf16.msra.mxu1 %v4585_v30  ;;  %4304 = vmatprep.subr.bf16.mxu0 %v4651_v1  ;;  %v3747_v30 = vld [vmem:[%s5556_s5 + $0x2] ss:$0 sm:$0xff] }
  0xba   : > { %4316 = vmatprep.subr.bf16.mxu1 %v4651_v1  ;;  %4310 = vmatprep.mubr.msk.bf16.mxu0 %vm4652_vm0, %v4651_v1 }
  0xbb   : > { %4322 = vmatprep.mubr.msk.bf16.mxu1 %vm4652_vm0, %v4651_v1 }
  0xbc   : > { %4305 = vmatpush3.bf16.msra.mxu0 %v4586_v31  ;;  %v3748_v31 = vld [vmem:[%s5556_s5 + $0x3] ss:$0 sm:$0xff] }
  0xbd   : > { %4317 = vmatpush3.bf16.msra.mxu1 %v4587_v32  ;;  %4306 = vmatprep.subr.bf16.mxu0 %v4651_v1  ;;  %v3699_v32 = vld [vmem:[%s5555_s4 + $0x2] ss:$0 sm:$0xff] }
  0xbe   : > { %4318 = vmatprep.subr.bf16.mxu1 %v4651_v1 }
  0xc0   : > { %4307 = vmatpush3.bf16.msra.mxu0 %v4588_v33 }
  0xc1   : > { %4319 = vmatpush3.bf16.msra.mxu1 %v4589_v34  ;;  %4308 = vmatprep.subr.bf16.mxu0 %v4651_v1  ;;  %v3700_v34 = vld [vmem:[%s5555_s4 + $0x3] ss:$0 sm:$0xff] }
  0xc2   : > { %4320 = vmatprep.subr.bf16.mxu1 %v4651_v1 }
  0xc4   : > { %4309 = vmatpush3.bf16.msra.mxu0 %v4590_v35 }
  0xc5   : > { %4321 = vmatpush3.bf16.msra.mxu1 %v4591_v36  ;;  %4326 = vmatprep.subr.bf16.mxu0 %v4651_v1 }
  0xc6   : > { %4332 = vmatprep.subr.bf16.mxu1 %v4651_v1 }
  0xc7   : > { %4311 = vmatmul.mubr.msk.bf16.vlgmr.msra.gmra.mrb[44].mxu0 %vm681_vm1, %v4778_v10 }
  0xc8   : > { %4323 = vmatmul.mubr.msk.bf16.vlgmr.msra.gmra.mrb[44].mxu1 %vm681_vm1, %v4778_v10  ;;  %4328 = vmatprep.mubr.msk.bf16.mxu0 %vm4652_vm0, %v4651_v1 }
  0xc9   : > { %4334 = vmatprep.mubr.msk.bf16.mxu1 %vm4652_vm0, %v4651_v1 }
  0xea   : > { %v719_v37 = vpop.f32.mrb[0].mxu0 }
  0xeb   : > { %v783_v38 = vpop.f32.mrb[0].mxu1  ;;  %v4048_v39 = vpop.f32.mrb[1].mxu0  ;;  %v720_v17 = vadd.f32 %v3697_v7, %v719_v37 }
  0xec   : > { %v4060_v40 = vpop.f32.mrb[1].mxu1  ;;  %v722_v41 = vpop.f32.mrb[2].mxu0  ;;  %v784_v21 = vadd.f32 %v3698_v9, %v783_v38 }
  0xed   : > { %v786_v42 = vpop.f32.mrb[2].mxu1  ;;  %v4049_v43 = vpop.f32.mrb[3].mxu0  ;;  %v1173_v26 = vmul.f32 0.35355338, %v720_v17 }
  0xee   : > { %v4061_v44 = vpop.f32.mrb[3].mxu1  ;;  %v1174_v27 = vmul.f32 0.35355338, %v784_v21  ;;  %v3704_v21 = vld [vmem:[%s5555_s4 + $0x7] ss:$0 sm:$0xff] }
  0xef   : > { %v2320_v28 = vpack.c.bf16 %v1173_v26, %v1173_v26 }
  0xf0   : > { %v2321_v29 = vpack.c.bf16 %v1174_v27, %v1174_v27 }
  0xfa   : > { %v5230_v45 = vpop.f32.mrb[4].mxu0 }
  0xfb   : > { %v5232_v46 = vpop.f32.mrb[4].mxu1  ;;  %v4072_v47 = vpop.f32.mrb[5].mxu0  ;;  %v848_v41 = vadd.f32 %v3699_v32, %v5230_v45 }
  0xfc   : > { %v4084_v10 = vpop.f32.mrb[5].mxu1  ;;  %v850_v48 = vpop.f32.mrb[6].mxu0  ;;  %v912_v47 = vadd.f32 %v3700_v34, %v5232_v46  ;;  %v3749_v46 = vld [vmem:[%s5556_s5 + $0x4] ss:$0 sm:$0xff] }
  0xfd   : > { %v914_v49 = vpop.f32.mrb[6].mxu1  ;;  %v4073_v50 = vpop.f32.mrb[7].mxu0 }
  0xfe   : > { %v4085_v51 = vpop.f32.mrb[7].mxu1 }
  0xff   : > { %v1175_v51 = vmul.f32 0.35355338, %v848_v41 }
 0x101   : > { %v2322_v45 = vpack.c.bf16 %v1175_v51, %v1175_v51 }
 0x10a   : > { %v5234_v52 = vpop.f32.mrb[8].mxu0 }
 0x10b   : > { %v5236_v53 = vpop.f32.mrb[8].mxu1  ;;  %v4096_v54 = vpop.f32.mrb[9].mxu0 }
 0x10c   : > { %v4108_v55 = vpop.f32.mrb[9].mxu1  ;;  %v978_v56 = vpop.f32.mrb[10].mxu0  ;;  %v1176_v54 = vmul.f32 0.35355338, %v912_v47 }
 0x10d   : > { %v1042_v57 = vpop.f32.mrb[10].mxu1  ;;  %v4097_v58 = vpop.f32.mrb[11].mxu0  ;;  %v3750_v56 = vld [vmem:[%s5556_s5 + $0x5] ss:$0 sm:$0xff] }
 0x10e   : > { %v4109_v59 = vpop.f32.mrb[11].mxu1  ;;  %v2323_v55 = vpack.c.bf16 %v1176_v54, %v1176_v54  ;;  %v3701_v57 = vld [vmem:[%s5555_s4 + $0x4] ss:$0 sm:$0xff] }
 0x10f   : > { %v3702_v59 = vld [vmem:[%s5555_s4 + $0x5] ss:$0 sm:$0xff] }
 0x110   : > { %v1040_v9 = vadd.f32 %v3702_v59, %v5236_v53  ;;  %v3751_v53 = vld [vmem:[%s5556_s5 + $0x6] ss:$0 sm:$0xff] }
 0x11a   : > { %v5238_v60 = vpop.f32.mrb[12].mxu0 }
 0x11b   : > { %v5240_v61 = vpop.f32.mrb[12].mxu1  ;;  %v4120_v62 = vpop.f32.mrb[13].mxu0 }
 0x11c   : > { %v4132_v63 = vpop.f32.mrb[13].mxu1  ;;  %v1106_v0 = vpop.f32.mrb[14].mxu0  ;;  %v1168_v32 = vadd.f32 %v3704_v21, %v5240_v61  ;;  %v3793_v61 = vld [vmem:[%s5557_s6] ss:$0 sm:$0xff] }
 0x11d   : > { %v1170_v2 = vpop.f32.mrb[14].mxu1  ;;  %v4121_v3 = vpop.f32.mrb[15].mxu0 }
 0x11e   : > { %v4133_v4 = vpop.f32.mrb[15].mxu1 }
 0x12a   : > { %v1298_v8 = vpop.f32.mrb[16].mxu0 }
 0x12b   : > { %v1299_v11 = vadd.f32 %v3745_v5, %v1298_v8  ;;  %v1362_v12 = vpop.f32.mrb[16].mxu1  ;;  %v4144_v13 = vpop.f32.mrb[17].mxu0  ;;  %v976_v5 = vadd.f32 %v3701_v57, %v5234_v52 }
 0x12c   : > { %v1363_v14 = vadd.f32 %v3746_v6, %v1362_v12  ;;  %v4156_v15 = vpop.f32.mrb[17].mxu1  ;;  %v1301_v16 = vpop.f32.mrb[18].mxu0 }
 0x12d   : > { %v2328_v18 = vpack.c.bf16 %v1299_v11, %v1299_v11  ;;  %v1365_v19 = vpop.f32.mrb[18].mxu1  ;;  %v4145_v20 = vpop.f32.mrb[19].mxu0  ;;  %v1177_v15 = vmul.f32 0.35355338, %v976_v5  ;;  %v1178_v16 = vmul.f32 0.35355338, %v1040_v9 }
 0x12e   : > { %v2329_v22 = vpack.c.bf16 %v1363_v14, %v1363_v14  ;;  %v4157_v23 = vpop.f32.mrb[19].mxu1  ;;  %v3703_v19 = vld [vmem:[%s5555_s4 + $0x6] ss:$0 sm:$0xff] }
 0x12f   : > { %v2341_v24 = vsel %vm2336_vm2, %v2328_v18, 0  ;;  %v2324_v52 = vpack.c.bf16 %v1177_v15, %v1177_v15  ;;  %v2325_v17 = vpack.c.bf16 %v1178_v16, %v1178_v16  ;;  %v3752_v18 = vld [vmem:[%s5556_s5 + $0x7] ss:$0 sm:$0xff] }
 0x130   : > { %v2387_v25 = vsel %vm2336_vm2, %v2329_v22, 0  ;;  %4327 = vmatpush3.bf16.xpose.msra.mxu0 %v2341_v24 }
 0x131   : > { %4333 = vmatpush3.bf16.xpose.msra.mxu1 %v2387_v25  ;;  %4338 = vmatprep.subr.bf16.mxu0 %v4651_v1 }
 0x132   : > { %4344 = vmatprep.subr.bf16.mxu1 %v4651_v1 }
 0x137   : > { %4329 = vmatmul.mubr.msk.bf16.vlgmr.msra.gmra.mrb[48].mxu0 %vm2336_vm2, %v2320_v28  ;;  %v1104_v28 = vadd.f32 %v3703_v19, %v5238_v60 }
 0x138   : > { %4335 = vmatmul.mubr.msk.bf16.vlgmr.msra.gmra.mrb[48].mxu1 %vm2336_vm2, %v2321_v29  ;;  %4340 = vmatprep.mubr.msk.bf16.mxu0 %vm4652_vm0, %v4651_v1 }
 0x139   : > { %4346 = vmatprep.mubr.msk.bf16.mxu1 %vm4652_vm0, %v4651_v1 }
 0x13a   : > { %v1426_v33 = vpop.f32.mrb[20].mxu0 }
 0x13b   : > { %v1427_v35 = vadd.f32 %v3747_v30, %v1426_v33  ;;  %v1490_v36 = vpop.f32.mrb[20].mxu1  ;;  %v4168_v37 = vpop.f32.mrb[21].mxu0 }
 0x13c   : > { %v1491_v38 = vadd.f32 %v3748_v31, %v1490_v36  ;;  %v4180_v39 = vpop.f32.mrb[21].mxu1  ;;  %v1429_v40 = vpop.f32.mrb[22].mxu0  ;;  %v1179_v37 = vmul.f32 0.35355338, %v1104_v28 }
 0x13d   : > { %v2330_v42 = vpack.c.bf16 %v1427_v35, %v1427_v35  ;;  %v1493_v43 = vpop.f32.mrb[22].mxu1  ;;  %v4169_v44 = vpop.f32.mrb[23].mxu0  ;;  %v3794_v40 = vld [vmem:[%s5557_s6 + $0x1] ss:$0 sm:$0xff] }
 0x13e   : > { %v2331_v10 = vpack.c.bf16 %v1491_v38, %v1491_v38  ;;  %v4181_v48 = vpop.f32.mrb[23].mxu1  ;;  %v1180_v38 = vmul.f32 0.35355338, %v1168_v32  ;;  %v2326_v60 = vpack.c.bf16 %v1179_v37, %v1179_v37 }
 0x13f   : > { %v2433_v49 = vsel %vm2336_vm2, %v2330_v42, 0 }
 0x140   : > { %v2479_v50 = vsel %vm2336_vm2, %v2331_v10, 0  ;;  %4339 = vmatpush3.bf16.xpose.msra.mxu0 %v2433_v49  ;;  %v2327_v39 = vpack.c.bf16 %v1180_v38, %v1180_v38 }
 0x141   : > { %4345 = vmatpush3.bf16.xpose.msra.mxu1 %v2479_v50  ;;  %4350 = vmatprep.subr.bf16.mxu0 %v4651_v1 }
 0x142   : > { %4356 = vmatprep.subr.bf16.mxu1 %v4651_v1 }
 0x147   : > { %4341 = vmatmul.mubr.msk.bf16.vlgmr.msra.gmra.mrb[52].mxu0 %vm2336_vm2, %v2322_v45 }
 0x148   : > { %4347 = vmatmul.mubr.msk.bf16.vlgmr.msra.gmra.mrb[52].mxu1 %vm2336_vm2, %v2323_v55  ;;  %4352 = vmatprep.mubr.msk.bf16.mxu0 %vm4652_vm0, %v4651_v1 }
 0x149   : > { %4358 = vmatprep.mubr.msk.bf16.mxu1 %vm4652_vm0, %v4651_v1 }
 0x14a   : > { %v1554_v58 = vpop.f32.mrb[24].mxu0 }
 0x14b   : > { %v1555_v62 = vadd.f32 %v3749_v46, %v1554_v58  ;;  %v1618_v63 = vpop.f32.mrb[24].mxu1  ;;  %v4192_v0 = vpop.f32.mrb[25].mxu0 }
 0x14c   : > { %v1619_v2 = vadd.f32 %v3750_v56, %v1618_v63  ;;  %v4204_v3 = vpop.f32.mrb[25].mxu1  ;;  %v1557_v4 = vpop.f32.mrb[26].mxu0 }
 0x14d   : > { %v2332_v6 = vpack.c.bf16 %v1555_v62, %v1555_v62  ;;  %v1621_v7 = vpop.f32.mrb[26].mxu1  ;;  %v4193_v8 = vpop.f32.mrb[27].mxu0 }
 0x14e   : > { %v2333_v11 = vpack.c.bf16 %v1619_v2, %v1619_v2  ;;  %v4205_v12 = vpop.f32.mrb[27].mxu1 }
 0x14f   : > { %v2525_v13 = vsel %vm2336_vm2, %v2332_v6, 0 }
 0x150   : > { %v2571_v14 = vsel %vm2336_vm2, %v2333_v11, 0  ;;  %4351 = vmatpush3.bf16.xpose.msra.mxu0 %v2525_v13 }
 0x151   : > { %4357 = vmatpush3.bf16.xpose.msra.mxu1 %v2571_v14  ;;  %4362 = vmatprep.subr.bf16.mxu0 %v4651_v1 }
 0x152   : > { %4368 = vmatprep.subr.bf16.mxu1 %v4651_v1 }
 0x157   : > { %4353 = vmatmul.mubr.msk.bf16.vlgmr.msra.gmra.mrb[56].mxu0 %vm2336_vm2, %v2324_v52 }
 0x158   : > { %4359 = vmatmul.mubr.msk.bf16.vlgmr.msra.gmra.mrb[56].mxu1 %vm2336_vm2, %v2325_v17  ;;  %4364 = vmatprep.mubr.msk.bf16.mxu0 %vm4652_vm0, %v4651_v1 }
 0x159   : > { %4370 = vmatprep.mubr.msk.bf16.mxu1 %vm4652_vm0, %v4651_v1 }
 0x15a   : > { %v1682_v20 = vpop.f32.mrb[28].mxu0 }
 0x15b   : > { %v1683_v22 = vadd.f32 %v3751_v53, %v1682_v20  ;;  %v1746_v23 = vpop.f32.mrb[28].mxu1  ;;  %v4216_v24 = vpop.f32.mrb[29].mxu0 }
 0x15c   : > { %v1747_v25 = vadd.f32 %v3752_v18, %v1746_v23  ;;  %v4228_v26 = vpop.f32.mrb[29].mxu1  ;;  %v1685_v27 = vpop.f32.mrb[30].mxu0 }
 0x15d   : > { %v2334_v29 = vpack.c.bf16 %v1683_v22, %v1683_v22  ;;  %v1749_v30 = vpop.f32.mrb[30].mxu1  ;;  %v4217_v31 = vpop.f32.mrb[31].mxu0 }
 0x15e   : > { %v2335_v33 = vpack.c.bf16 %v1747_v25, %v1747_v25  ;;  %v4229_v34 = vpop.f32.mrb[31].mxu1 }
 0x15f   : > { %v2617_v35 = vsel %vm2336_vm2, %v2334_v29, 0 }
 0x160   : > { %v2663_v36 = vsel %vm2336_vm2, %v2335_v33, 0  ;;  %4363 = vmatpush3.bf16.xpose.msra.mxu0 %v2617_v35 }
 0x161   : > { %4369 = vmatpush3.bf16.xpose.msra.mxu1 %v2663_v36  ;;  %4374 = vmatprep.subr.bf16.mxu0 %v4651_v1 }
 0x162   : > { %4380 = vmatprep.subr.bf16.mxu1 %v4651_v1 }
 0x167   : > { %4365 = vmatmul.mubr.msk.bf16.vlgmr.msra.gmra.mrb[60].mxu0 %vm2336_vm2, %v2326_v60 }
 0x168   : > { %4371 = vmatmul.mubr.msk.bf16.vlgmr.msra.gmra.mrb[60].mxu1 %vm2336_vm2, %v2327_v39  ;;  %4376 = vmatprep.mubr.msk.bf16.mxu0 %vm4652_vm0, %v4651_v1 }
 0x169   : > { %4382 = vmatprep.mubr.msk.bf16.mxu1 %vm4652_vm0, %v4651_v1 }
 0x16a   : > { %v1866_v41 = vpop.f32.mrb[32].mxu0 }
 0x16b   : > { %v1867_v42 = vadd.f32 %v3793_v61, %v1866_v41  ;;  %v4240_v43 = vpop.f32.mrb[33].mxu0  ;;  %v1930_v44 = vpop.f32.mrb[32].mxu1 }
 0x16c   : > { %v1869_v47 = vpop.f32.mrb[34].mxu0  ;;  %v1931_v10 = vadd.f32 %v3794_v40, %v1930_v44  ;;  %v4252_v48 = vpop.f32.mrb[33].mxu1 }
 0x16d   : > { %v2801_v49 = vpack.c.bf16 %v1867_v42, %v1867_v42  ;;  %v4241_v50 = vpop.f32.mrb[35].mxu0  ;;  %v1933_v51 = vpop.f32.mrb[34].mxu1 }
 0x16e   : > { %v2802_v54 = vpack.c.bf16 %v1931_v10, %v1931_v10  ;;  %v4253_v45 = vpop.f32.mrb[35].mxu1 }
 0x16f   : > { %v2814_v55 = vsel %vm2812_vm3, %v2801_v49, 0 }
 0x170   : > { %v2860_v46 = vsel %vm2812_vm3, %v2802_v54, 0  ;;  %4375 = vmatpush3.bf16.msra.mxu0 %v2814_v55 }
 0x171   : > { %4381 = vmatpush3.bf16.msra.mxu1 %v2860_v46  ;;  %4386 = vmatprep.subr.bf16.mxu0 %v4651_v1 }
 0x172   : > { %4392 = vmatprep.subr.bf16.mxu1 %v4651_v1 }
 0x17a   : > { %v5346_v56 = vpop.f32.mrb[36].mxu0 }
 0x17b   : > { %v4264_v57 = vpop.f32.mrb[37].mxu0  ;;  %v5348_v58 = vpop.f32.mrb[36].mxu1 }
 0x17c   : > { %v1997_v59 = vpop.f32.mrb[38].mxu0  ;;  %v4276_v62 = vpop.f32.mrb[37].mxu1 }
 0x17d   : > { %v4265_v63 = vpop.f32.mrb[39].mxu0  ;;  %v2061_v0 = vpop.f32.mrb[38].mxu1 }
 0x17e   : > { %v4277_v2 = vpop.f32.mrb[39].mxu1 }
 0x18a   : > { %v5350_v3 = vpop.f32.mrb[40].mxu0 }
 0x18b   : > { %v4288_v4 = vpop.f32.mrb[41].mxu0  ;;  %v5352_v5 = vpop.f32.mrb[40].mxu1 }
 0x18c   : > { %v2125_v6 = vpop.f32.mrb[42].mxu0  ;;  %v4300_v7 = vpop.f32.mrb[41].mxu1 }
 0x18d   : > { %v4289_v8 = vpop.f32.mrb[43].mxu0  ;;  %v2189_v9 = vpop.f32.mrb[42].mxu1 }
 0x18e   : > { %v4301_v11 = vpop.f32.mrb[43].mxu1 }
 0x19a   : > { %v5354_v12 = vpop.f32.mrb[44].mxu0 }
 0x19b   : > { %v5356_v13 = vpop.f32.mrb[44].mxu1  ;;  %v4312_v14 = vpop.f32.mrb[45].mxu0 }
 0x19c   : > { %v4324_v15 = vpop.f32.mrb[45].mxu1  ;;  %v2253_v16 = vpop.f32.mrb[46].mxu0 }
 0x19d   : > { %v2317_v52 = vpop.f32.mrb[46].mxu1  ;;  %v4313_v17 = vpop.f32.mrb[47].mxu0 }
 0x19e   : > { %v4325_v53 = vpop.f32.mrb[47].mxu1 }
 0x20a   : > { %v2377_v18 = vpop.f32.mrb[48].mxu0 }
 0x20b   : > { %v2423_v19 = vpop.f32.mrb[48].mxu1  ;;  %v4330_v20 = vpop.f32.mrb[49].mxu0  ;;  %v2705_v21 = vsel %vm2336_vm2, %v2377_v18, -inf }
 0x20c   : > { %v4336_v22 = vpop.f32.mrb[49].mxu1  ;;  %2706 = vmax.xlane.f32.xlu0 %v2705_v21  ;;  %v2380_v23 = vpop.f32.mrb[50].mxu0  ;;  %v2708_v27 = vsel %vm2336_vm2, %v2423_v19, -inf }
 0x20d   : > { %v2426_v24 = vpop.f32.mrb[50].mxu1  ;;  %v4331_v25 = vpop.f32.mrb[51].mxu0 }
 0x20e   : > { %v4337_v26 = vpop.f32.mrb[51].mxu1 }
 0x210   : > { %2709 = vmax.xlane.f32.xlu0 %v2708_v27 }
 0x21a   : > { %v2469_v28 = vpop.f32.mrb[52].mxu0 }
 0x21b   : > { %v2515_v29 = vpop.f32.mrb[52].mxu1  ;;  %v4342_v30 = vpop.f32.mrb[53].mxu0  ;;  %v2711_v31 = vsel %vm2336_vm2, %v2469_v28, -inf }
 0x21c   : > { %v4348_v32 = vpop.f32.mrb[53].mxu1  ;;  %2712 = vmax.xlane.f32.xlu1 %v2711_v31  ;;  %v2472_v33 = vpop.f32.mrb[54].mxu0  ;;  %v2714_v37 = vsel %vm2336_vm2, %v2515_v29, -inf }
 0x21d   : > { %v2518_v34 = vpop.f32.mrb[54].mxu1  ;;  %v4343_v35 = vpop.f32.mrb[55].mxu0 }
 0x21e   : > { %v4349_v36 = vpop.f32.mrb[55].mxu1 }
 0x220   : > { %2715 = vmax.xlane.f32.xlu1 %v2714_v37 }
 0x22a   : > { %v2561_v38 = vpop.f32.mrb[56].mxu0 }
 0x22b   : > { %v2607_v60 = vpop.f32.mrb[56].mxu1  ;;  %v4354_v39 = vpop.f32.mrb[57].mxu0  ;;  %v2717_v61 = vsel %vm2336_vm2, %v2561_v38, -inf }
 0x22c   : > { %v4360_v40 = vpop.f32.mrb[57].mxu1  ;;  %v2720_v41 = vsel %vm2336_vm2, %v2607_v60, -inf  ;;  %2718 = vmax.xlane.f32.xlu0 %v2717_v61  ;;  %v2564_v42 = vpop.f32.mrb[58].mxu0 }
 0x22d   : > { %v2610_v43 = vpop.f32.mrb[58].mxu1  ;;  %2721 = vmax.xlane.f32.xlu1 %v2720_v41  ;;  %v4355_v44 = vpop.f32.mrb[59].mxu0  ;;  %v3795_v41 = vld [vmem:[%s5557_s6 + $0x2] ss:$0 sm:$0xff] }
 0x22e   : > { %v4361_v47 = vpop.f32.mrb[59].mxu1  ;;  %v1995_v42 = vadd.f32 %v3795_v41, %v5346_v56  ;;  %v3796_v43 = vld [vmem:[%s5557_s6 + $0x3] ss:$0 sm:$0xff] }
 0x230   : > { %v2803_v47 = vpack.c.bf16 %v1995_v42, %v1995_v42  ;;  %v3189_v42 = vld [vmem:[%s5558_s7 + $0xc] sm:$0xf] }
 0x23a   : > { %v2653_v10 = vpop.f32.mrb[60].mxu0 }
 0x23b   : > { %v2699_v48 = vpop.f32.mrb[60].mxu1  ;;  %v4366_v49 = vpop.f32.mrb[61].mxu0  ;;  %v2723_v50 = vsel %vm2336_vm2, %v2653_v10, -inf }
 0x23c   : > { %v4372_v51 = vpop.f32.mrb[61].mxu1  ;;  %v2726_v54 = vsel %vm2336_vm2, %v2699_v48, -inf  ;;  %2724 = vmax.xlane.f32.xlu0 %v2723_v50  ;;  %v2656_v45 = vpop.f32.mrb[62].mxu0 }
 0x23d   : > { %v2702_v55 = vpop.f32.mrb[62].mxu1  ;;  %2727 = vmax.xlane.f32.xlu1 %v2726_v54  ;;  %v4367_v46 = vpop.f32.mrb[63].mxu0  ;;  %v2906_v51 = vsel %vm2812_vm3, %v2803_v47, 0 }
 0x23e   : > { %v4373_v57 = vpop.f32.mrb[63].mxu1 }
 0x23f   : > { %v3797_v57 = vld [vmem:[%s5557_s6 + $0x4] ss:$0 sm:$0xff] }
 0x299   : > { %v2707_v59 = vpop.xlane.xlu0 %2706 }
 0x29a   : > { %v2729_v62 = vsub.f32 %v2377_v18, %v2707_v59  ;;  %v2123_v59 = vadd.f32 %v3797_v57, %v5350_v3 }
 0x29c   : > { %v2737_v63 = vmul.f32 1.442695, %v2729_v62  ;;  %v3798_v62 = vld [vmem:[%s5557_s6 + $0x5] ss:$0 sm:$0xff] }
 0x29d   : > { %v2710_v0 = vpop.xlane.xlu0 %2709 }
 0x29e   : > { %4592 = vpow2.f32 %v2737_v63  ;;  %v2730_v2 = vsub.f32 %v2423_v19, %v2710_v0  ;;  %v2805_v0 = vpack.c.bf16 %v2123_v59, %v2123_v59 }
 0x2a0   : > { %v2739_v4 = vmul.f32 1.442695, %v2730_v2  ;;  %v2187_v2 = vadd.f32 %v3798_v62, %v5352_v5 }
 0x2a2   : > { %4594 = vpow2.f32 %v2739_v4 }
 0x2a8   : > { %v4593_v6 = vpop.eup %4592 }
 0x2a9   : > { %v2713_v7 = vpop.xlane.xlu1 %2712  ;;  %v2753_v8 = vsel %vm2336_vm2, %v4593_v6, 0.0 }
 0x2aa   : > { %v2731_v9 = vsub.f32 %v2469_v28, %v2713_v7  ;;  %2754 = vadd.xlane.f32.xlu0 %v2753_v8  ;;  %v2998_v8 = vsel %vm2812_vm3, %v2805_v0, 0 }
 0x2ac   : > { %v4595_v11 = vpop.eup %4594  ;;  %v2741_v14 = vmul.f32 1.442695, %v2731_v9  ;;  %v2806_v9 = vpack.c.bf16 %v2187_v2, %v2187_v2 }
 0x2ad   : > { %v2716_v15 = vpop.xlane.xlu1 %2715  ;;  %v2756_v16 = vsel %vm2336_vm2, %v4595_v11, 0.0 }
 0x2ae   : > { %4596 = vpow2.f32 %v2741_v14  ;;  %v2732_v52 = vsub.f32 %v2515_v29, %v2716_v15  ;;  %2757 = vadd.xlane.f32.xlu1 %v2756_v16  ;;  %v3044_v15 = vsel %vm2812_vm3, %v2806_v9, 0  ;;  %v3799_v16 = vld [vmem:[%s5557_s6 + $0x6] ss:$0 sm:$0xff] }
 0x2b0   : > { %v2743_v17 = vmul.f32 1.442695, %v2732_v52  ;;  %v3800_v52 = vld [vmem:[%s5557_s6 + $0x7] ss:$0 sm:$0xff] }
 0x2b2   : > { %4598 = vpow2.f32 %v2743_v17  ;;  %v2251_v17 = vadd.f32 %v3799_v16, %v5354_v12 }
 0x2b8   : > { %v5368_v53 = vpop.eup %4596 }
 0x2b9   : > { %v2719_v18 = vpop.xlane.xlu0 %2718  ;;  %v2759_v19 = vsel %vm2336_vm2, %v5368_v53, 0.0 }
 0x2ba   : > { %v2722_v20 = vpop.xlane.xlu1 %2721  ;;  %v2733_v21 = vsub.f32 %v2561_v38, %v2719_v18  ;;  %2760 = vadd.xlane.f32.xlu0 %v2759_v19 }
 0x2bb   : > { %v2734_v22 = vsub.f32 %v2607_v60, %v2722_v20  ;;  %v2807_v20 = vpack.c.bf16 %v2251_v17, %v2251_v17 }
 0x2bc   : > { %v5372_v23 = vpop.eup %4598  ;;  %v2745_v24 = vmul.f32 1.442695, %v2733_v21 }
 0x2bd   : > { %v2747_v25 = vmul.f32 1.442695, %v2734_v22  ;;  %v2762_v26 = vsel %vm2336_vm2, %v5372_v23, 0.0 }
 0x2be   : > { %4600 = vpow2.f32 %v2745_v24  ;;  %2763 = vadd.xlane.f32.xlu1 %v2762_v26  ;;  %v3090_v26 = vsel %vm2812_vm3, %v2807_v20, 0 }
 0x2bf   : > { %4602 = vpow2.f32 %v2747_v25 }
 0x2c8   : > { %v5376_v27 = vpop.eup %4600 }
 0x2c9   : > { %v5378_v28 = vpop.eup %4602  ;;  %v2725_v29 = vpop.xlane.xlu0 %2724  ;;  %v2765_v30 = vsel %vm2336_vm2, %v5376_v27, 0.0 }
 0x2ca   : > { %v2728_v31 = vpop.xlane.xlu1 %2727  ;;  %v2735_v32 = vsub.f32 %v2653_v10, %v2725_v29  ;;  %v2768_v33 = vsel %vm2336_vm2, %v5378_v28, 0.0  ;;  %2766 = vadd.xlane.f32.xlu0 %v2765_v30  ;;  %v2059_v10 = vadd.f32 %v3796_v43, %v5348_v58 }
 0x2cb   : > { %v2736_v34 = vsub.f32 %v2699_v48, %v2728_v31  ;;  %2769 = vadd.xlane.f32.xlu1 %v2768_v33 }
 0x2cc   : > { %v2749_v35 = vmul.f32 1.442695, %v2735_v32  ;;  %v2804_v54 = vpack.c.bf16 %v2059_v10, %v2059_v10 }
 0x2cd   : > { %v2751_v36 = vmul.f32 1.442695, %v2736_v34  ;;  %v3186_v34 = vld [vmem:[%s5558_s7] sm:$0xf] }
 0x2ce   : > { %4604 = vpow2.f32 %v2749_v35  ;;  %v2952_v58 = vsel %vm2812_vm3, %v2804_v54, 0  ;;  %v3198_v35 = vsel %vm2812_vm3, %v3186_v34, 0 }
 0x2cf   : > { %4606 = vpow2.f32 %v2751_v36  ;;  %v3187_v36 = vld [vmem:[%s5558_s7 + $0x4] sm:$0xf] }
 0x2d8   : > { %v5384_v37 = vpop.eup %4604 }
 0x2d9   : > { %v5386_v38 = vpop.eup %4606  ;;  %v2771_v60 = vsel %vm2336_vm2, %v5384_v37, 0.0 }
 0x2da   : > { %v2774_v39 = vsel %vm2336_vm2, %v5386_v38, 0.0  ;;  %2772 = vadd.xlane.f32.xlu0 %v2771_v60 }
 0x2db   : > { %2775 = vadd.xlane.f32.xlu1 %v2774_v39 }
 0x337   : > { %v2755_v61 = vpop.xlane.xlu0 %2754 }
 0x338   : > { %4608 = vrcp.f32 %v2755_v61 }
 0x33b   : > { %v2758_v40 = vpop.xlane.xlu1 %2757 }
 0x33c   : > { %4610 = vrcp.f32 %v2758_v40 }
 0x342   : > { %v4609_v44 = vpop.eup %4608 }
 0x343   : > { %v2785_v48 = vmul.f32 %v4609_v44, %v4593_v6 }
 0x345   : > { %v2793_v49 = vpack.c.bf16 %v2785_v48, %v2785_v48  ;;  %v3336_v48 = vsel %vm2812_vm3, %v3189_v42, 0 }
 0x346   : > { %v4611_v50 = vpop.eup %4610 }
 0x347   : > { %v2786_v45 = vmul.f32 %v4611_v50, %v4595_v11  ;;  %4377 = vmatmul.mubr.msk.bf16.vlgmr.msra.gmra.mrb[64].mxu0 %vm2336_vm2, %v2793_v49  ;;  %v2761_v55 = vpop.xlane.xlu0 %2760 }
 0x348   : > { %4387 = vmatpush3.bf16.msra.mxu0 %v2906_v51  ;;  %4612 = vrcp.f32 %v2761_v55  ;;  %4388 = vmatprep.mubr.msk.bf16.mxu0 %vm4652_vm0, %v4651_v1  ;;  %v3190_v51 = vld [vmem:[%s5558_s7 + $0x10] sm:$0xf] }
 0x349   : > { %v2794_v56 = vpack.c.bf16 %v2786_v45, %v2786_v45  ;;  %4398 = vmatprep.subr.bf16.mxu0 %v4651_v1 }
 0x34b   : > { %4383 = vmatmul.mubr.msk.bf16.vlgmr.msra.gmra.mrb[64].mxu1 %vm2336_vm2, %v2794_v56  ;;  %v2764_v46 = vpop.xlane.xlu1 %2763  ;;  %v3382_v56 = vsel %vm2812_vm3, %v3190_v51, 0 }
 0x34c   : > { %4393 = vmatpush3.bf16.msra.mxu1 %v2952_v58  ;;  %4614 = vrcp.f32 %v2764_v46  ;;  %4394 = vmatprep.mubr.msk.bf16.mxu1 %vm4652_vm0, %v4651_v1  ;;  %v3191_v46 = vld [vmem:[%s5558_s7 + $0x14] sm:$0xf] }
 0x34d   : > { %4404 = vmatprep.subr.bf16.mxu1 %v4651_v1  ;;  %v3428_v0 = vsel %vm2812_vm3, %v3191_v46, 0 }
 0x352   : > { %v4613_v63 = vpop.eup %4612 }
 0x353   : > { %v2787_v4 = vmul.f32 %v4613_v63, %v5368_v53  ;;  %v2315_v53 = vadd.f32 %v3800_v52, %v5356_v13 }
 0x355   : > { %v2795_v6 = vpack.c.bf16 %v2787_v4, %v2787_v4  ;;  %v2808_v22 = vpack.c.bf16 %v2315_v53, %v2315_v53 }
 0x356   : > { %v4615_v7 = vpop.eup %4614 }
 0x357   : > { %v2788_v11 = vmul.f32 %v4615_v7, %v5372_v23  ;;  %4389 = vmatmul.mubr.msk.bf16.vlgmr.msra.gmra.mrb[68].mxu0 %vm2336_vm2, %v2795_v6  ;;  %v2767_v3 = vpop.xlane.xlu0 %2766  ;;  %v3136_v30 = vsel %vm2812_vm3, %v2808_v22, 0  ;;  %v3192_v6 = vld [vmem:[%s5558_s7 + $0x18] sm:$0xf]  ;;  %v3193_v7 = vld [vmem:[%s5558_s7 + $0x1c] sm:$0xf] }
 0x358   : > { %v2770_v14 = vpop.xlane.xlu1 %2769  ;;  %4399 = vmatpush3.bf16.msra.mxu0 %v2998_v8  ;;  %4616 = vrcp.f32 %v2767_v3  ;;  %4400 = vmatprep.mubr.msk.bf16.mxu0 %vm4652_vm0, %v4651_v1  ;;  %v3520_v52 = vsel %vm2812_vm3, %v3193_v7, 0 }
 0x359   : > { %4618 = vrcp.f32 %v2770_v14  ;;  %v2796_v5 = vpack.c.bf16 %v2788_v11, %v2788_v11  ;;  %4410 = vmatprep.subr.bf16.mxu0 %v4651_v1  ;;  %v3474_v14 = vsel %vm2812_vm3, %v3192_v6, 0 }
 0x35b   : > { %4395 = vmatmul.mubr.msk.bf16.vlgmr.msra.gmra.mrb[68].mxu1 %vm2336_vm2, %v2796_v5 }
 0x35c   : > { %4405 = vmatpush3.bf16.msra.mxu1 %v3044_v15  ;;  %4406 = vmatprep.mubr.msk.bf16.mxu1 %vm4652_vm0, %v4651_v1 }
 0x35d   : > { %4416 = vmatprep.subr.bf16.mxu1 %v4651_v1 }
 0x362   : > { %v4617_v18 = vpop.eup %4616 }
 0x363   : > { %v4619_v19 = vpop.eup %4618  ;;  %v2789_v21 = vmul.f32 %v4617_v18, %v5376_v27 }
 0x364   : > { %v2790_v23 = vmul.f32 %v4619_v19, %v5378_v28 }
 0x365   : > { %v2797_v24 = vpack.c.bf16 %v2789_v21, %v2789_v21 }
 0x366   : > { %v2798_v25 = vpack.c.bf16 %v2790_v23, %v2790_v23 }
 0x367   : > { %4401 = vmatmul.mubr.msk.bf16.vlgmr.msra.gmra.mrb[72].mxu0 %vm2336_vm2, %v2797_v24  ;;  %v2773_v29 = vpop.xlane.xlu0 %2772 }
 0x368   : > { %4407 = vmatmul.mubr.msk.bf16.vlgmr.msra.gmra.mrb[72].mxu1 %vm2336_vm2, %v2798_v25  ;;  %v2776_v12 = vpop.xlane.xlu1 %2775  ;;  %4411 = vmatpush3.bf16.msra.mxu0 %v3090_v26  ;;  %4620 = vrcp.f32 %v2773_v29 }
 0x369   : > { %4417 = vmatpush3.bf16.msra.mxu1 %v3136_v30  ;;  %4622 = vrcp.f32 %v2776_v12  ;;  %4412 = vmatprep.mubr.msk.bf16.mxu0 %vm4652_vm0, %v4651_v1 }
 0x36a   : > { %4418 = vmatprep.mubr.msk.bf16.mxu1 %vm4652_vm0, %v4651_v1  ;;  %4422 = vmatprep.subr.bf16.mxu0 %v4651_v1 }
 0x36b   : > { %4428 = vmatprep.subr.bf16.mxu1 %v4651_v1 }
 0x372   : > { %v4621_v13 = vpop.eup %4620 }
 0x373   : > { %v4623_v27 = vpop.eup %4622  ;;  %v2791_v28 = vmul.f32 %v4621_v13, %v5384_v37  ;;  %v3244_v37 = vsel %vm2812_vm3, %v3187_v36, 0 }
 0x374   : > { %v2792_v31 = vmul.f32 %v4623_v27, %v5386_v38  ;;  %v3188_v38 = vld [vmem:[%s5558_s7 + $0x8] sm:$0xf] }
 0x375   : > { %v2799_v32 = vpack.c.bf16 %v2791_v28, %v2791_v28  ;;  %v3290_v40 = vsel %vm2812_vm3, %v3188_v38, 0 }
 0x376   : > { %v2800_v33 = vpack.c.bf16 %v2792_v31, %v2792_v31 }
 0x377   : > { %4413 = vmatmul.mubr.msk.bf16.vlgmr.msra.gmra.mrb[76].mxu0 %vm2336_vm2, %v2799_v32 }
 0x378   : > { %4419 = vmatmul.mubr.msk.bf16.vlgmr.msra.gmra.mrb[76].mxu1 %vm2336_vm2, %v2800_v33  ;;  %4424 = vmatprep.mubr.msk.bf16.mxu0 %vm4652_vm0, %v4651_v1 }
 0x379   : > { %4430 = vmatprep.mubr.msk.bf16.mxu1 %vm4652_vm0, %v4651_v1  ;;  %4423 = vmatpush3.bf16.msra.mxu0 %v3198_v35 }
 0x37a   : > { %4434 = vmatprep.subr.bf16.mxu0 %v4651_v1  ;;  %4429 = vmatpush3.bf16.msra.mxu1 %v3244_v37 }
 0x37b   : > { %4440 = vmatprep.subr.bf16.mxu1 %v4651_v1 }
 0x41a   : > { %v2850_v60 = vpop.f32.mrb[64].mxu0 }
 0x41b   : > { %v3178_v39 = vpack.c.bf16 %v2850_v60, %v2850_v60  ;;  %v4378_v61 = vpop.f32.mrb[65].mxu0 }
 0x41c   : > { %v2853_v41 = vpop.f32.mrb[66].mxu0 }
 0x41d   : > { %v4379_v43 = vpop.f32.mrb[67].mxu0  ;;  %4425 = vmatmul.mubr.msk.bf16.vlgmr.msra.gmra.mrb[80].mxu0 %vm2336_vm2, %v3178_v39 }
 0x41e   : > { %v2896_v44 = vpop.f32.mrb[64].mxu1  ;;  %4435 = vmatpush3.bf16.msra.mxu0 %v3290_v40  ;;  %4436 = vmatprep.mubr.msk.bf16.mxu0 %vm4652_vm0, %v4651_v1 }
 0x41f   : > { %v3179_v47 = vpack.c.bf16 %v2896_v44, %v2896_v44  ;;  %v4384_v10 = vpop.f32.mrb[65].mxu1  ;;  %4446 = vmatprep.subr.bf16.mxu0 %v4651_v1 }
 0x420   : > { %v2899_v49 = vpop.f32.mrb[66].mxu1 }
 0x421   : > { %v4385_v50 = vpop.f32.mrb[67].mxu1  ;;  %4431 = vmatmul.mubr.msk.bf16.vlgmr.msra.gmra.mrb[80].mxu1 %vm2336_vm2, %v3179_v47 }
 0x422   : > { %4441 = vmatpush3.bf16.msra.mxu1 %v3336_v48  ;;  %4442 = vmatprep.mubr.msk.bf16.mxu1 %vm4652_vm0, %v4651_v1 }
 0x423   : > { %4452 = vmatprep.subr.bf16.mxu1 %v4651_v1 }
 0x42a   : > { %v2942_v54 = vpop.f32.mrb[68].mxu0 }
 0x42b   : > { %v3180_v45 = vpack.c.bf16 %v2942_v54, %v2942_v54  ;;  %v4390_v55 = vpop.f32.mrb[69].mxu0 }
 0x42c   : > { %v2945_v58 = vpop.f32.mrb[70].mxu0 }
 0x42d   : > { %v4391_v57 = vpop.f32.mrb[71].mxu0  ;;  %4437 = vmatmul.mubr.msk.bf16.vlgmr.msra.gmra.mrb[84].mxu0 %vm2336_vm2, %v3180_v45 }
 0x42e   : > { %v2988_v59 = vpop.f32.mrb[68].mxu1  ;;  %4447 = vmatpush3.bf16.msra.mxu0 %v3382_v56  ;;  %4448 = vmatprep.mubr.msk.bf16.mxu0 %vm4652_vm0, %v4651_v1 }
 0x42f   : > { %v3181_v62 = vpack.c.bf16 %v2988_v59, %v2988_v59  ;;  %v4396_v63 = vpop.f32.mrb[69].mxu1  ;;  %4458 = vmatprep.subr.bf16.mxu0 %v4651_v1 }
 0x430   : > { %v2991_v2 = vpop.f32.mrb[70].mxu1 }
 0x431   : > { %v4397_v4 = vpop.f32.mrb[71].mxu1  ;;  %4443 = vmatmul.mubr.msk.bf16.vlgmr.msra.gmra.mrb[84].mxu1 %vm2336_vm2, %v3181_v62 }
 0x432   : > { %4453 = vmatpush3.bf16.msra.mxu1 %v3428_v0  ;;  %4454 = vmatprep.mubr.msk.bf16.mxu1 %vm4652_vm0, %v4651_v1 }
 0x433   : > { %4464 = vmatprep.subr.bf16.mxu1 %v4651_v1 }
 0x43a   : > { %v3034_v8 = vpop.f32.mrb[72].mxu0 }
 0x43b   : > { %v3182_v9 = vpack.c.bf16 %v3034_v8, %v3034_v8  ;;  %v3080_v11 = vpop.f32.mrb[72].mxu1  ;;  %v4402_v3 = vpop.f32.mrb[73].mxu0 }
 0x43c   : > { %v3183_v5 = vpack.c.bf16 %v3080_v11, %v3080_v11  ;;  %v4408_v15 = vpop.f32.mrb[73].mxu1  ;;  %v3037_v16 = vpop.f32.mrb[74].mxu0 }
 0x43d   : > { %v3083_v17 = vpop.f32.mrb[74].mxu1  ;;  %v4403_v53 = vpop.f32.mrb[75].mxu0  ;;  %4449 = vmatmul.mubr.msk.bf16.vlgmr.msra.gmra.mrb[88].mxu0 %vm2336_vm2, %v3182_v9  ;;  %v3865_v9 = vld [vmem:[%s5559_s8] ss:$0 sm:$0xff] }
 0x43e   : > { %v4409_v18 = vpop.f32.mrb[75].mxu1  ;;  %4455 = vmatmul.mubr.msk.bf16.vlgmr.msra.gmra.mrb[88].mxu1 %vm2336_vm2, %v3183_v5  ;;  %4459 = vmatpush3.bf16.msra.mxu0 %v3474_v14  ;;  %v4626_v16 = vld [vmem:[%s4766_s21] sm:$0xff] }
 0x43f   : > { %4465 = vmatpush3.bf16.msra.mxu1 %v3520_v52  ;;  %4460 = vmatprep.mubr.msk.bf16.mxu0 %vm4652_vm0, %v4651_v1 }
 0x440   : > { %4466 = vmatprep.mubr.msk.bf16.mxu1 %vm4652_vm0, %v4651_v1 }
 0x44a   : > { %v3126_v19 = vpop.f32.mrb[76].mxu0 }
 0x44b   : > { %v3184_v20 = vpack.c.bf16 %v3126_v19, %v3126_v19  ;;  %v3172_v21 = vpop.f32.mrb[76].mxu1  ;;  %v4414_v22 = vpop.f32.mrb[77].mxu0 }
 0x44c   : > { %v3185_v23 = vpack.c.bf16 %v3172_v21, %v3172_v21  ;;  %v4420_v24 = vpop.f32.mrb[77].mxu1  ;;  %v3129_v25 = vpop.f32.mrb[78].mxu0 }
 0x44d   : > { %v3175_v26 = vpop.f32.mrb[78].mxu1  ;;  %v4415_v29 = vpop.f32.mrb[79].mxu0  ;;  %4461 = vmatmul.mubr.msk.bf16.vlgmr.msra.gmra.mrb[92].mxu0 %vm2336_vm2, %v3184_v20 }
 0x44e   : > { %v4421_v30 = vpop.f32.mrb[79].mxu1  ;;  %4467 = vmatmul.mubr.msk.bf16.vlgmr.msra.gmra.mrb[92].mxu1 %vm2336_vm2, %v3185_v23  ;;  %v3866_v26 = vld [vmem:[%s5560_s9] ss:$0 sm:$0xff] }
 0x44f   : > { %v3867_v30 = vld [vmem:[%s5561_s10] ss:$0 sm:$0xff] }
 0x4f0   : > { %v3234_v12 = vpop.f32.mrb[80].mxu0 }
 0x4f1   : > { %v4426_v13 = vpop.f32.mrb[81].mxu0  ;;  %v3562_v1 = vsel %vm681_vm1, %v3234_v12, 0.0 }
 0x4f2   : > { %v3237_v27 = vpop.f32.mrb[82].mxu0 }
 0x4f3   : > { %v4427_v28 = vpop.f32.mrb[83].mxu0 }
 0x4f4   : > { %v3280_v31 = vpop.f32.mrb[80].mxu1 }
 0x4f5   : > { %v3563_v32 = vsel %vm681_vm1, %v3280_v31, 0.0  ;;  %v4432_v33 = vpop.f32.mrb[81].mxu1 }
 0x4f6   : > { %v3564_v34 = vadd.f32 %v3563_v32, %v3562_v1  ;;  %v3283_v35 = vpop.f32.mrb[82].mxu1 }
 0x4f7   : > { %v4433_v36 = vpop.f32.mrb[83].mxu1 }
 0x500   : > { %v3326_v37 = vpop.f32.mrb[84].mxu0 }
 0x501   : > { %v3565_v38 = vsel %vm681_vm1, %v3326_v37, 0.0  ;;  %v4438_v60 = vpop.f32.mrb[85].mxu0 }
 0x502   : > { %v3566_v39 = vadd.f32 %v3565_v38, %v3564_v34  ;;  %v3329_v61 = vpop.f32.mrb[86].mxu0 }
 0x503   : > { %v4439_v40 = vpop.f32.mrb[87].mxu0 }
 0x504   : > { %v3372_v41 = vpop.f32.mrb[84].mxu1 }
 0x505   : > { %v3567_v42 = vsel %vm681_vm1, %v3372_v41, 0.0  ;;  %v4444_v43 = vpop.f32.mrb[85].mxu1 }
 0x506   : > { %v3568_v44 = vadd.f32 %v3567_v42, %v3566_v39  ;;  %v3375_v47 = vpop.f32.mrb[86].mxu1 }
 0x507   : > { %v4445_v10 = vpop.f32.mrb[87].mxu1 }
 0x510   : > { %v3418_v48 = vpop.f32.mrb[88].mxu0 }
 0x511   : > { %v3569_v49 = vsel %vm681_vm1, %v3418_v48, 0.0  ;;  %v3464_v50 = vpop.f32.mrb[88].mxu1  ;;  %v4450_v51 = vpop.f32.mrb[89].mxu0 }
 0x512   : > { %v3570_v54 = vadd.f32 %v3569_v49, %v3568_v44  ;;  %v4456_v45 = vpop.f32.mrb[89].mxu1  ;;  %v3421_v55 = vpop.f32.mrb[90].mxu0  ;;  %v3571_v56 = vsel %vm681_vm1, %v3464_v50, 0.0 }
 0x513   : > { %v3467_v58 = vpop.f32.mrb[90].mxu1  ;;  %v4451_v46 = vpop.f32.mrb[91].mxu0 }
 0x514   : > { %v3572_v57 = vadd.f32 %v3571_v56, %v3570_v54  ;;  %v4457_v59 = vpop.f32.mrb[91].mxu1 }
 0x520   : > { %v3510_v62 = vpop.f32.mrb[92].mxu0 }
 0x521   : > { %v3573_v63 = vsel %vm681_vm1, %v3510_v62, 0.0  ;;  %v3556_v0 = vpop.f32.mrb[92].mxu1  ;;  %v4462_v2 = vpop.f32.mrb[93].mxu0 }
 0x522   : > { %v3574_v4 = vadd.f32 %v3573_v63, %v3572_v57  ;;  %v4468_v6 = vpop.f32.mrb[93].mxu1  ;;  %v3513_v7 = vpop.f32.mrb[94].mxu0  ;;  %v3575_v8 = vsel %vm681_vm1, %v3556_v0, 0.0 }
 0x523   : > { %v3559_v11 = vpop.f32.mrb[94].mxu1  ;;  %v4463_v3 = vpop.f32.mrb[95].mxu0 }
 0x524   : > { %v3576_v14 = vadd.f32 %v3575_v8, %v3574_v4  ;;  %v4469_v5 = vpop.f32.mrb[95].mxu1 }
 0x526   : > { %v3584_v15 = vadd.f32 %v3865_v9, %v3576_v14 }
 0x528   : > { %v3585_v52 = vadd.f32 %v4626_v16, %v3584_v15 }
 0x52a   : > { %v3586_v17 = vsel %vm681_vm1, %v3585_v52, 0.0 }
 0x52b   : > { %3587 = vadd.xlane.f32.xlu0 %v3586_v17 }
 0x5b8   : > { %v3588_v53 = vpop.xlane.xlu0 %3587 }
 0x5b9   : > { %v3590_v18 = vmul.f32 0.015625, %v3588_v53 }
 0x5bb   : > { %v3591_v19 = vsub.f32 %v3585_v52, %v3590_v18 }
 0x5bd   : > { %v3592_v20 = vmul.f32 %v3591_v19, %v3591_v19 }
 0x5bf   : > { %v3593_v21 = vsel %vm681_vm1, %v3592_v20, 0.0 }
 0x5c0   : > { %3594 = vadd.xlane.f32.xlu1 %v3593_v21 }
 0x64d   : > { %v3595_v22 = vpop.xlane.xlu1 %3594 }
 0x64e   : > { %v3596_v23 = vmul.f32 0.015625, %v3595_v22 }
 0x650   : > { %v3597_v24 = vadd.f32 1e-05, %v3596_v23 }
 0x652   : > { %4624 = vrsqrt.f32 %v3597_v24 }
 0x65c   : > { %v4625_v25 = vpop.eup %4624 }
 0x65d   : > { %v3599_v29 = vmul.f32 %v4625_v25, %v3591_v19 }
 0x65f   : > { %v3607_v12 = vmul.f32 %v3866_v26, %v3599_v29 }
 0x661   : > { %v3615_v13 = vadd.f32 %v3867_v30, %v3607_v12 }
 0x663   : > { %3616 = vst.msk [vmem:[%s401_s26] sm:$0xff] %vm681_vm1, %v3615_v13 }
 0x664 PF: > { %s21_s19 = sadd.s32 1, %s4649_s19   ;;  %s5563_s17 = smov %s4645_s18 }
 0x665   : > { %p18_p5 = scmp.ge.s32.totalorder %s21_s19, 4   ;;  %s5564_s18 = smov %s5566_s20 }
 0x667   :  { %20 = sbr.rel (!%p18_p5) target bundleno = 2 (0x2), region = 95 }

// kernel: vit4d_forward.8
= control target key start
LH: loop header
LB: loop body
LE: loop exit
PB: predicated region body
PF: predicated region fallthrough
CT: control target
= control target key end

     0   :  { %v2820_v3 = vmov 0   ;;  %vm498_vm0 = vcmask 523264   ;;  %s3572_s1 = inlined_call_operand.vmem [shape: bf16[64,2048], index: 1, kind: input, shape index: {}]   ;;  %s3573_s0 = inlined_call_operand.vmem [shape: f32[16,64], index: 0, kind: input, shape index: {}]   ;;  %s3574_s3 = inlined_call_operand.vmem [shape: bf16[2048,64], index: 3, kind: input, shape index: {}]   ;;  %s3575_s2 = inlined_call_operand.vmem [shape: f32[1,2048], index: 2, kind: input, shape index: {}]   ;;  %s3576_s4 = inlined_call_operand.vmem [shape: f32[1,64], index: 4, kind: input, shape index: {}]   ;;  %s3577_s5 = inlined_call_operand.vmem [shape: f32[1,64], index: 5, kind: input, shape index: {}]   ;;  %s3578_s6 = inlined_call_operand.vmem [shape: f32[1,64], index: 6, kind: input, shape index: {}]   ;;  %s3579_s7 = inlined_call_operand.vmem [shape: f32[16,64], index: 7, kind: output, shape index: {}]  }
   0x1   :  { %v30_v0 = vld [vmem:[%s3572_s1] sm:$0xff]  ;;  %v31_v2 = vld [vmem:[%s3572_s1 + $0x8] sm:$0xff]  ;;  %534 = vmatprep.mubr.bf16.mxu0 %v2820_v3  ;;  %577 = vmatprep.mubr.bf16.mxu1 %v2820_v3  ;;  %v32_v31 = vld [vmem:[%s3572_s1 + $0x10] sm:$0xff] }
   0x2   :  { %v38_v1 = vld [vmem:[%s3572_s1 + $0x40] sm:$0xff]  ;;  %v39_v5 = vld [vmem:[%s3572_s1 + $0x48] sm:$0xff]  ;;  %v40_v32 = vld [vmem:[%s3572_s1 + $0x50] sm:$0xff] }
   0x3   :  { %v2307_v4 = vcombine.high %v30_v0, %v38_v1  ;;  %v2306_v6 = vcombine.low %v30_v0, %v38_v1  ;;  %v46_v7 = vld [vmem:[%s3572_s1 + $0x80] sm:$0xff]  ;;  %v2309_v9 = vcombine.high %v31_v2, %v39_v5  ;;  %v2308_v10 = vcombine.low %v31_v2, %v39_v5  ;;  %v47_v12 = vld [vmem:[%s3572_s1 + $0x88] sm:$0xff]  ;;  %v33_v33 = vld [vmem:[%s3572_s1 + $0x18] sm:$0xff] }
   0x4   :  { %v54_v8 = vld [vmem:[%s3572_s1 + $0xc0] sm:$0xff]  ;;  %v55_v13 = vld [vmem:[%s3572_s1 + $0xc8] sm:$0xff]  ;;  %v41_v34 = vld [vmem:[%s3572_s1 + $0x58] sm:$0xff]  ;;  %v2311_v39 = vcombine.high %v32_v31, %v40_v32  ;;  %v2310_v46 = vcombine.low %v32_v31, %v40_v32 }
   0x5   :  { %v2323_v11 = vcombine.high %v46_v7, %v54_v8  ;;  %v62_v14 = vld [vmem:[%s3572_s1 + $0x100] sm:$0xff]  ;;  %502 = vmatprep.subr.bf16.mxu0 %v2307_v4  ;;  %v2325_v15 = vcombine.high %v47_v12, %v55_v13  ;;  %v63_v17 = vld [vmem:[%s3572_s1 + $0x108] sm:$0xff]  ;;  %545 = vmatprep.subr.bf16.mxu1 %v2309_v9  ;;  %v2322_v19 = vcombine.low %v46_v7, %v54_v8  ;;  %v48_v41 = vld [vmem:[%s3572_s1 + $0x90] sm:$0xff] }
   0x6   :  { %v70_v16 = vld [vmem:[%s3572_s1 + $0x140] sm:$0xff]  ;;  %v71_v18 = vld [vmem:[%s3572_s1 + $0x148] sm:$0xff]  ;;  %503 = vmatpush1.bf16.msra.mxu0 %v2306_v6  ;;  %546 = vmatpush1.bf16.msra.mxu1 %v2308_v10  ;;  %v2324_v20 = vcombine.low %v47_v12, %v55_v13  ;;  %v2313_v40 = vcombine.high %v33_v33, %v41_v34  ;;  %v56_v42 = vld [vmem:[%s3572_s1 + $0xd0] sm:$0xff]  ;;  %v2312_v47 = vcombine.low %v33_v33, %v41_v34 }
   0x7   :  { %504 = vmatprep.subr.bf16.mxu0 %v2323_v11  ;;  %v2339_v21 = vcombine.high %v62_v14, %v70_v16  ;;  %547 = vmatprep.subr.bf16.mxu1 %v2325_v15  ;;  %v2341_v22 = vcombine.high %v63_v17, %v71_v18  ;;  %v78_v23 = vld [vmem:[%s3572_s1 + $0x180] sm:$0xff]  ;;  %v79_v25 = vld [vmem:[%s3572_s1 + $0x188] sm:$0xff]  ;;  %v2338_v27 = vcombine.low %v62_v14, %v70_v16  ;;  %v49_v44 = vld [vmem:[%s3572_s1 + $0x98] sm:$0xff] }
   0x8   :  { %v86_v24 = vld [vmem:[%s3572_s1 + $0x1c0] sm:$0xff]  ;;  %v87_v26 = vld [vmem:[%s3572_s1 + $0x1c8] sm:$0xff]  ;;  %v2340_v28 = vcombine.low %v63_v17, %v71_v18  ;;  %v57_v45 = vld [vmem:[%s3572_s1 + $0xd8] sm:$0xff]  ;;  %v2327_v48 = vcombine.high %v48_v41, %v56_v42  ;;  %v2326_v54 = vcombine.low %v48_v41, %v56_v42 }
   0x9   :  { %v2355_v29 = vcombine.high %v78_v23, %v86_v24  ;;  %v2357_v30 = vcombine.high %v79_v25, %v87_v26  ;;  %v2354_v35 = vcombine.low %v78_v23, %v86_v24  ;;  %v27_v36 = vld [vmem:[%s3573_s0] sm:$0xff]  ;;  %v28_v37 = vld [vmem:[%s3573_s0 + $0x8] sm:$0xff]  ;;  %v2356_v38 = vcombine.low %v79_v25, %v87_v26  ;;  %v64_v50 = vld [vmem:[%s3572_s1 + $0x110] sm:$0xff] }
   0xa   :  { %505 = vmatpush1.bf16.msra.mxu0 %v2322_v19  ;;  %548 = vmatpush1.bf16.msra.mxu1 %v2324_v20  ;;  %v2935_v43 = vpack.c.bf16 %v28_v37, %v27_v36  ;;  %v2329_v49 = vcombine.high %v49_v44, %v57_v45  ;;  %v72_v51 = vld [vmem:[%s3572_s1 + $0x150] sm:$0xff]  ;;  %v65_v52 = vld [vmem:[%s3572_s1 + $0x118] sm:$0xff]  ;;  %v2328_v55 = vcombine.low %v49_v44, %v57_v45  ;;  %v34_v63 = vld [vmem:[%s3572_s1 + $0x20] sm:$0xff] }
   0xb   :  { %506 = vmatprep.subr.bf16.mxu0 %v2339_v21  ;;  %549 = vmatprep.subr.bf16.mxu1 %v2341_v22  ;;  %v73_v53 = vld [vmem:[%s3572_s1 + $0x158] sm:$0xff]  ;;  %v2343_v56 = vcombine.high %v64_v50, %v72_v51  ;;  %v80_v57 = vld [vmem:[%s3572_s1 + $0x190] sm:$0xff]  ;;  %v2342_v62 = vcombine.low %v64_v50, %v72_v51  ;;  %v42_v2 = vld [vmem:[%s3572_s1 + $0x60] sm:$0xff] }
   0xc   :  { %v88_v58 = vld [vmem:[%s3572_s1 + $0x1d0] sm:$0xff]  ;;  %v2345_v59 = vcombine.high %v65_v52, %v73_v53  ;;  %v81_v60 = vld [vmem:[%s3572_s1 + $0x198] sm:$0xff]  ;;  %v2344_v0 = vcombine.low %v65_v52, %v73_v53  ;;  %v35_v5 = vld [vmem:[%s3572_s1 + $0x28] sm:$0xff]  ;;  %v2315_v10 = vcombine.high %v34_v63, %v42_v2  ;;  %v2314_v15 = vcombine.low %v34_v63, %v42_v2 }
   0xd   :  { %v89_v61 = vld [vmem:[%s3572_s1 + $0x1d8] sm:$0xff]  ;;  %v2359_v1 = vcombine.high %v80_v57, %v88_v58  ;;  %v43_v6 = vld [vmem:[%s3572_s1 + $0x68] sm:$0xff]  ;;  %v2358_v7 = vcombine.low %v80_v57, %v88_v58  ;;  %v50_v8 = vld [vmem:[%s3572_s1 + $0xa0] sm:$0xff] }
   0xe   :  { %507 = vmatpush1.bf16.msra.mxu0 %v2338_v27  ;;  %550 = vmatpush1.bf16.msra.mxu1 %v2340_v28  ;;  %v2361_v4 = vcombine.high %v81_v60, %v89_v61  ;;  %v2360_v9 = vcombine.low %v81_v60, %v89_v61  ;;  %v58_v11 = vld [vmem:[%s3572_s1 + $0xe0] sm:$0xff]  ;;  %v2317_v12 = vcombine.high %v35_v5, %v43_v6  ;;  %v51_v13 = vld [vmem:[%s3572_s1 + $0xa8] sm:$0xff]  ;;  %v36_v32 = vld [vmem:[%s3572_s1 + $0x30] sm:$0xff] }
   0xf   :  { %508 = vmatprep.subr.bf16.mxu0 %v2355_v29  ;;  %551 = vmatprep.subr.bf16.mxu1 %v2357_v30  ;;  %v59_v14 = vld [vmem:[%s3572_s1 + $0xe8] sm:$0xff]  ;;  %v66_v16 = vld [vmem:[%s3572_s1 + $0x120] sm:$0xff]  ;;  %v2316_v17 = vcombine.low %v35_v5, %v43_v6  ;;  %v2331_v18 = vcombine.high %v50_v8, %v58_v11  ;;  %v2330_v23 = vcombine.low %v50_v8, %v58_v11  ;;  %v37_v37 = vld [vmem:[%s3572_s1 + $0x38] sm:$0xff] }
  0x10   :  { %v74_v19 = vld [vmem:[%s3572_s1 + $0x160] sm:$0xff]  ;;  %v2333_v20 = vcombine.high %v51_v13, %v59_v14  ;;  %v67_v21 = vld [vmem:[%s3572_s1 + $0x128] sm:$0xff]  ;;  %v2332_v25 = vcombine.low %v51_v13, %v59_v14  ;;  %v60_v41 = vld [vmem:[%s3572_s1 + $0xf0] sm:$0xff] }
  0x11   :  { %v75_v22 = vld [vmem:[%s3572_s1 + $0x168] sm:$0xff]  ;;  %v82_v24 = vld [vmem:[%s3572_s1 + $0x1a0] sm:$0xff]  ;;  %v2347_v26 = vcombine.high %v66_v16, %v74_v19  ;;  %v2346_v31 = vcombine.low %v66_v16, %v74_v19  ;;  %v53_v45 = vld [vmem:[%s3572_s1 + $0xb8] sm:$0xff] }
  0x12   :  { %509 = vmatpush1.bf16.msra.mxu0 %v2354_v35  ;;  %552 = vmatpush1.bf16.msra.mxu1 %v2356_v38  ;;  %v90_v27 = vld [vmem:[%s3572_s1 + $0x1e0] sm:$0xff]  ;;  %v2349_v28 = vcombine.high %v67_v21, %v75_v22  ;;  %v83_v29 = vld [vmem:[%s3572_s1 + $0x1a8] sm:$0xff]  ;;  %v2348_v33 = vcombine.low %v67_v21, %v75_v22  ;;  %v44_v35 = vld [vmem:[%s3572_s1 + $0x70] sm:$0xff] }
  0x13   :  { %588 = vmatprep.subr.bf16.mxu0 %v2311_v39  ;;  %631 = vmatprep.subr.bf16.mxu1 %v2313_v40  ;;  %v91_v30 = vld [vmem:[%s3572_s1 + $0x1e8] sm:$0xff]  ;;  %v2363_v34 = vcombine.high %v82_v24, %v90_v27  ;;  %v45_v38 = vld [vmem:[%s3572_s1 + $0x78] sm:$0xff]  ;;  %v2362_v39 = vcombine.low %v82_v24, %v90_v27  ;;  %v52_v40 = vld [vmem:[%s3572_s1 + $0xb0] sm:$0xff]  ;;  %v2319_v44 = vcombine.high %v36_v32, %v44_v35 }
  0x14   :  { %v2365_v36 = vcombine.high %v83_v29, %v91_v30  ;;  %v2364_v42 = vcombine.low %v83_v29, %v91_v30  ;;  %v76_v50 = vld [vmem:[%s3572_s1 + $0x170] sm:$0xff]  ;;  %v2320_v51 = vcombine.low %v37_v37, %v45_v38  ;;  %v2335_v52 = vcombine.high %v52_v40, %v60_v41  ;;  %v69_v53 = vld [vmem:[%s3572_s1 + $0x138] sm:$0xff]  ;;  %v2686_v5 = vld [vmem:[%s3574_s3 + $0x40] sm:$0xff]  }
  0x15   :  { %2370 = vmatmul.mubr.msk.bf16.vlgmr.msra.gmra.mrb[0].mxu0 %vm498_vm0, %v2935_v43  ;;  %2371 = vmatmul.mubr.msk.bf16.vlgmr.msra.gmra.mrb[0].mxu1 %vm498_vm0, %v2935_v43  ;;  %v84_v57 = vld [vmem:[%s3572_s1 + $0x1b0] sm:$0xff]  ;;  %v85_v61 = vld [vmem:[%s3572_s1 + $0x1b8] sm:$0xff]  ;;  %v2688_v8 = vld [vmem:[%s3574_s3] sm:$0xff]  }
  0x16   :  { %589 = vmatpush1.bf16.msra.mxu0 %v2310_v46  ;;  %632 = vmatpush1.bf16.msra.mxu1 %v2312_v47  ;;  %v2321_v46 = vcombine.high %v37_v37, %v45_v38  ;;  %v61_v47 = vld [vmem:[%s3572_s1 + $0xf8] sm:$0xff]  ;;  %v92_v58 = vld [vmem:[%s3572_s1 + $0x1f0] sm:$0xff]  ;;  %v2691_v11 = vld [vmem:[%s3574_s3 + $0xc8] sm:$0xff]  }
  0x17   :  { %590 = vmatprep.subr.bf16.mxu0 %v2327_v48  ;;  %633 = vmatprep.subr.bf16.mxu1 %v2329_v49  ;;  %v2318_v48 = vcombine.low %v36_v32, %v44_v35  ;;  %v68_v49 = vld [vmem:[%s3572_s1 + $0x130] sm:$0xff]  ;;  %v2367_v2 = vcombine.high %v84_v57, %v92_v58  ;;  %v2366_v6 = vcombine.low %v84_v57, %v92_v58  ;;  %v2693_v13 = vld [vmem:[%s3574_s3 + $0x88] sm:$0xff]   ;;  %v2700_v19 = vld [vmem:[%s3574_s3 + $0x18] sm:$0xff]  }
  0x18   :  { %620 = vmatprep.mubr.bf16.mxu0 %v2820_v3  ;;  %663 = vmatprep.mubr.bf16.mxu1 %v2820_v3  ;;  %v2351_v60 = vcombine.high %v68_v49, %v76_v50  ;;  %v2694_v14 = vld [vmem:[%s3574_s3 + $0x50] sm:$0xff]   ;;  %v2702_v21 = vld [vmem:[%s3574_s3 + $0x60] sm:$0xff]   ;;  %v2708_v27 = vld [vmem:[%s3574_s3 + $0x28] sm:$0xff]  }
  0x19   :  { %v2696_v16 = vld [vmem:[%s3574_s3 + $0x10] sm:$0xff]   ;;  %v2703_v22 = vld [vmem:[%s3574_s3 + $0xe0] sm:$0xff]   ;;  %v2716_v35 = vld [vmem:[%s3574_s3 + $0x38] sm:$0xff]  }
  0x1a   :  { %591 = vmatpush1.bf16.msra.mxu0 %v2326_v54  ;;  %634 = vmatpush1.bf16.msra.mxu1 %v2328_v55  ;;  %v77_v54 = vld [vmem:[%s3572_s1 + $0x178] sm:$0xff]  ;;  %v2337_v55 = vcombine.high %v53_v45, %v61_v47  ;;  %v2705_v24 = vld [vmem:[%s3574_s3 + $0xa0] sm:$0xff]   ;;  %v2710_v29 = vld [vmem:[%s3574_s3 + $0x70] sm:$0xff]  }
  0x1b   :  { %592 = vmatprep.subr.bf16.mxu0 %v2343_v56  ;;  %635 = vmatprep.subr.bf16.mxu1 %v2345_v59  ;;  %v2334_v56 = vcombine.low %v52_v40, %v60_v41  ;;  %v2336_v59 = vcombine.low %v53_v45, %v61_v47  ;;  %v2353_v63 = vcombine.high %v69_v53, %v77_v54  ;;  %v2711_v30 = vld [vmem:[%s3574_s3 + $0xf0] sm:$0xff]   ;;  %v2718_v37 = vld [vmem:[%s3574_s3 + $0x140] sm:$0xff]  }
  0x1c   :  { %v2713_v32 = vld [vmem:[%s3574_s3 + $0xb0] sm:$0xff]   ;;  %v2719_v38 = vld [vmem:[%s3574_s3 + $0x1c0] sm:$0xff]  }
  0x1e   :  { %593 = vmatpush1.bf16.msra.mxu0 %v2342_v62  ;;  %636 = vmatpush1.bf16.msra.mxu1 %v2344_v0  ;;  %v93_v62 = vld [vmem:[%s3572_s1 + $0x1f8] sm:$0xff]  ;;  %v2350_v0 = vcombine.low %v68_v49, %v76_v50 }
  0x1f   :  { %594 = vmatprep.subr.bf16.mxu0 %v2359_v1  ;;  %637 = vmatprep.subr.bf16.mxu1 %v2361_v4  ;;  %v2352_v1 = vcombine.low %v69_v53, %v77_v54  ;;  %v2369_v4 = vcombine.high %v85_v61, %v93_v62 }
  0x22   :  { %595 = vmatpush1.bf16.msra.mxu0 %v2358_v7  ;;  %638 = vmatpush1.bf16.msra.mxu1 %v2360_v9  ;;  %v2687_v7 = vld [vmem:[%s3574_s3 + $0xc0] sm:$0xff]  }
  0x23   :  { %674 = vmatprep.subr.bf16.mxu0 %v2315_v10  ;;  %717 = vmatprep.subr.bf16.mxu1 %v2317_v12  ;;  %v2689_v9 = vld [vmem:[%s3574_s3 + $0x80] sm:$0xff]   ;;  %v2690_v10 = vld [vmem:[%s3574_s3 + $0x48] sm:$0xff]  }
  0x24   :  { %v2692_v12 = vld [vmem:[%s3574_s3 + $0x8] sm:$0xff]  }
  0x25   :  { %2372 = vmatmul.mubr.msk.bf16.vlgmr.msra.gmra.mrb[4].mxu0 %vm498_vm0, %v2935_v43  ;;  %2373 = vmatmul.mubr.msk.bf16.vlgmr.msra.gmra.mrb[4].mxu1 %vm498_vm0, %v2935_v43 }
  0x26   :  { %675 = vmatpush1.bf16.msra.mxu0 %v2314_v15  ;;  %718 = vmatpush1.bf16.msra.mxu1 %v2316_v17  ;;  %v2695_v15 = vld [vmem:[%s3574_s3 + $0xd0] sm:$0xff]  }
  0x27   :  { %676 = vmatprep.subr.bf16.mxu0 %v2331_v18  ;;  %719 = vmatprep.subr.bf16.mxu1 %v2333_v20  ;;  %v2697_v17 = vld [vmem:[%s3574_s3 + $0x90] sm:$0xff]   ;;  %v2699_v18 = vld [vmem:[%s3574_s3 + $0xd8] sm:$0xff]  }
  0x28   :  { %706 = vmatprep.mubr.bf16.mxu0 %v2820_v3  ;;  %749 = vmatprep.mubr.bf16.mxu1 %v2820_v3  ;;  %v2701_v20 = vld [vmem:[%s3574_s3 + $0x98] sm:$0xff]  }
  0x2a   :  { %677 = vmatpush1.bf16.msra.mxu0 %v2330_v23  ;;  %720 = vmatpush1.bf16.msra.mxu1 %v2332_v25  ;;  %v2704_v23 = vld [vmem:[%s3574_s3 + $0x20] sm:$0xff]   ;;  %v2706_v25 = vld [vmem:[%s3574_s3 + $0x68] sm:$0xff]  }
  0x2b   :  { %678 = vmatprep.subr.bf16.mxu0 %v2347_v26  ;;  %721 = vmatprep.subr.bf16.mxu1 %v2349_v28  ;;  %v2707_v26 = vld [vmem:[%s3574_s3 + $0xe8] sm:$0xff]  }
  0x2c   :  { %v2709_v28 = vld [vmem:[%s3574_s3 + $0xa8] sm:$0xff]  }
  0x2e   :  { %679 = vmatpush1.bf16.msra.mxu0 %v2346_v31  ;;  %722 = vmatpush1.bf16.msra.mxu1 %v2348_v33  ;;  %v2712_v31 = vld [vmem:[%s3574_s3 + $0x30] sm:$0xff]   ;;  %v2714_v33 = vld [vmem:[%s3574_s3 + $0x78] sm:$0xff]  }
  0x2f   :  { %680 = vmatprep.subr.bf16.mxu0 %v2363_v34  ;;  %723 = vmatprep.subr.bf16.mxu1 %v2365_v36  ;;  %v2715_v34 = vld [vmem:[%s3574_s3 + $0xf8] sm:$0xff]  }
  0x30   :  { %v2717_v36 = vld [vmem:[%s3574_s3 + $0xb8] sm:$0xff]  }
  0x32   :  { %681 = vmatpush1.bf16.msra.mxu0 %v2362_v39  ;;  %724 = vmatpush1.bf16.msra.mxu1 %v2364_v42  ;;  %v98_v39 = vlaneseq  ;;  %v94_v42 = vld [vmem:[%s3575_s2] sm:$0xff] }
  0x33   :  { %760 = vmatprep.subr.bf16.mxu0 %v2319_v44  ;;  %803 = vmatprep.subr.bf16.mxu1 %v2321_v46 }
  0x34   :  { %v3187_v40 = vshrl.u32 %v98_v39, 7 }
  0x35   :  { %2374 = vmatmul.mubr.msk.bf16.vlgmr.msra.gmra.mrb[8].mxu0 %vm498_vm0, %v2935_v43  ;;  %2375 = vmatmul.mubr.msk.bf16.vlgmr.msra.gmra.mrb[8].mxu1 %vm498_vm0, %v2935_v43 }
  0x36   :  { %761 = vmatpush1.bf16.msra.mxu0 %v2318_v48  ;;  %804 = vmatpush1.bf16.msra.mxu1 %v2320_v51  ;;  %v100_v41 = vsub.s32 0, %v3187_v40  ;;  %v108_v44 = vsub.s32 2, %v3187_v40  ;;  %v104_v45 = vsub.s32 1, %v3187_v40  ;;  %v112_v46 = vsub.s32 3, %v3187_v40 }
  0x37   :  { %762 = vmatprep.subr.bf16.mxu0 %v2335_v52  ;;  %805 = vmatprep.subr.bf16.mxu1 %v2337_v55 }
  0x38   :  { %792 = vmatprep.mubr.bf16.mxu0 %v2820_v3  ;;  %835 = vmatprep.mubr.bf16.mxu1 %v2820_v3  ;;  %v2368_v3 = vcombine.low %v85_v61, %v93_v62  ;;  %v101_v47 = vrot.slane %v94_v42, %v100_v41  ;;  %v109_v48 = vrot.slane %v94_v42, %v108_v44 }
  0x39   :  { %v105_v49 = vrot.slane %v94_v42, %v104_v45  ;;  %v113_v50 = vrot.slane %v94_v42, %v112_v46 }
  0x3a   :  { %763 = vmatpush1.bf16.msra.mxu0 %v2334_v56  ;;  %806 = vmatpush1.bf16.msra.mxu1 %v2336_v59 }
  0x3b   :  { %764 = vmatprep.subr.bf16.mxu0 %v2351_v60  ;;  %807 = vmatprep.subr.bf16.mxu1 %v2353_v63 }
  0x3e   :  { %765 = vmatpush1.bf16.msra.mxu0 %v2350_v0  ;;  %808 = vmatpush1.bf16.msra.mxu1 %v2352_v1 }
  0x3f   :  { %766 = vmatprep.subr.bf16.mxu0 %v2367_v2  ;;  %809 = vmatprep.subr.bf16.mxu1 %v2369_v4 }
  0x42   :  { %767 = vmatpush1.bf16.msra.mxu0 %v2366_v6  ;;  %810 = vmatpush1.bf16.msra.mxu1 %v2368_v3 }
  0x43   :  { %2509 = vmatprep.subr.bf16.mxu0 %v2686_v5  ;;  %2531 = vmatprep.subr.bf16.mxu1 %v2687_v7 }
  0x45   :  { %2376 = vmatmul.mubr.msk.bf16.vlgmr.msra.gmra.mrb[12].mxu0 %vm498_vm0, %v2935_v43  ;;  %2377 = vmatmul.mubr.msk.bf16.vlgmr.msra.gmra.mrb[12].mxu1 %vm498_vm0, %v2935_v43  ;;  %v2698_v43 = vld [vmem:[%s3574_s3 + $0x58] sm:$0xff]  }
  0x46   :  { %2510 = vmatpush3.bf16.msra.mxu0 %v2688_v8  ;;  %2532 = vmatpush3.bf16.msra.mxu1 %v2689_v9 }
  0x47   :  { %2511 = vmatprep.subr.bf16.mxu0 %v2690_v10  ;;  %2533 = vmatprep.subr.bf16.mxu1 %v2691_v11 }
  0x4a   :  { %2512 = vmatpush3.bf16.msra.mxu0 %v2692_v12  ;;  %2534 = vmatpush3.bf16.msra.mxu1 %v2693_v13 }
  0x4b   :  { %2513 = vmatprep.subr.bf16.mxu0 %v2694_v14  ;;  %2535 = vmatprep.subr.bf16.mxu1 %v2695_v15  ;;  %v2720_v14 = vld [vmem:[%s3574_s3 + $0x100] sm:$0xff]  }
  0x4e   :  { %2514 = vmatpush3.bf16.msra.mxu0 %v2696_v16  ;;  %2536 = vmatpush3.bf16.msra.mxu1 %v2697_v17  ;;  %v2721_v16 = vld [vmem:[%s3574_s3 + $0x180] sm:$0xff]   ;;  %v2722_v17 = vld [vmem:[%s3574_s3 + $0x148] sm:$0xff]  }
  0x4f   :  { %2515 = vmatprep.subr.bf16.mxu0 %v2698_v43  ;;  %2537 = vmatprep.subr.bf16.mxu1 %v2699_v18  ;;  %v116_v43 = vsub.s32 4, %v3187_v40  ;;  %v2723_v18 = vld [vmem:[%s3574_s3 + $0x1c8] sm:$0xff]  }
  0x52   :  { %2516 = vmatpush3.bf16.msra.mxu0 %v2700_v19  ;;  %2538 = vmatpush3.bf16.msra.mxu1 %v2701_v20  ;;  %v120_v19 = vsub.s32 5, %v3187_v40  ;;  %v124_v20 = vsub.s32 6, %v3187_v40 }
  0x53   :  { %2517 = vmatprep.subr.bf16.mxu0 %v2702_v21  ;;  %2539 = vmatprep.subr.bf16.mxu1 %v2703_v22  ;;  %v128_v21 = vsub.s32 7, %v3187_v40  ;;  %v2724_v22 = vld [vmem:[%s3574_s3 + $0x108] sm:$0xff]  }
  0x56   :  { %2518 = vmatpush3.bf16.msra.mxu0 %v2704_v23  ;;  %2540 = vmatpush3.bf16.msra.mxu1 %v2705_v24  ;;  %v2725_v23 = vld [vmem:[%s3574_s3 + $0x188] sm:$0xff]   ;;  %v2726_v24 = vld [vmem:[%s3574_s3 + $0x150] sm:$0xff]  }
  0x57   :  { %2519 = vmatprep.subr.bf16.mxu0 %v2706_v25  ;;  %2541 = vmatprep.subr.bf16.mxu1 %v2707_v26  ;;  %v117_v25 = vrot.slane %v94_v42, %v116_v43  ;;  %v2727_v26 = vld [vmem:[%s3574_s3 + $0x1d0] sm:$0xff]  }
  0x5a   :  { %2520 = vmatpush3.bf16.msra.mxu0 %v2708_v27  ;;  %2542 = vmatpush3.bf16.msra.mxu1 %v2709_v28  ;;  %v121_v27 = vrot.slane %v94_v42, %v120_v19  ;;  %v125_v28 = vrot.slane %v94_v42, %v124_v20 }
  0x5b   :  { %2521 = vmatprep.subr.bf16.mxu0 %v2710_v29  ;;  %2543 = vmatprep.subr.bf16.mxu1 %v2711_v30  ;;  %v129_v29 = vrot.slane %v94_v42, %v128_v21  ;;  %v2728_v30 = vld [vmem:[%s3574_s3 + $0x110] sm:$0xff]  }
  0x5e   :  { %2522 = vmatpush3.bf16.msra.mxu0 %v2712_v31  ;;  %2544 = vmatpush3.bf16.msra.mxu1 %v2713_v32  ;;  %v2729_v32 = vld [vmem:[%s3574_s3 + $0x190] sm:$0xff]  }
  0x5f   :  { %2523 = vmatprep.subr.bf16.mxu0 %v2714_v33  ;;  %2545 = vmatprep.subr.bf16.mxu1 %v2715_v34  ;;  %v2730_v33 = vld [vmem:[%s3574_s3 + $0x158] sm:$0xff]  }
  0x62   :  { %2524 = vmatpush3.bf16.msra.mxu0 %v2716_v35  ;;  %2546 = vmatpush3.bf16.msra.mxu1 %v2717_v36 }
  0x63   :  { %2553 = vmatprep.subr.bf16.mxu0 %v2718_v37  ;;  %2575 = vmatprep.subr.bf16.mxu1 %v2719_v38  ;;  %v2731_v37 = vld [vmem:[%s3574_s3 + $0x1d8] sm:$0xff]  }
  0xe8   :  { %v536_v51 = vpop.f32.mrb[0].mxu0  ;;  %v579_v53 = vpop.f32.mrb[0].mxu1 }
  0xe9   :  { %v537_v52 = vadd.f32 %v536_v51, %v101_v47  ;;  %v538_v54 = vpop.f32.mrb[1].mxu0  ;;  %v580_v55 = vadd.f32 %v579_v53, %v109_v48  ;;  %v581_v57 = vpop.f32.mrb[1].mxu1  ;;  %v2732_v53 = vld [vmem:[%s3574_s3 + $0x118] sm:$0xff]  }
  0xea   :  { %v539_v56 = vadd.f32 %v538_v54, %v105_v49  ;;  %v540_v58 = vpop.f32.mrb[2].mxu0  ;;  %v582_v59 = vadd.f32 %v581_v57, %v113_v50  ;;  %v583_v61 = vpop.f32.mrb[2].mxu1 }
  0xeb   :  { %v541_v60 = vadd.f32 %v540_v58, %v101_v47  ;;  %v542_v62 = vpop.f32.mrb[3].mxu0  ;;  %v848_v63 = vmax.f32 %v580_v55, 0.0  ;;  %v584_v0 = vadd.f32 %v583_v61, %v109_v48  ;;  %v585_v2 = vpop.f32.mrb[3].mxu1  ;;  %v846_v4 = vmax.f32 %v537_v52, 0.0 }
  0xec   :  { %v543_v1 = vadd.f32 %v542_v62, %v105_v49  ;;  %v849_v5 = vmax.f32 %v582_v59, 0.0  ;;  %v586_v7 = vadd.f32 %v585_v2, %v113_v50  ;;  %v847_v3 = vmax.f32 %v539_v56, 0.0  ;;  %v2733_v59 = vld [vmem:[%s3574_s3 + $0x198] sm:$0xff]  }
  0xed   :  { %v862_v6 = vmax.f32 %v541_v60, 0.0  ;;  %v864_v8 = vmax.f32 %v584_v0, 0.0  ;;  %v2734_v60 = vld [vmem:[%s3574_s3 + $0x160] sm:$0xff]  }
  0xee   :  { %v863_v9 = vmax.f32 %v543_v1, 0.0  ;;  %v865_v11 = vmax.f32 %v586_v7, 0.0  ;;  %v2735_v0 = vld [vmem:[%s3574_s3 + $0x1e0] sm:$0xff]  }
  0xef   :  { %v878_v10 = vpack.c.bf16 %v862_v6, %v846_v4  ;;  %v880_v12 = vpack.c.bf16 %v864_v8, %v848_v63  ;;  %v2736_v6 = vld [vmem:[%s3574_s3 + $0x120] sm:$0xff]  }
  0xf0   :  { %v879_v13 = vpack.c.bf16 %v863_v9, %v847_v3  ;;  %v881_v15 = vpack.c.bf16 %v865_v11, %v849_v5  ;;  %v2737_v8 = vld [vmem:[%s3574_s3 + $0x1a0] sm:$0xff]   ;;  %v2738_v9 = vld [vmem:[%s3574_s3 + $0x168] sm:$0xff]  }
  0xf1   :  { %v2739_v11 = vld [vmem:[%s3574_s3 + $0x1e8] sm:$0xff]  }
  0xf2   :  { %1957 = vmatprep.mubr.bf16.mxu0 %v879_v13  ;;  %1998 = vmatprep.mubr.bf16.mxu1 %v881_v15  ;;  %v2740_v13 = vld [vmem:[%s3574_s3 + $0x128] sm:$0xff]   ;;  %v2742_v15 = vld [vmem:[%s3574_s3 + $0x170] sm:$0xff]  }
  0xf3   :  { %1958 = vmatmul.mubr.bf16.vlgmr.msra.gmra.mrb[16].mxu0 %v878_v10  ;;  %1999 = vmatmul.mubr.bf16.vlgmr.msra.gmra.mrb[16].mxu1 %v880_v12  ;;  %v3283_v12 = vld [vmem:[%s3575_s2 + $0x8] sm:$0xff] }
  0xf4   :  { %2554 = vmatpush3.bf16.msra.mxu0 %v2720_v14  ;;  %2576 = vmatpush3.bf16.msra.mxu1 %v2721_v16  ;;  %v2741_v14 = vld [vmem:[%s3574_s3 + $0x1a8] sm:$0xff]   ;;  %v133_v16 = vrot.slane %v3283_v12, %v100_v41  ;;  %v2744_v41 = vld [vmem:[%s3574_s3 + $0x130] sm:$0xff]  }
  0xf5   :  { %2555 = vmatprep.subr.bf16.mxu0 %v2722_v17  ;;  %2577 = vmatprep.subr.bf16.mxu1 %v2723_v18  ;;  %v2743_v17 = vld [vmem:[%s3574_s3 + $0x1f0] sm:$0xff]   ;;  %v137_v18 = vrot.slane %v3283_v12, %v104_v45 }
  0xf6   :  { %v2745_v45 = vld [vmem:[%s3574_s3 + $0x1b0] sm:$0xff]  }
  0xf8   :  { %2556 = vmatpush3.bf16.msra.mxu0 %v2724_v22  ;;  %v622_v31 = vpop.f32.mrb[4].mxu0  ;;  %2578 = vmatpush3.bf16.msra.mxu1 %v2725_v23  ;;  %v665_v36 = vpop.f32.mrb[4].mxu1  ;;  %v141_v22 = vrot.slane %v3283_v12, %v108_v44  ;;  %v145_v23 = vrot.slane %v3283_v12, %v112_v46  ;;  %v2746_v44 = vld [vmem:[%s3574_s3 + $0x178] sm:$0xff]  }
  0xf9   :  { %2557 = vmatprep.subr.bf16.mxu0 %v2726_v24  ;;  %v623_v34 = vadd.f32 %v622_v31, %v117_v25  ;;  %v624_v35 = vpop.f32.mrb[5].mxu0  ;;  %2579 = vmatprep.subr.bf16.mxu1 %v2727_v26  ;;  %v666_v42 = vadd.f32 %v665_v36, %v125_v28  ;;  %v667_v47 = vpop.f32.mrb[5].mxu1  ;;  %v2747_v46 = vld [vmem:[%s3574_s3 + $0x1f8] sm:$0xff]  }
  0xfa   :  { %v625_v38 = vadd.f32 %v624_v35, %v121_v27  ;;  %v626_v39 = vpop.f32.mrb[6].mxu0  ;;  %v668_v51 = vadd.f32 %v667_v47, %v129_v29  ;;  %v669_v52 = vpop.f32.mrb[6].mxu1 }
  0xfb   :  { %v850_v48 = vmax.f32 %v623_v34, 0.0  ;;  %v627_v49 = vadd.f32 %v626_v39, %v117_v25  ;;  %v628_v50 = vpop.f32.mrb[7].mxu0  ;;  %v852_v55 = vmax.f32 %v666_v42, 0.0  ;;  %v670_v57 = vadd.f32 %v669_v52, %v125_v28  ;;  %v671_v58 = vpop.f32.mrb[7].mxu1 }
  0xfc   :  { %2558 = vmatpush3.bf16.msra.mxu0 %v2728_v30  ;;  %v851_v54 = vmax.f32 %v625_v38, 0.0  ;;  %v629_v56 = vadd.f32 %v628_v50, %v121_v27  ;;  %2580 = vmatpush3.bf16.msra.mxu1 %v2729_v32  ;;  %v853_v62 = vmax.f32 %v668_v51, 0.0  ;;  %v672_v63 = vadd.f32 %v671_v58, %v129_v29  ;;  %v2750_v50 = vld [vmem:[%s3574_s3 + $0x240] sm:$0xff]  }
  0xfd   :  { %2559 = vmatprep.subr.bf16.mxu0 %v2730_v33  ;;  %v866_v61 = vmax.f32 %v627_v49, 0.0  ;;  %2581 = vmatprep.subr.bf16.mxu1 %v2731_v37  ;;  %v868_v2 = vmax.f32 %v670_v57, 0.0  ;;  %v2748_v37 = vld [vmem:[%s3574_s3 + $0x138] sm:$0xff]  }
  0xfe   :  { %v867_v1 = vmax.f32 %v629_v56, 0.0  ;;  %v869_v5 = vmax.f32 %v672_v63, 0.0  ;;  %v2749_v49 = vld [vmem:[%s3574_s3 + $0x1b8] sm:$0xff]   ;;  %v2754_v63 = vld [vmem:[%s3574_s3 + $0x248] sm:$0xff]  }
  0xff   :  { %v3264_v4 = vpack.c.bf16 %v866_v61, %v850_v48  ;;  %v3269_v3 = vpack.c.bf16 %v868_v2, %v852_v55  ;;  %v2756_v2 = vld [vmem:[%s3574_s3 + $0x208] sm:$0xff]  }
 0x100   :  { %2560 = vmatpush3.bf16.msra.mxu0 %v2732_v53  ;;  %v883_v7 = vpack.c.bf16 %v867_v1, %v851_v54  ;;  %2582 = vmatpush3.bf16.msra.mxu1 %v2733_v59  ;;  %v885_v10 = vpack.c.bf16 %v869_v5, %v853_v62  ;;  %v2751_v54 = vld [vmem:[%s3574_s3 + $0x2c0] sm:$0xff]   ;;  %v2755_v1 = vld [vmem:[%s3574_s3 + $0x2c8] sm:$0xff]  }
 0x101   :  { %2561 = vmatprep.subr.bf16.mxu0 %v2734_v60  ;;  %2583 = vmatprep.subr.bf16.mxu1 %v2735_v0  ;;  %v2752_v59 = vld [vmem:[%s3574_s3 + $0x200] sm:$0xff]   ;;  %v2757_v5 = vld [vmem:[%s3574_s3 + $0x288] sm:$0xff]  }
 0x102   :  { %2039 = vmatprep.mubr.bf16.mxu0 %v883_v7  ;;  %2080 = vmatprep.mubr.bf16.mxu1 %v885_v10  ;;  %v2753_v62 = vld [vmem:[%s3574_s3 + $0x280] sm:$0xff]   ;;  %v2759_v7 = vld [vmem:[%s3574_s3 + $0x2d0] sm:$0xff]  }
 0x104   :  { %2562 = vmatpush3.bf16.msra.mxu0 %v2736_v6  ;;  %2584 = vmatpush3.bf16.msra.mxu1 %v2737_v8  ;;  %v2758_v6 = vld [vmem:[%s3574_s3 + $0x250] sm:$0xff]   ;;  %v157_v8 = vrot.slane %v3283_v12, %v124_v20  ;;  %v2762_v20 = vld [vmem:[%s3574_s3 + $0x258] sm:$0xff]  }
 0x105   :  { %2563 = vmatprep.subr.bf16.mxu0 %v2738_v9  ;;  %2585 = vmatprep.subr.bf16.mxu1 %v2739_v11  ;;  %v161_v9 = vrot.slane %v3283_v12, %v128_v21  ;;  %v2763_v21 = vld [vmem:[%s3574_s3 + $0x2d8] sm:$0xff]  }
 0x108   :  { %2564 = vmatpush3.bf16.msra.mxu0 %v2740_v13  ;;  %v708_v24 = vpop.f32.mrb[8].mxu0  ;;  %2586 = vmatpush3.bf16.msra.mxu1 %v2741_v14  ;;  %v751_v27 = vpop.f32.mrb[8].mxu1 }
 0x109   :  { %2565 = vmatprep.subr.bf16.mxu0 %v2742_v15  ;;  %v709_v25 = vadd.f32 %v708_v24, %v133_v16  ;;  %v710_v26 = vpop.f32.mrb[9].mxu0  ;;  %2587 = vmatprep.subr.bf16.mxu1 %v2743_v17  ;;  %v752_v30 = vadd.f32 %v751_v27, %v141_v22  ;;  %v753_v31 = vpop.f32.mrb[9].mxu1  ;;  %v2764_v24 = vld [vmem:[%s3574_s3 + $0x218] sm:$0xff]  }
 0x10a   :  { %v711_v28 = vadd.f32 %v710_v26, %v137_v18  ;;  %v712_v29 = vpop.f32.mrb[10].mxu0  ;;  %v754_v35 = vadd.f32 %v753_v31, %v145_v23  ;;  %v755_v36 = vpop.f32.mrb[10].mxu1 }
 0x10b   :  { %v854_v32 = vmax.f32 %v709_v25, 0.0  ;;  %v713_v33 = vadd.f32 %v712_v29, %v133_v16  ;;  %v714_v34 = vpop.f32.mrb[11].mxu0  ;;  %v856_v39 = vmax.f32 %v752_v30, 0.0  ;;  %v756_v47 = vadd.f32 %v755_v36, %v141_v22  ;;  %v757_v48 = vpop.f32.mrb[11].mxu1 }
 0x10c   :  { %2566 = vmatpush3.bf16.msra.mxu0 %v2744_v41  ;;  %v855_v38 = vmax.f32 %v711_v28, 0.0  ;;  %v715_v42 = vadd.f32 %v714_v34, %v137_v18  ;;  %2588 = vmatpush3.bf16.msra.mxu1 %v2745_v45  ;;  %v857_v52 = vmax.f32 %v754_v35, 0.0  ;;  %v758_v53 = vadd.f32 %v757_v48, %v145_v23  ;;  %v2766_v28 = vld [vmem:[%s3574_s3 + $0x260] sm:$0xff]  }
 0x10d   :  { %2567 = vmatprep.subr.bf16.mxu0 %v2746_v44  ;;  %v870_v51 = vmax.f32 %v713_v33, 0.0  ;;  %2589 = vmatprep.subr.bf16.mxu1 %v2747_v46  ;;  %v872_v56 = vmax.f32 %v756_v47, 0.0  ;;  %v2765_v46 = vld [vmem:[%s3574_s3 + $0x298] sm:$0xff]   ;;  %v2770_v47 = vld [vmem:[%s3574_s3 + $0x268] sm:$0xff]  }
 0x10e   :  { %v871_v55 = vmax.f32 %v715_v42, 0.0  ;;  %v873_v58 = vmax.f32 %v758_v53, 0.0  ;;  %v2769_v42 = vld [vmem:[%s3574_s3 + $0x2a0] sm:$0xff]   ;;  %v2775_v53 = vld [vmem:[%s3574_s3 + $0x2f0] sm:$0xff]  }
 0x10f   :  { %v3333_v57 = vpack.c.bf16 %v870_v51, %v854_v32  ;;  %v3338_v61 = vpack.c.bf16 %v872_v56, %v856_v39  ;;  %v2767_v32 = vld [vmem:[%s3574_s3 + $0x2e0] sm:$0xff]   ;;  %v2773_v51 = vld [vmem:[%s3574_s3 + $0x2a8] sm:$0xff]   ;;  %v2778_v56 = vld [vmem:[%s3574_s3 + $0x278] sm:$0xff]  }
 0x110   :  { %2568 = vmatpush3.bf16.msra.mxu0 %v2748_v37  ;;  %v887_v60 = vpack.c.bf16 %v871_v55, %v855_v38  ;;  %2590 = vmatpush3.bf16.msra.mxu1 %v2749_v49  ;;  %v889_v0 = vpack.c.bf16 %v873_v58, %v857_v52  ;;  %v2768_v37 = vld [vmem:[%s3574_s3 + $0x220] sm:$0xff]   ;;  %v2771_v49 = vld [vmem:[%s3574_s3 + $0x2e8] sm:$0xff]   ;;  %v2774_v52 = vld [vmem:[%s3574_s3 + $0x270] sm:$0xff]  }
 0x111   :  { %2597 = vmatprep.subr.bf16.mxu0 %v2750_v50  ;;  %2619 = vmatprep.subr.bf16.mxu1 %v2751_v54  ;;  %v2772_v50 = vld [vmem:[%s3574_s3 + $0x228] sm:$0xff]   ;;  %v2776_v54 = vld [vmem:[%s3574_s3 + $0x230] sm:$0xff]   ;;  %v2779_v58 = vld [vmem:[%s3574_s3 + $0x2f8] sm:$0xff]  }
 0x112   :  { %v2777_v55 = vld [vmem:[%s3574_s3 + $0x2b0] sm:$0xff]  }
 0x113   :  { %2040 = vmatmul.mubr.bf16.vlgmr.msra.gmra.mrb[20].mxu0 %v3264_v4  ;;  %2081 = vmatmul.mubr.bf16.vlgmr.msra.gmra.mrb[20].mxu1 %v3269_v3  ;;  %v149_v4 = vrot.slane %v3283_v12, %v116_v43  ;;  %v153_v3 = vrot.slane %v3283_v12, %v120_v19  ;;  %v2760_v43 = vld [vmem:[%s3574_s3 + $0x210] sm:$0xff]  }
 0x114   :  { %2598 = vmatpush3.bf16.msra.mxu0 %v2752_v59  ;;  %2620 = vmatpush3.bf16.msra.mxu1 %v2753_v62  ;;  %v2761_v19 = vld [vmem:[%s3574_s3 + $0x290] sm:$0xff]   ;;  %v2780_v59 = vld [vmem:[%s3574_s3 + $0x238] sm:$0xff]   ;;  %v2782_v62 = vld [vmem:[%s3574_s3 + $0x340] sm:$0xff]  }
 0x115   :  { %2599 = vmatprep.subr.bf16.mxu0 %v2754_v63  ;;  %2621 = vmatprep.subr.bf16.mxu1 %v2755_v1  ;;  %v2783_v63 = vld [vmem:[%s3574_s3 + $0x3c0] sm:$0xff]  }
 0x116   :  { %2121 = vmatprep.mubr.bf16.mxu0 %v887_v60  ;;  %2162 = vmatprep.mubr.bf16.mxu1 %v889_v0  ;;  %v2781_v60 = vld [vmem:[%s3574_s3 + $0x2b8] sm:$0xff]   ;;  %v2784_v0 = vld [vmem:[%s3574_s3 + $0x300] sm:$0xff]  }
 0x117   :  { %v2785_v1 = vld [vmem:[%s3574_s3 + $0x380] sm:$0xff]  }
 0x118   :  { %2600 = vmatpush3.bf16.msra.mxu0 %v2756_v2  ;;  %v794_v10 = vpop.f32.mrb[12].mxu0  ;;  %2622 = vmatpush3.bf16.msra.mxu1 %v2757_v5  ;;  %v837_v13 = vpop.f32.mrb[12].mxu1  ;;  %v2786_v2 = vld [vmem:[%s3574_s3 + $0x348] sm:$0xff]  }
 0x119   :  { %2601 = vmatprep.subr.bf16.mxu0 %v2758_v6  ;;  %v795_v11 = vadd.f32 %v794_v10, %v149_v4  ;;  %v796_v40 = vpop.f32.mrb[13].mxu0  ;;  %2623 = vmatprep.subr.bf16.mxu1 %v2759_v7  ;;  %v838_v15 = vadd.f32 %v837_v13, %v157_v8  ;;  %v839_v16 = vpop.f32.mrb[13].mxu1  ;;  %v2787_v5 = vld [vmem:[%s3574_s3 + $0x3c8] sm:$0xff]   ;;  %v2790_v7 = vld [vmem:[%s3574_s3 + $0x350] sm:$0xff]   ;;  %v2797_v10 = vld [vmem:[%s3574_s3 + $0x398] sm:$0xff]  }
 0x11a   :  { %v797_v12 = vadd.f32 %v796_v40, %v153_v3  ;;  %v798_v14 = vpop.f32.mrb[14].mxu0  ;;  %v840_v23 = vadd.f32 %v839_v16, %v161_v9  ;;  %v841_v41 = vpop.f32.mrb[14].mxu1  ;;  %v2788_v6 = vld [vmem:[%s3574_s3 + $0x308] sm:$0xff]   ;;  %v2801_v40 = vld [vmem:[%s3574_s3 + $0x3a0] sm:$0xff]   ;;  %v2807_v16 = vld [vmem:[%s3574_s3 + $0x3f0] sm:$0xff]  }
 0x11b   :  { %v858_v17 = vmax.f32 %v795_v11, 0.0  ;;  %v799_v18 = vadd.f32 %v798_v14, %v149_v4  ;;  %v800_v22 = vpop.f32.mrb[15].mxu0  ;;  %v860_v44 = vmax.f32 %v838_v15, 0.0  ;;  %v842_v26 = vadd.f32 %v841_v41, %v157_v8  ;;  %v843_v27 = vpop.f32.mrb[15].mxu1  ;;  %v2789_v4 = vld [vmem:[%s3574_s3 + $0x388] sm:$0xff]   ;;  %v2794_v8 = vld [vmem:[%s3574_s3 + $0x358] sm:$0xff]  }
 0x11c   :  { %2602 = vmatpush3.bf16.msra.mxu0 %v2760_v43  ;;  %v859_v45 = vmax.f32 %v797_v12, 0.0  ;;  %v801_v25 = vadd.f32 %v800_v22, %v153_v3  ;;  %2624 = vmatpush3.bf16.msra.mxu1 %v2761_v19  ;;  %v861_v30 = vmax.f32 %v840_v23, 0.0  ;;  %v844_v31 = vadd.f32 %v843_v27, %v161_v9  ;;  %v2793_v3 = vld [vmem:[%s3574_s3 + $0x390] sm:$0xff]   ;;  %v2795_v9 = vld [vmem:[%s3574_s3 + $0x3d8] sm:$0xff]   ;;  %v2798_v19 = vld [vmem:[%s3574_s3 + $0x360] sm:$0xff]  }
 0x11d   :  { %2603 = vmatprep.subr.bf16.mxu0 %v2762_v20  ;;  %v874_v29 = vmax.f32 %v799_v18, 0.0  ;;  %2625 = vmatprep.subr.bf16.mxu1 %v2763_v21  ;;  %v876_v34 = vmax.f32 %v842_v26, 0.0  ;;  %v2796_v43 = vld [vmem:[%s3574_s3 + $0x318] sm:$0xff]   ;;  %v2799_v20 = vld [vmem:[%s3574_s3 + $0x3e0] sm:$0xff]   ;;  %v2802_v13 = vld [vmem:[%s3574_s3 + $0x368] sm:$0xff]  }
 0x11e   :  { %v875_v33 = vmax.f32 %v801_v25, 0.0  ;;  %v877_v36 = vmax.f32 %v844_v31, 0.0  ;;  %v2800_v11 = vld [vmem:[%s3574_s3 + $0x320] sm:$0xff]   ;;  %v2803_v21 = vld [vmem:[%s3574_s3 + $0x3e8] sm:$0xff]   ;;  %v2806_v15 = vld [vmem:[%s3574_s3 + $0x370] sm:$0xff]  }
 0x11f   :  { %v3399_v35 = vpack.c.bf16 %v874_v29, %v858_v17  ;;  %v3404_v39 = vpack.c.bf16 %v876_v34, %v860_v44  ;;  %v2804_v12 = vld [vmem:[%s3574_s3 + $0x328] sm:$0xff]   ;;  %v2808_v17 = vld [vmem:[%s3574_s3 + $0x330] sm:$0xff]   ;;  %v2810_v22 = vld [vmem:[%s3574_s3 + $0x378] sm:$0xff]  }
 0x120   :  { %2604 = vmatpush3.bf16.msra.mxu0 %v2764_v24  ;;  %v891_v38 = vpack.c.bf16 %v875_v33, %v859_v45  ;;  %2626 = vmatpush3.bf16.msra.mxu1 %v2765_v46  ;;  %v893_v48 = vpack.c.bf16 %v877_v36, %v861_v30  ;;  %v2805_v14 = vld [vmem:[%s3574_s3 + $0x3a8] sm:$0xff]   ;;  %v2809_v18 = vld [vmem:[%s3574_s3 + $0x3b0] sm:$0xff]   ;;  %v2811_v23 = vld [vmem:[%s3574_s3 + $0x3f8] sm:$0xff]  }
 0x121   :  { %2605 = vmatprep.subr.bf16.mxu0 %v2766_v28  ;;  %2627 = vmatprep.subr.bf16.mxu1 %v2767_v32  ;;  %v2812_v41 = vld [vmem:[%s3574_s3 + $0x338] sm:$0xff]   ;;  %v2378_v25 = vld [vmem:[%s3576_s4] ss:$0 sm:$0xff] }
 0x122   :  { %v2813_v24 = vld [vmem:[%s3574_s3 + $0x3b8] sm:$0xff]  }
 0x124   :  { %2606 = vmatpush3.bf16.msra.mxu0 %v2768_v37  ;;  %2628 = vmatpush3.bf16.msra.mxu1 %v2769_v42 }
 0x125   :  { %2607 = vmatprep.subr.bf16.mxu0 %v2770_v47  ;;  %2629 = vmatprep.subr.bf16.mxu1 %v2771_v49 }
 0x128   :  { %2608 = vmatpush3.bf16.msra.mxu0 %v2772_v50  ;;  %2630 = vmatpush3.bf16.msra.mxu1 %v2773_v51 }
 0x129   :  { %2609 = vmatprep.subr.bf16.mxu0 %v2774_v52  ;;  %2631 = vmatprep.subr.bf16.mxu1 %v2775_v53 }
 0x12c   :  { %2610 = vmatpush3.bf16.msra.mxu0 %v2776_v54  ;;  %2632 = vmatpush3.bf16.msra.mxu1 %v2777_v55 }
 0x12d   :  { %2611 = vmatprep.subr.bf16.mxu0 %v2778_v56  ;;  %2633 = vmatprep.subr.bf16.mxu1 %v2779_v58 }
 0x130   :  { %2612 = vmatpush3.bf16.msra.mxu0 %v2780_v59  ;;  %2634 = vmatpush3.bf16.msra.mxu1 %v2781_v60 }
 0x131   :  { %2641 = vmatprep.subr.bf16.mxu0 %v2782_v62  ;;  %2663 = vmatprep.subr.bf16.mxu1 %v2783_v63 }
 0x133   :  { %2122 = vmatmul.mubr.bf16.vlgmr.msra.gmra.mrb[24].mxu0 %v3333_v57  ;;  %2163 = vmatmul.mubr.bf16.vlgmr.msra.gmra.mrb[24].mxu1 %v3338_v61  ;;  %v2791_v57 = vld [vmem:[%s3574_s3 + $0x3d0] sm:$0xff]  }
 0x134   :  { %2642 = vmatpush3.bf16.msra.mxu0 %v2784_v0  ;;  %2664 = vmatpush3.bf16.msra.mxu1 %v2785_v1  ;;  %v2792_v61 = vld [vmem:[%s3574_s3 + $0x310] sm:$0xff]  }
 0x135   :  { %2643 = vmatprep.subr.bf16.mxu0 %v2786_v2  ;;  %2665 = vmatprep.subr.bf16.mxu1 %v2787_v5 }
 0x136   :  { %2203 = vmatprep.mubr.bf16.mxu0 %v891_v38  ;;  %2244 = vmatprep.mubr.bf16.mxu1 %v893_v48 }
 0x138   :  { %2644 = vmatpush3.bf16.msra.mxu0 %v2788_v6  ;;  %2666 = vmatpush3.bf16.msra.mxu1 %v2789_v4 }
 0x139   :  { %2645 = vmatprep.subr.bf16.mxu0 %v2790_v7  ;;  %2667 = vmatprep.subr.bf16.mxu1 %v2791_v57 }
 0x13c   :  { %2646 = vmatpush3.bf16.msra.mxu0 %v2792_v61  ;;  %2668 = vmatpush3.bf16.msra.mxu1 %v2793_v3 }
 0x13d   :  { %2647 = vmatprep.subr.bf16.mxu0 %v2794_v8  ;;  %2669 = vmatprep.subr.bf16.mxu1 %v2795_v9 }
 0x140   :  { %2648 = vmatpush3.bf16.msra.mxu0 %v2796_v43  ;;  %2670 = vmatpush3.bf16.msra.mxu1 %v2797_v10 }
 0x141   :  { %2649 = vmatprep.subr.bf16.mxu0 %v2798_v19  ;;  %2671 = vmatprep.subr.bf16.mxu1 %v2799_v20 }
 0x144   :  { %2650 = vmatpush3.bf16.msra.mxu0 %v2800_v11  ;;  %2672 = vmatpush3.bf16.msra.mxu1 %v2801_v40 }
 0x145   :  { %2651 = vmatprep.subr.bf16.mxu0 %v2802_v13  ;;  %2673 = vmatprep.subr.bf16.mxu1 %v2803_v21 }
 0x148   :  { %2652 = vmatpush3.bf16.msra.mxu0 %v2804_v12  ;;  %2674 = vmatpush3.bf16.msra.mxu1 %v2805_v14 }
 0x149   :  { %2653 = vmatprep.subr.bf16.mxu0 %v2806_v15  ;;  %2675 = vmatprep.subr.bf16.mxu1 %v2807_v16 }
 0x14c   :  { %2654 = vmatpush3.bf16.msra.mxu0 %v2808_v17  ;;  %2676 = vmatpush3.bf16.msra.mxu1 %v2809_v18 }
 0x14d   :  { %2655 = vmatprep.subr.bf16.mxu0 %v2810_v22  ;;  %2677 = vmatprep.subr.bf16.mxu1 %v2811_v23 }
 0x150   :  { %2656 = vmatpush3.bf16.msra.mxu0 %v2812_v41  ;;  %2678 = vmatpush3.bf16.msra.mxu1 %v2813_v24 }
 0x153   :  { %2204 = vmatmul.mubr.bf16.vlgmr.msra.gmra.mrb[28].mxu0 %v3399_v35  ;;  %2245 = vmatmul.mubr.bf16.vlgmr.msra.gmra.mrb[28].mxu1 %v3404_v39 }
 0x1c6   :  { %v2525_v45 = vpop.f32.mrb[16].mxu0  ;;  %v2547_v44 = vpop.f32.mrb[16].mxu1 }
 0x1c7   :  { %v2526_v26 = vpop.f32.mrb[17].mxu0  ;;  %v2548_v46 = vpop.f32.mrb[17].mxu1 }
 0x1c8   :  { %v2527_v27 = vadd.f32 %v2526_v26, %v2525_v45  ;;  %v2528_v28 = vpop.f32.mrb[18].mxu0  ;;  %v2549_v29 = vadd.f32 %v2548_v46, %v2547_v44  ;;  %v2550_v30 = vpop.f32.mrb[18].mxu1  ;;  %v2818_v44 = vld [vmem:[%s3573_s0] sm:$0xff] }
 0x1c9   :  { %v2529_v31 = vpop.f32.mrb[19].mxu0  ;;  %v2551_v34 = vpop.f32.mrb[19].mxu1 }
 0x1ca   :  { %v1960_v32 = vadd.f32 %v2527_v27, %v2378_v25  ;;  %v2530_v33 = vadd.f32 %v2529_v31, %v2528_v28  ;;  %v2552_v36 = vadd.f32 %v2551_v34, %v2550_v30  ;;  %v2819_v27 = vld [vmem:[%s3573_s0 + $0x8] sm:$0xff] }
 0x1cc   :  { %v2001_v35 = vadd.f32 %v2549_v29, %v1960_v32  ;;  %v1963_v37 = vadd.f32 %v2530_v33, %v2378_v25 }
 0x1ce   :  { %v2004_v38 = vadd.f32 %v2552_v36, %v1963_v37 }
 0x1e6   :  { %v2569_v39 = vpop.f32.mrb[20].mxu0  ;;  %v2591_v42 = vpop.f32.mrb[20].mxu1 }
 0x1e7   :  { %v2570_v47 = vpop.f32.mrb[21].mxu0  ;;  %v2592_v49 = vpop.f32.mrb[21].mxu1 }
 0x1e8   :  { %v2571_v48 = vadd.f32 %v2570_v47, %v2569_v39  ;;  %v2572_v50 = vpop.f32.mrb[22].mxu0  ;;  %v2593_v51 = vadd.f32 %v2592_v49, %v2591_v42  ;;  %v2594_v52 = vpop.f32.mrb[22].mxu1 }
 0x1e9   :  { %v2573_v53 = vpop.f32.mrb[23].mxu0  ;;  %v2595_v56 = vpop.f32.mrb[23].mxu1 }
 0x1ea   :  { %v2042_v54 = vadd.f32 %v2571_v48, %v2001_v35  ;;  %v2574_v55 = vadd.f32 %v2573_v53, %v2572_v50  ;;  %v2596_v58 = vadd.f32 %v2595_v56, %v2594_v52  ;;  %v2507_v52 = vld [vmem:[%s3577_s5] ss:$0 sm:$0xff] }
 0x1ec   :  { %v2083_v59 = vadd.f32 %v2593_v51, %v2042_v54  ;;  %v2045_v60 = vadd.f32 %v2574_v55, %v2004_v38  ;;  %v2508_v54 = vld [vmem:[%s3578_s6] ss:$0 sm:$0xff] }
 0x1ee   :  { %v2086_v62 = vadd.f32 %v2596_v58, %v2045_v60 }
 0x206   :  { %v2613_v63 = vpop.f32.mrb[24].mxu0  ;;  %v2635_v0 = vpop.f32.mrb[24].mxu1 }
 0x207   :  { %v2614_v1 = vpop.f32.mrb[25].mxu0  ;;  %v2636_v5 = vpop.f32.mrb[25].mxu1 }
 0x208   :  { %v2615_v2 = vadd.f32 %v2614_v1, %v2613_v63  ;;  %v2616_v6 = vpop.f32.mrb[26].mxu0  ;;  %v2637_v4 = vadd.f32 %v2636_v5, %v2635_v0  ;;  %v2638_v7 = vpop.f32.mrb[26].mxu1 }
 0x209   :  { %v2617_v57 = vpop.f32.mrb[27].mxu0  ;;  %v2639_v8 = vpop.f32.mrb[27].mxu1 }
 0x20a   :  { %v2124_v61 = vadd.f32 %v2615_v2, %v2083_v59  ;;  %v2618_v3 = vadd.f32 %v2617_v57, %v2616_v6  ;;  %v2640_v9 = vadd.f32 %v2639_v8, %v2638_v7 }
 0x20c   :  { %v2165_v43 = vadd.f32 %v2637_v4, %v2124_v61  ;;  %v2127_v10 = vadd.f32 %v2618_v3, %v2086_v62 }
 0x20e   :  { %v2168_v19 = vadd.f32 %v2640_v9, %v2127_v10 }
 0x226   :  { %v2657_v20 = vpop.f32.mrb[28].mxu0  ;;  %v2679_v11 = vpop.f32.mrb[28].mxu1 }
 0x227   :  { %v2658_v40 = vpop.f32.mrb[29].mxu0  ;;  %v2680_v21 = vpop.f32.mrb[29].mxu1 }
 0x228   :  { %v2659_v13 = vadd.f32 %v2658_v40, %v2657_v20  ;;  %v2660_v12 = vpop.f32.mrb[30].mxu0  ;;  %v2681_v14 = vadd.f32 %v2680_v21, %v2679_v11  ;;  %v2682_v15 = vpop.f32.mrb[30].mxu1 }
 0x229   :  { %v2661_v16 = vpop.f32.mrb[31].mxu0  ;;  %v2683_v22 = vpop.f32.mrb[31].mxu1 }
 0x22a   :  { %v2206_v17 = vadd.f32 %v2659_v13, %v2165_v43  ;;  %v2662_v18 = vadd.f32 %v2661_v16, %v2660_v12  ;;  %v2684_v23 = vadd.f32 %v2683_v22, %v2682_v15 }
 0x22c   :  { %v2247_v41 = vadd.f32 %v2681_v14, %v2206_v17  ;;  %v2209_v24 = vadd.f32 %v2662_v18, %v2168_v19 }
 0x22e   :  { %v2250_v45 = vadd.f32 %v2684_v23, %v2209_v24  ;;  %v2253_v25 = vadd.f32 %v2818_v44, %v2247_v41 }
 0x230   :  { %v2255_v26 = vsel %vm498_vm0, %v2253_v25, 0.0  ;;  %v2254_v46 = vadd.f32 %v2819_v27, %v2250_v45 }
 0x231   :  { %2256 = vadd.xlane.f32.xlu0 %v2255_v26 }
 0x232   :  { %v2258_v28 = vsel %vm498_vm0, %v2254_v46, 0.0 }
 0x235   :  { %2259 = vadd.xlane.f32.xlu0 %v2258_v28 }
 0x2be   :  { %v2257_v29 = vpop.xlane.xlu0 %2256 }
 0x2bf   :  { %v2262_v30 = vmul.f32 0.015625, %v2257_v29 }
 0x2c1   :  { %v2264_v31 = vsub.f32 %v2253_v25, %v2262_v30 }
 0x2c2   :  { %v2260_v32 = vpop.xlane.xlu0 %2259 }
 0x2c3   :  { %v2263_v33 = vmul.f32 0.015625, %v2260_v32  ;;  %v2266_v34 = vmul.f32 %v2264_v31, %v2264_v31 }
 0x2c5   :  { %v2265_v36 = vsub.f32 %v2254_v46, %v2263_v33  ;;  %v2268_v35 = vsel %vm498_vm0, %v2266_v34, 0.0 }
 0x2c6   :  { %2269 = vadd.xlane.f32.xlu1 %v2268_v35 }
 0x2c7   :  { %v2267_v37 = vmul.f32 %v2265_v36, %v2265_v36 }
 0x2c9   :  { %v2271_v38 = vsel %vm498_vm0, %v2267_v37, 0.0 }
 0x2ca   :  { %2272 = vadd.xlane.f32.xlu1 %v2271_v38 }
 0x353   :  { %v2270_v39 = vpop.xlane.xlu1 %2269 }
 0x354   :  { %v2274_v42 = vmul.f32 0.015625, %v2270_v39 }
 0x356   :  { %v2276_v47 = vadd.f32 1e-05, %v2274_v42 }
 0x357   :  { %v2273_v48 = vpop.xlane.xlu1 %2272 }
 0x358   :  { %2814 = vrsqrt.f32 %v2276_v47  ;;  %v2275_v49 = vmul.f32 0.015625, %v2273_v48 }
 0x35a   :  { %v2277_v50 = vadd.f32 1e-05, %v2275_v49 }
 0x35c   :  { %2816 = vrsqrt.f32 %v2277_v50 }
 0x362   :  { %v2815_v51 = vpop.eup %2814 }
 0x363   :  { %v2280_v53 = vmul.f32 %v2815_v51, %v2264_v31 }
 0x365   :  { %v2289_v55 = vmul.f32 %v2507_v52, %v2280_v53 }
 0x366   :  { %v2817_v56 = vpop.eup %2816 }
 0x367   :  { %v2298_v58 = vadd.f32 %v2508_v54, %v2289_v55  ;;  %v2281_v59 = vmul.f32 %v2817_v56, %v2265_v36 }
 0x369   :  { %2300 = vst.msk [vmem:[%s3579_s7] sm:$0xff] %vm498_vm0, %v2298_v58  ;;  %v2290_v60 = vmul.f32 %v2507_v52, %v2281_v59 }
 0x36b   :  { %v2299_v62 = vadd.f32 %v2508_v54, %v2290_v60 }
 0x36d   :  { %2301 = vst.msk [vmem:[%s3579_s7 + $0x8] sm:$0xff] %vm498_vm0, %v2299_v62 }

// kernel: vit4d_forward.11
= control target key start
LH: loop header
LB: loop body
LE: loop exit
PB: predicated region body
PF: predicated region fallthrough
CT: control target
= control target key end

     0   :  { %v161_v1 = vmov 0   ;;  %vm82_vm0 = vcmask 523264   ;;  %v27_v10 = vlaneseq  ;;  %s224_s1 = inlined_call_operand.vmem [shape: bf16[64,256], index: 1, kind: input, shape index: {}]   ;;  %s225_s0 = inlined_call_operand.vmem [shape: bf16[16,64], index: 0, kind: input, shape index: {}]   ;;  %s226_s2 = inlined_call_operand.vmem [shape: f32[1,256], index: 2, kind: input, shape index: {}]   ;;  %s227_s3 = inlined_call_operand.vmem [shape: f32[16,256], index: 3, kind: output, shape index: {}]  }
   0x1   :  { %v148_v0 = vld [vmem:[%s224_s1 + $0x4] ss:$8 sps:$4 sm:$0xff]   ;;  %118 = vmatprep.mubr.bf16.mxu0 %v161_v1  ;;  %v150_v2 = vld [vmem:[%s224_s1] ss:$8 sps:$4 sm:$0xff]   ;;  %v151_v3 = vld [vmem:[%s224_s1 + $0x14] ss:$8 sps:$4 sm:$0xff]  }
   0x2   :  { %86 = vmatprep.subr.bf16.mxu0 %v148_v0  ;;  %v153_v4 = vld [vmem:[%s224_s1 + $0x10] ss:$8 sps:$4 sm:$0xff]   ;;  %v154_v5 = vld [vmem:[%s224_s1 + $0x24] ss:$8 sps:$4 sm:$0xff]   ;;  %v156_v6 = vld [vmem:[%s224_s1 + $0x20] ss:$8 sps:$4 sm:$0xff]  }
   0x3   :  { %87 = vmatpush1.bf16.msra.mxu0 %v150_v2  ;;  %v157_v7 = vld [vmem:[%s224_s1 + $0x34] ss:$8 sps:$4 sm:$0xff]   ;;  %v159_v8 = vld [vmem:[%s224_s1 + $0x30] ss:$8 sps:$4 sm:$0xff]   ;;  %v160_v9 = vld [vmem:[%s225_s0] sm:$0xff]   ;;  %v28_v11 = vshrl.u32 %v27_v10, 7 }
   0x4   :  { %88 = vmatprep.subr.bf16.mxu0 %v151_v3  ;;  %v25_v13 = vld [vmem:[%s226_s2] sm:$0x3] }
   0x5   :  { %v29_v12 = vsub.s32 0, %v28_v11  ;;  %v33_v14 = vsub.s32 1, %v28_v11 }
   0x7   :  { %89 = vmatpush1.bf16.msra.mxu0 %v153_v4  ;;  %v30_v15 = vrot.slane %v25_v13, %v29_v12  ;;  %v34_v16 = vrot.slane %v25_v13, %v33_v14 }
   0x8   :  { %90 = vmatprep.subr.bf16.mxu0 %v154_v5 }
   0xb   :  { %91 = vmatpush1.bf16.msra.mxu0 %v156_v6 }
   0xc   :  { %92 = vmatprep.subr.bf16.mxu0 %v157_v7 }
   0xf   :  { %93 = vmatpush1.bf16.msra.mxu0 %v159_v8 }
  0x12   :  { %146 = vmatmul.mubr.msk.bf16.vlgmr.msra.gmra.mrb[0].mxu0 %vm82_vm0, %v160_v9 }
  0xe5   :  { %v120_v17 = vpop.f32.mrb[0].mxu0 }
  0xe6   :  { %v121_v18 = vadd.f32 %v120_v17, %v30_v15  ;;  %v122_v19 = vpop.f32.mrb[1].mxu0 }
  0xe7   :  { %v123_v20 = vadd.f32 %v122_v19, %v34_v16  ;;  %v124_v21 = vpop.f32.mrb[2].mxu0 }
  0xe8   :  { %129 = vst [vmem:[%s227_s3] sm:$0xff] %v121_v18  ;;  %v125_v22 = vadd.f32 %v124_v21, %v30_v15  ;;  %v126_v23 = vpop.f32.mrb[3].mxu0 }
  0xe9   :  { %130 = vst [vmem:[%s227_s3 + $0x8] sm:$0xff] %v123_v20  ;;  %v127_v24 = vadd.f32 %v126_v23, %v34_v16 }
  0xea   :  { %131 = vst [vmem:[%s227_s3 + $0x10] sm:$0xff] %v125_v22 }
  0xeb   :  { %132 = vst [vmem:[%s227_s3 + $0x18] sm:$0xff] %v127_v24 }

</bundles_post_ra>
